<compile_context>
chip_gen: v5e
topology: v5e:2x2
jax: 0.10.0
libtpu: 0.0.40
codegen_flags: <defaults>
</compile_context>

<pallas_src>
import jax
import jax.numpy as jnp
from jax import lax
from jax.experimental import pallas as pl
from jax.experimental.pallas import tpu as pltpu


# ----------------------------------------------------------------------------
# Pallas kernels
# ----------------------------------------------------------------------------

def _run_gru_stack(x_ref, w_ih_ref, w_hh_ref, b_i_ref, b_hn_ref, seq_ref, gi_ref):
    """Run all GRU layers on one batch tile; return final layer h_T (Bt, P) f32.

    x_ref   : (T, Bt, P)      time-major, zero-padded input tile
    w_ih_ref: (L, P, 3P)      pre-transposed, gate-slab-aligned
    w_hh_ref: (L, P, 3P)
    b_i_ref : (L, 1, 3P)      b_ih with b_hh(r,z) folded in
    b_hn_ref: (L, 1, P)       b_hh of the n gate
    seq_ref : (T, Bt, P)      VMEM scratch: inter-layer activations
    gi_ref  : (T, Bt, 3P)     VMEM scratch: hoisted input projections
    """
    T, B, P = x_ref.shape
    L = w_ih_ref.shape[0]
    P2, P3 = 2 * P, 3 * P

    h_last = jnp.zeros((B, P), jnp.float32)
    for layer in range(L):                       # static layer count
        w_ih = w_ih_ref[layer]                   # (P, 3P)
        w_hh = w_hh_ref[layer]                   # (P, 3P)
        b_i = b_i_ref[layer]                     # (1, 3P)
        # Hoisted: broadcast_in_dim is not CSE'd, keep it out of the hot loop.
        b_hn_b = jnp.broadcast_to(b_hn_ref[layer], (B, P))

        # Hoisted input projection for the whole sequence: one big MXU matmul.
        # Layer 0 reads straight from the input block (no seq copy).
        src_ref = x_ref if layer == 0 else seq_ref
        x2d = src_ref[...].reshape(T * B, P)
        gi_ref[...] = (
            jnp.dot(x2d, w_ih, preferred_element_type=jnp.float32) + b_i
        ).reshape(T, B, P3)

        write_seq = layer < L - 1                # last layer: skip the store

        def step(t, h):
            gi = gi_ref[t]                                              # (B, 3P)
            gh = jnp.dot(h, w_hh, preferred_element_type=jnp.float32)   # (B, 3P)
            # One fused sigmoid over the contiguous r|z slab (halves EUP pushes).
            rz = jax.nn.sigmoid(gi[:, :P2] + gh[:, :P2])
            r = rz[:, :P]
            z = rz[:, P:]
            n = jnp.tanh(gi[:, P2:] + r * (gh[:, P2:] + b_hn_b))
            h_new = (1.0 - z) * n + z * h
            if write_seq:
                seq_ref[t] = h_new          # next layer's input, stays in VMEM
            return h_new

        h_last = lax.fori_loop(0, T, step, jnp.zeros((B, P), jnp.float32),
                               unroll=min(T, 8))
    return h_last


def gru_ts_head_kernel(x_ref, w_ih_ref, w_hh_ref, b_i_ref, b_hn_ref,
                       w_gru_ref, b_gru_ref, out_ref, seq_ref, gi_ref):
    """GRU stack + fc_gru head (x_non_ts is None path)."""
    h = _run_gru_stack(x_ref, w_ih_ref, w_hh_ref, b_i_ref, b_hn_ref, seq_ref, gi_ref)
    out_ref[...] = (
        jnp.dot(h, w_gru_ref[...], preferred_element_type=jnp.float32)
        + b_gru_ref[...]
    ).astype(out_ref.dtype)


def gru_combined_head_kernel(x_ref, x_nts_ref, w_ih_ref, w_hh_ref, b_i_ref, b_hn_ref,
                             w_nts_ref, b_nts_ref, w_ch_ref, w_cn_ref, b_c_ref,
                             out_ref, seq_ref, gi_ref):
    """GRU stack + fc_non_ts + concat + fc_combined head (x_non_ts given path)."""
    h = _run_gru_stack(x_ref, w_ih_ref, w_hh_ref, b_i_ref, b_hn_ref, seq_ref, gi_ref)
    nts = (
        jnp.dot(x_nts_ref[...], w_nts_ref[...], preferred_element_type=jnp.float32)
        + b_nts_ref[...]
    )
    # concat([h, nts]) @ W_comb.T == h @ W_comb[:, :H].T + nts @ W_comb[:, H:].T
    out_ref[...] = (
        jnp.dot(h, w_ch_ref[...], preferred_element_type=jnp.float32)
        + jnp.dot(nts, w_cn_ref[...], preferred_element_type=jnp.float32)
        + b_c_ref[...]
    ).astype(out_ref.dtype)


# ----------------------------------------------------------------------------
# Wrapper: weight packing (transpose + pad + gate alignment) and pallas_call
# ----------------------------------------------------------------------------

def _ru(n, m):
    return ((n + m - 1) // m) * m


def _pad2(x, rows, cols):
    return jnp.pad(x, ((0, rows - x.shape[0]), (0, cols - x.shape[1])))


def _prep_gate_weight(w, h, p):
    # w: (3H, D_in) PyTorch layout -> (P, 3P): transposed, each gate slab
    # zero-padded so it starts on a lane multiple of P.
    blocks = [_pad2(w[g * h:(g + 1) * h, :].T, p, p) for g in range(3)]
    return jnp.concatenate(blocks, axis=1)


def _prep_gate_bias(b, h, p):
    # b: (3H,) -> (1, 3P), per-gate zero padding.
    blocks = [jnp.pad(b[g * h:(g + 1) * h], (0, p - h)) for g in range(3)]
    return jnp.concatenate(blocks)[None, :]


def _pack_kernel_params(params, input_dim, hidden_dim, output_dim, non_ts_input_dim):
    H, D, O = hidden_dim, input_dim, output_dim
    P = max(_ru(D, 128), _ru(H, 128))
    O_pad = _ru(O, 128)

    w_ih, w_hh, b_i, b_hn = [], [], [], []
    for layer in params["gru"]:
        w_ih.append(_prep_gate_weight(layer["w_ih"], H, P))
        w_hh.append(_prep_gate_weight(layer["w_hh"], H, P))
        bhh = layer["b_hh"]
        # fold b_hh of the r/z gates into the hoisted input-projection bias,
        # keep b_hn separate for the n gate (PyTorch semantics).
        b_fold = layer["b_ih"] + jnp.concatenate(
            [bhh[:H], bhh[H:2 * H], jnp.zeros((H,), bhh.dtype)])
        b_i.append(_prep_gate_bias(b_fold, H, P))
        b_hn.append(jnp.pad(bhh[2 * H:], (0, P - H))[None, :])

    packed = {
        "P": P, "O_pad": O_pad,
        "w_ih": jnp.stack(w_ih), "w_hh": jnp.stack(w_hh),
        "b_i": jnp.stack(b_i), "b_hn": jnp.stack(b_hn),
        "w_gru": _pad2(params["fc_gru_w"].T, P, O_pad),
        "b_gru": jnp.pad(params["fc_gru_b"], (0, O_pad - O))[None, :],
    }
    if non_ts_input_dim is not None:
        NTS_pad = _ru(non_ts_input_dim, 128)
        wc = params["fc_combined_w"]                       # (O, 2H)
        packed["NTS_pad"] = NTS_pad
        packed["w_nts"] = _pad2(params["fc_non_ts_w"].T, NTS_pad, P)
        packed["b_nts"] = jnp.pad(params["fc_non_ts_b"], (0, P - H))[None, :]
        packed["w_ch"] = _pad2(wc[:, :H].T, P, O_pad)
        packed["w_cn"] = _pad2(wc[:, H:].T, P, O_pad)
        packed["b_c"] = jnp.pad(params["fc_combined_b"], (0, O_pad - O))[None, :]
    return packed


def _rep_spec(arr):
    """Replicated (grid-invariant) full-array block."""
    nd = arr.ndim
    return pl.BlockSpec(tuple(arr.shape), lambda b, _nd=nd: (0,) * _nd)


def _vmem_limit_bytes(T, Bt, P, O_pad, kp, use_nts):
    f32 = 4
    total = T * Bt * P * f32 + T * Bt * 3 * P * f32          # seq + gi scratch
    total += 2 * T * Bt * P * f32                            # x block (dbl-buf)
    total += 2 * f32 * (kp["w_ih"].size + kp["w_hh"].size
                        + kp["b_i"].size + kp["b_hn"].size)
    if use_nts:
        total += 2 * f32 * (kp["w_nts"].size + kp["b_nts"].size + kp["w_ch"].size
                            + kp["w_cn"].size + kp["b_c"].size + Bt * kp["NTS_pad"])
    else:
        total += 2 * f32 * (kp["w_gru"].size + kp["b_gru"].size)
    total += 2 * Bt * O_pad * f32                            # output block
    # 25% headroom, floor 16 MiB, cap 64 MiB (v7x physical per-TC VMEM).
    return int(min(max(total * 5 // 4 + (2 << 20), 16 << 20), 64 << 20))


def time_series_gru_forward(params, x_ts, x_non_ts=None):
    """Mirrors TimeSeriesGRU.forward (inference mode)."""
    B, T, D = x_ts.shape
    H = params["gru"][0]["w_hh"].shape[1]
    O = params["fc_gru_w"].shape[0]
    use_nts = x_non_ts is not None
    NTS = params["fc_non_ts_w"].shape[1] if use_nts else None

    kp = _pack_kernel_params(params, D, H, O, NTS)
    P, O_pad = kp["P"], kp["O_pad"]

    # Batch tiling: one grid step per (Bt, ...) tile.  "parallel" semantics let
    # multi-TC chips (v7x) shard tiles across TensorCores; BlockSpec also
    # double-buffers the per-tile x slab so its DMA overlaps compute.
    B_pad = _ru(B, 8)
    if B_pad <= 8:
        Bt = B_pad
    else:
        Bt = min(64, _ru(B_pad // 2, 8))
        B_pad = _ru(B_pad, Bt)
    grid = (B_pad // Bt,)

    # time-major, batch padded to the tile size, features zero-padded to P lanes
    x_tm = jnp.transpose(x_ts, (1, 0, 2)).astype(jnp.float32)
    x_tm = jnp.pad(x_tm, ((0, 0), (0, B_pad - B), (0, P - D)))

    x_spec = pl.BlockSpec((T, Bt, P), lambda b: (0, b, 0))
    out_spec = pl.BlockSpec((Bt, O_pad), lambda b: (b, 0))
    scratch = [
        pltpu.VMEM((T, Bt, P), jnp.float32),      # inter-layer activations
        pltpu.VMEM((T, Bt, 3 * P), jnp.float32),  # hoisted input projections
    ]
    cparams = pltpu.CompilerParams(
        dimension_semantics=("parallel",),
        vmem_limit_bytes=_vmem_limit_bytes(T, Bt, P, O_pad, kp, use_nts),
    )
    out_shape = jax.ShapeDtypeStruct((B_pad, O_pad), jnp.float32)

    if use_nts:
        x_nts = x_non_ts.reshape(B, -1).astype(jnp.float32)              # Flatten
        x_nts = jnp.pad(x_nts, ((0, B_pad - B), (0, kp["NTS_pad"] - NTS)))
        nts_spec = pl.BlockSpec((Bt, kp["NTS_pad"]), lambda b: (b, 0))
        out = pl.pallas_call(
            gru_combined_head_kernel,
            out_shape=out_shape,
            grid=grid,
            in_specs=[x_spec, nts_spec,
                      _rep_spec(kp["w_ih"]), _rep_spec(kp["w_hh"]),
                      _rep_spec(kp["b_i"]), _rep_spec(kp["b_hn"]),
                      _rep_spec(kp["w_nts"]), _rep_spec(kp["b_nts"]),
                      _rep_spec(kp["w_ch"]), _rep_spec(kp["w_cn"]),
                      _rep_spec(kp["b_c"])],
            out_specs=out_spec,
            scratch_shapes=scratch,
            compiler_params=cparams,
        )(x_tm, x_nts, kp["w_ih"], kp["w_hh"], kp["b_i"], kp["b_hn"],
          kp["w_nts"], kp["b_nts"], kp["w_ch"], kp["w_cn"], kp["b_c"])
    else:
        out = pl.pallas_call(
            gru_ts_head_kernel,
            out_shape=out_shape,
            grid=grid,
            in_specs=[x_spec,
                      _rep_spec(kp["w_ih"]), _rep_spec(kp["w_hh"]),
                      _rep_spec(kp["b_i"]), _rep_spec(kp["b_hn"]),
                      _rep_spec(kp["w_gru"]), _rep_spec(kp["b_gru"])],
            out_specs=out_spec,
            scratch_shapes=scratch,
            compiler_params=cparams,
        )(x_tm, kp["w_ih"], kp["w_hh"], kp["b_i"], kp["b_hn"],
          kp["w_gru"], kp["b_gru"])

    return out[:B, :O]


# ----------------------------------------------------------------------------
# Pure-JAX reference (for correctness check)
# ----------------------------------------------------------------------------

def _gru_layer_ref(x_tm, w_ih, w_hh, b_ih, b_hh):
    H = w_hh.shape[1]

    def step(h, xt):
        gi = xt @ w_ih.T + b_ih
        gh = h @ w_hh.T + b_hh
        r = jax.nn.sigmoid(gi[:, :H] + gh[:, :H])
        z = jax.nn.sigmoid(gi[:, H:2 * H] + gh[:, H:2 * H])
        n = jnp.tanh(gi[:, 2 * H:] + r * gh[:, 2 * H:])
        h_new = (1.0 - z) * n + z * h
        return h_new, h_new

    h0 = jnp.zeros((x_tm.shape[1], H), jnp.float32)
    _, out = lax.scan(step, h0, x_tm)
    return out


def forward_ref(params, x_ts, x_non_ts=None):
    B = x_ts.shape[0]
    h = jnp.transpose(x_ts, (1, 0, 2))
    for layer in params["gru"]:
        h = _gru_layer_ref(h, layer["w_ih"], layer["w_hh"], layer["b_ih"], layer["b_hh"])
    gru_out = h[-1]
    if x_non_ts is not None:
        x_flat = x_non_ts.reshape(B, -1)
        non_ts_output = x_flat @ params["fc_non_ts_w"].T + params["fc_non_ts_b"]
        combined = jnp.concatenate([gru_out, non_ts_output], axis=-1)
        return combined @ params["fc_combined_w"].T + params["fc_combined_b"]
    return gru_out @ params["fc_gru_w"].T + params["fc_gru_b"]


# ----------------------------------------------------------------------------
# Deterministic parameter init (shapes match the nn.Module __init__)
# ----------------------------------------------------------------------------

def init_params(key, input_dim, hidden_dim, num_layers, output_dim, non_ts_input_dim=None):
    keys = iter(jax.random.split(key, 4 * num_layers + 8))

    def u(shape, scale):
        return jax.random.uniform(next(keys), shape, jnp.float32, -scale, scale)

    params = {"gru": []}
    kg = 1.0 / float(jnp.sqrt(hidden_dim))
    for layer in range(num_layers):
        d_in = input_dim if layer == 0 else hidden_dim
        params["gru"].append({
            "w_ih": u((3 * hidden_dim, d_in), kg),
            "w_hh": u((3 * hidden_dim, hidden_dim), kg),
            "b_ih": u((3 * hidden_dim,), kg),
            "b_hh": u((3 * hidden_dim,), kg),
        })

    kf = 1.0 / float(jnp.sqrt(hidden_dim))
    params["fc_gru_w"] = u((output_dim, hidden_dim), kf)
    params["fc_gru_b"] = u((output_dim,), kf)

    if non_ts_input_dim is not None:
        kn = 1.0 / float(jnp.sqrt(non_ts_input_dim))
        params["fc_non_ts_w"] = u((hidden_dim, non_ts_input_dim), kn)
        params["fc_non_ts_b"] = u((hidden_dim,), kn)
        kc = 1.0 / float(jnp.sqrt(2 * hidden_dim))
        params["fc_combined_w"] = u((output_dim, 2 * hidden_dim), kc)
        params["fc_combined_b"] = u((output_dim,), kc)
    return params


# ----------------------------------------------------------------------------

if __name__ == "__main__":
    B, T, D, H, L, O, NTS = 2, 8, 4, 32, 2, 3, 6

    key = jax.random.PRNGKey(0)
    pkey, xkey, nkey = jax.random.split(key, 3)

    params = init_params(pkey, input_dim=D, hidden_dim=H, num_layers=L,
                         output_dim=O, non_ts_input_dim=NTS)
    x_ts = jax.random.normal(xkey, (B, T, D), jnp.float32)
    x_non_ts = jax.random.normal(nkey, (B, NTS), jnp.float32)

    # Path 1: ts-only (x_non_ts=None)  -> fc_gru head
    out_ts = time_series_gru_forward(params, x_ts)
    # Path 2: with non-ts features     -> fc_non_ts + concat + fc_combined head
    out_combined = time_series_gru_forward(params, x_ts, x_non_ts)
    jax.block_until_ready((out_ts, out_combined))

    ref_ts = forward_ref(params, x_ts)
    ref_combined = forward_ref(params, x_ts, x_non_ts)

    assert out_ts.shape == (B, O) and out_combined.shape == (B, O)
    assert jnp.allclose(out_ts, ref_ts, rtol=1e-4, atol=1e-4), "ts-only path mismatch"
    assert jnp.allclose(out_combined, ref_combined, rtol=1e-4, atol=1e-4), "combined path mismatch"

    print("KERNEL_OK")
</pallas_src>

<mosaic_0001>
module attributes {stable_mosaic.version = 11 : i64} {
  func.func @gru_ts_head_kernel(%arg0: i32, %arg1: memref<8x8x128xf32, #tpu.memory_space<vmem>>, %arg2: memref<2x128x384xf32, #tpu.memory_space<vmem>>, %arg3: memref<2x128x384xf32, #tpu.memory_space<vmem>>, %arg4: memref<2x1x384xf32, #tpu.memory_space<vmem>>, %arg5: memref<2x1x128xf32, #tpu.memory_space<vmem>>, %arg6: memref<128x128xf32, #tpu.memory_space<vmem>>, %arg7: memref<1x128xf32, #tpu.memory_space<vmem>>, %arg8: memref<8x128xf32, #tpu.memory_space<vmem>>, %arg9: memref<8x8x128xf32, #tpu.memory_space<vmem>>, %arg10: memref<8x8x384xf32, #tpu.memory_space<vmem>>) attributes {dimension_semantics = [#tpu.dimension_semantics<parallel>], iteration_bounds = array<i64: 1>, scalar_prefetch = 0 : i64, scratch_operands = 2 : i64, tpu.core_type = #tpu.core_type<tc>, window_params = [{transform_indices = @transform_0, window_bounds = array<i64: 8, 8, 128>}, {pipeline_mode = #tpu.pipeline_mode<synchronous>, transform_indices = @transform_1, window_bounds = array<i64: 2, 128, 384>}, {pipeline_mode = #tpu.pipeline_mode<synchronous>, transform_indices = @transform_2, window_bounds = array<i64: 2, 128, 384>}, {pipeline_mode = #tpu.pipeline_mode<synchronous>, transform_indices = @transform_3, window_bounds = array<i64: 2, 1, 384>}, {pipeline_mode = #tpu.pipeline_mode<synchronous>, transform_indices = @transform_4, window_bounds = array<i64: 2, 1, 128>}, {pipeline_mode = #tpu.pipeline_mode<synchronous>, transform_indices = @transform_5, window_bounds = array<i64: 128, 128>}, {pipeline_mode = #tpu.pipeline_mode<synchronous>, transform_indices = @transform_6, window_bounds = array<i64: 1, 128>}, {transform_indices = @transform_7, window_bounds = array<i64: 8, 128>}]} {
    %c0 = arith.constant 0 : index
    %c0_0 = arith.constant 0 : index
    %c0_1 = arith.constant 0 : index
    %0 = vector.load %arg2[%c0, %c0_0, %c0_1] : memref<2x128x384xf32, #tpu.memory_space<vmem>>, vector<1x128x384xf32>
    %1 = vector.shape_cast %0 : vector<1x128x384xf32> to vector<128x384xf32>
    %c0_2 = arith.constant 0 : index
    %c0_3 = arith.constant 0 : index
    %c0_4 = arith.constant 0 : index
    %2 = vector.load %arg3[%c0_2, %c0_3, %c0_4] : memref<2x128x384xf32, #tpu.memory_space<vmem>>, vector<1x128x384xf32>
    %3 = vector.shape_cast %2 : vector<1x128x384xf32> to vector<128x384xf32>
    %c0_5 = arith.constant 0 : index
    %c0_6 = arith.constant 0 : index
    %c0_7 = arith.constant 0 : index
    %4 = vector.load %arg4[%c0_5, %c0_6, %c0_7] : memref<2x1x384xf32, #tpu.memory_space<vmem>>, vector<1x1x384xf32>
    %5 = vector.shape_cast %4 : vector<1x1x384xf32> to vector<1x384xf32>
    %c0_8 = arith.constant 0 : index
    %c0_9 = arith.constant 0 : index
    %c0_10 = arith.constant 0 : index
    %6 = vector.load %arg5[%c0_8, %c0_9, %c0_10] : memref<2x1x128xf32, #tpu.memory_space<vmem>>, vector<1x1x128xf32>
    %7 = vector.shape_cast %6 : vector<1x1x128xf32> to vector<1x128xf32>
    %8 = vector.shape_cast %7 : vector<1x128xf32> to vector<1x128xf32>
    %9 = vector.broadcast %8 : vector<1x128xf32> to vector<8x128xf32>
    %c0_11 = arith.constant 0 : index
    %c0_12 = arith.constant 0 : index
    %c0_13 = arith.constant 0 : index
    %10 = vector.load %arg1[%c0_11, %c0_12, %c0_13] : memref<8x8x128xf32, #tpu.memory_space<vmem>>, vector<8x8x128xf32>
    %11 = vector.shape_cast %10 : vector<8x8x128xf32> to vector<64x128xf32>
    %cst = arith.constant dense<0.000000e+00> : vector<64x384xf32>
    %12 = tpu.matmul %11, %1, %cst {dimension_numbers = #tpu.dot_dimension_numbers<[1], [0], [0], [1], [0, 0, 1, 1], [], []>} : vector<64x128xf32>, vector<128x384xf32>, vector<64x384xf32> -> vector<64x384xf32>
    %13 = vector.broadcast %5 : vector<1x384xf32> to vector<64x384xf32>
    %14 = arith.addf %12, %13 : vector<64x384xf32>
    %15 = vector.shape_cast %14 : vector<64x384xf32> to vector<8x8x384xf32>
    %c0_14 = arith.constant 0 : index
    %c0_15 = arith.constant 0 : index
    %c0_16 = arith.constant 0 : index
    %16 = vector.load %arg10[%c0_14, %c0_15, %c0_16] : memref<8x8x384xf32, #tpu.memory_space<vmem>>, vector<8x8x384xf32>
    tpu.vector_store %arg10[%c0_14, %c0_15, %c0_16], %15 {strides = array<i32>} : memref<8x8x384xf32, #tpu.memory_space<vmem>>, vector<8x8x384xf32>,
    %cst_17 = arith.constant 0.000000e+00 : f32
    %17 = vector.broadcast %cst_17 : f32 to vector<8x128xf32>
    %c0_i32 = arith.constant 0 : i32
    %18 = arith.index_cast %c0_i32 : i32 to index
    %c0_18 = arith.constant 0 : index
    %c0_19 = arith.constant 0 : index
    %19 = vector.load %arg10[%18, %c0_18, %c0_19] : memref<8x8x384xf32, #tpu.memory_space<vmem>>, vector<1x8x384xf32>
    %20 = vector.shape_cast %19 : vector<1x8x384xf32> to vector<8x384xf32>
    %cst_20 = arith.constant dense<0.000000e+00> : vector<8x384xf32>
    %21 = tpu.matmul %17, %3, %cst_20 {dimension_numbers = #tpu.dot_dimension_numbers<[1], [0], [0], [1], [0, 0, 1, 1], [], []>} : vector<8x128xf32>, vector<128x384xf32>, vector<8x384xf32> -> vector<8x384xf32>
    %22 = vector.extract_strided_slice %20 {offsets = [0, 0], sizes = [8, 256], strides = [1, 1]} : vector<8x384xf32> to vector<8x256xf32>
    %23 = vector.extract_strided_slice %21 {offsets = [0, 0], sizes = [8, 256], strides = [1, 1]} : vector<8x384xf32> to vector<8x256xf32>
    %24 = arith.addf %22, %23 : vector<8x256xf32>
    %25 = arith.negf %24 : vector<8x256xf32>
    %26 = math.exp %25 : vector<8x256xf32>
    %cst_21 = arith.constant 1.000000e+00 : f32
    %27 = vector.broadcast %cst_21 : f32 to vector<8x256xf32>
    %28 = arith.addf %27, %26 : vector<8x256xf32>
    %29 = arith.divf %27, %28 : vector<8x256xf32>
    %30 = vector.extract_strided_slice %29 {offsets = [0, 0], sizes = [8, 128], strides = [1, 1]} : vector<8x256xf32> to vector<8x128xf32>
    %31 = vector.extract_strided_slice %29 {offsets = [0, 128], sizes = [8, 128], strides = [1, 1]} : vector<8x256xf32> to vector<8x128xf32>
    %32 = vector.extract_strided_slice %20 {offsets = [0, 256], sizes = [8, 128], strides = [1, 1]} : vector<8x384xf32> to vector<8x128xf32>
    %33 = vector.extract_strided_slice %21 {offsets = [0, 256], sizes = [8, 128], strides = [1, 1]} : vector<8x384xf32> to vector<8x128xf32>
    %34 = arith.addf %33, %9 : vector<8x128xf32>
    %35 = arith.mulf %30, %34 : vector<8x128xf32>
    %36 = arith.addf %32, %35 : vector<8x128xf32>
    %37 = math.tanh %36 : vector<8x128xf32>
    %cst_22 = arith.constant 1.000000e+00 : f32
    %38 = vector.broadcast %cst_22 : f32 to vector<8x128xf32>
    %39 = arith.subf %38, %31 : vector<8x128xf32>
    %40 = arith.mulf %39, %37 : vector<8x128xf32>
    %41 = arith.mulf %31, %17 : vector<8x128xf32>
    %42 = arith.addf %40, %41 : vector<8x128xf32>
    %43 = arith.index_cast %c0_i32 : i32 to index
    %c0_23 = arith.constant 0 : index
    %c0_24 = arith.constant 0 : index
    %44 = vector.load %arg9[%43, %c0_23, %c0_24] : memref<8x8x128xf32, #tpu.memory_space<vmem>>, vector<1x8x128xf32>
    %45 = vector.shape_cast %44 : vector<1x8x128xf32> to vector<8x128xf32>
    %46 = vector.shape_cast %42 : vector<8x128xf32> to vector<1x8x128xf32>
    tpu.vector_store %arg9[%43, %c0_23, %c0_24], %46 {strides = array<i32>} : memref<8x8x128xf32, #tpu.memory_space<vmem>>, vector<1x8x128xf32>,
    %c1_i32 = arith.constant 1 : i32
    %47 = arith.index_cast %c1_i32 : i32 to index
    %c0_25 = arith.constant 0 : index
    %c0_26 = arith.constant 0 : index
    %48 = vector.load %arg10[%47, %c0_25, %c0_26] : memref<8x8x384xf32, #tpu.memory_space<vmem>>, vector<1x8x384xf32>
    %49 = vector.shape_cast %48 : vector<1x8x384xf32> to vector<8x384xf32>
    %cst_27 = arith.constant dense<0.000000e+00> : vector<8x384xf32>
    %50 = tpu.matmul %42, %3, %cst_27 {dimension_numbers = #tpu.dot_dimension_numbers<[1], [0], [0], [1], [0, 0, 1, 1], [], []>} : vector<8x128xf32>, vector<128x384xf32>, vector<8x384xf32> -> vector<8x384xf32>
    %51 = vector.extract_strided_slice %49 {offsets = [0, 0], sizes = [8, 256], strides = [1, 1]} : vector<8x384xf32> to vector<8x256xf32>
    %52 = vector.extract_strided_slice %50 {offsets = [0, 0], sizes = [8, 256], strides = [1, 1]} : vector<8x384xf32> to vector<8x256xf32>
    %53 = arith.addf %51, %52 : vector<8x256xf32>
    %54 = arith.negf %53 : vector<8x256xf32>
    %55 = math.exp %54 : vector<8x256xf32>
    %cst_28 = arith.constant 1.000000e+00 : f32
    %56 = vector.broadcast %cst_28 : f32 to vector<8x256xf32>
    %57 = arith.addf %56, %55 : vector<8x256xf32>
    %58 = arith.divf %56, %57 : vector<8x256xf32>
    %59 = vector.extract_strided_slice %58 {offsets = [0, 0], sizes = [8, 128], strides = [1, 1]} : vector<8x256xf32> to vector<8x128xf32>
    %60 = vector.extract_strided_slice %58 {offsets = [0, 128], sizes = [8, 128], strides = [1, 1]} : vector<8x256xf32> to vector<8x128xf32>
    %61 = vector.extract_strided_slice %49 {offsets = [0, 256], sizes = [8, 128], strides = [1, 1]} : vector<8x384xf32> to vector<8x128xf32>
    %62 = vector.extract_strided_slice %50 {offsets = [0, 256], sizes = [8, 128], strides = [1, 1]} : vector<8x384xf32> to vector<8x128xf32>
    %63 = arith.addf %62, %9 : vector<8x128xf32>
    %64 = arith.mulf %59, %63 : vector<8x128xf32>
    %65 = arith.addf %61, %64 : vector<8x128xf32>
    %66 = math.tanh %65 : vector<8x128xf32>
    %cst_29 = arith.constant 1.000000e+00 : f32
    %67 = vector.broadcast %cst_29 : f32 to vector<8x128xf32>
    %68 = arith.subf %67, %60 : vector<8x128xf32>
    %69 = arith.mulf %68, %66 : vector<8x128xf32>
    %70 = arith.mulf %60, %42 : vector<8x128xf32>
    %71 = arith.addf %69, %70 : vector<8x128xf32>
    %72 = arith.index_cast %c1_i32 : i32 to index
    %c0_30 = arith.constant 0 : index
    %c0_31 = arith.constant 0 : index
    %73 = vector.load %arg9[%72, %c0_30, %c0_31] : memref<8x8x128xf32, #tpu.memory_space<vmem>>, vector<1x8x128xf32>
    %74 = vector.shape_cast %73 : vector<1x8x128xf32> to vector<8x128xf32>
    %75 = vector.shape_cast %71 : vector<8x128xf32> to vector<1x8x128xf32>
    tpu.vector_store %arg9[%72, %c0_30, %c0_31], %75 {strides = array<i32>} : memref<8x8x128xf32, #tpu.memory_space<vmem>>, vector<1x8x128xf32>,
    %c2_i32 = arith.constant 2 : i32
    %76 = arith.index_cast %c2_i32 : i32 to index
    %c0_32 = arith.constant 0 : index
    %c0_33 = arith.constant 0 : index
    %77 = vector.load %arg10[%76, %c0_32, %c0_33] : memref<8x8x384xf32, #tpu.memory_space<vmem>>, vector<1x8x384xf32>
    %78 = vector.shape_cast %77 : vector<1x8x384xf32> to vector<8x384xf32>
    %cst_34 = arith.constant dense<0.000000e+00> : vector<8x384xf32>
    %79 = tpu.matmul %71, %3, %cst_34 {dimension_numbers = #tpu.dot_dimension_numbers<[1], [0], [0], [1], [0, 0, 1, 1], [], []>} : vector<8x128xf32>, vector<128x384xf32>, vector<8x384xf32> -> vector<8x384xf32>
    %80 = vector.extract_strided_slice %78 {offsets = [0, 0], sizes = [8, 256], strides = [1, 1]} : vector<8x384xf32> to vector<8x256xf32>
    %81 = vector.extract_strided_slice %79 {offsets = [0, 0], sizes = [8, 256], strides = [1, 1]} : vector<8x384xf32> to vector<8x256xf32>
    %82 = arith.addf %80, %81 : vector<8x256xf32>
    %83 = arith.negf %82 : vector<8x256xf32>
    %84 = math.exp %83 : vector<8x256xf32>
    %cst_35 = arith.constant 1.000000e+00 : f32
    %85 = vector.broadcast %cst_35 : f32 to vector<8x256xf32>
    %86 = arith.addf %85, %84 : vector<8x256xf32>
    %87 = arith.divf %85, %86 : vector<8x256xf32>
    %88 = vector.extract_strided_slice %87 {offsets = [0, 0], sizes = [8, 128], strides = [1, 1]} : vector<8x256xf32> to vector<8x128xf32>
    %89 = vector.extract_strided_slice %87 {offsets = [0, 128], sizes = [8, 128], strides = [1, 1]} : vector<8x256xf32> to vector<8x128xf32>
    %90 = vector.extract_strided_slice %78 {offsets = [0, 256], sizes = [8, 128], strides = [1, 1]} : vector<8x384xf32> to vector<8x128xf32>
    %91 = vector.extract_strided_slice %79 {offsets = [0, 256], sizes = [8, 128], strides = [1, 1]} : vector<8x384xf32> to vector<8x128xf32>
    %92 = arith.addf %91, %9 : vector<8x128xf32>
    %93 = arith.mulf %88, %92 : vector<8x128xf32>
    %94 = arith.addf %90, %93 : vector<8x128xf32>
    %95 = math.tanh %94 : vector<8x128xf32>
    %cst_36 = arith.constant 1.000000e+00 : f32
    %96 = vector.broadcast %cst_36 : f32 to vector<8x128xf32>
    %97 = arith.subf %96, %89 : vector<8x128xf32>
    %98 = arith.mulf %97, %95 : vector<8x128xf32>
    %99 = arith.mulf %89, %71 : vector<8x128xf32>
    %100 = arith.addf %98, %99 : vector<8x128xf32>
    %101 = arith.index_cast %c2_i32 : i32 to index
    %c0_37 = arith.constant 0 : index
    %c0_38 = arith.constant 0 : index
    %102 = vector.load %arg9[%101, %c0_37, %c0_38] : memref<8x8x128xf32, #tpu.memory_space<vmem>>, vector<1x8x128xf32>
    %103 = vector.shape_cast %102 : vector<1x8x128xf32> to vector<8x128xf32>
    %104 = vector.shape_cast %100 : vector<8x128xf32> to vector<1x8x128xf32>
    tpu.vector_store %arg9[%101, %c0_37, %c0_38], %104 {strides = array<i32>} : memref<8x8x128xf32, #tpu.memory_space<vmem>>, vector<1x8x128xf32>,
    %c3_i32 = arith.constant 3 : i32
    %105 = arith.index_cast %c3_i32 : i32 to index
    %c0_39 = arith.constant 0 : index
    %c0_40 = arith.constant 0 : index
    %106 = vector.load %arg10[%105, %c0_39, %c0_40] : memref<8x8x384xf32, #tpu.memory_space<vmem>>, vector<1x8x384xf32>
    %107 = vector.shape_cast %106 : vector<1x8x384xf32> to vector<8x384xf32>
    %cst_41 = arith.constant dense<0.000000e+00> : vector<8x384xf32>
    %108 = tpu.matmul %100, %3, %cst_41 {dimension_numbers = #tpu.dot_dimension_numbers<[1], [0], [0], [1], [0, 0, 1, 1], [], []>} : vector<8x128xf32>, vector<128x384xf32>, vector<8x384xf32> -> vector<8x384xf32>
    %109 = vector.extract_strided_slice %107 {offsets = [0, 0], sizes = [8, 256], strides = [1, 1]} : vector<8x384xf32> to vector<8x256xf32>
    %110 = vector.extract_strided_slice %108 {offsets = [0, 0], sizes = [8, 256], strides = [1, 1]} : vector<8x384xf32> to vector<8x256xf32>
    %111 = arith.addf %109, %110 : vector<8x256xf32>
    %112 = arith.negf %111 : vector<8x256xf32>
    %113 = math.exp %112 : vector<8x256xf32>
    %cst_42 = arith.constant 1.000000e+00 : f32
    %114 = vector.broadcast %cst_42 : f32 to vector<8x256xf32>
    %115 = arith.addf %114, %113 : vector<8x256xf32>
    %116 = arith.divf %114, %115 : vector<8x256xf32>
    %117 = vector.extract_strided_slice %116 {offsets = [0, 0], sizes = [8, 128], strides = [1, 1]} : vector<8x256xf32> to vector<8x128xf32>
    %118 = vector.extract_strided_slice %116 {offsets = [0, 128], sizes = [8, 128], strides = [1, 1]} : vector<8x256xf32> to vector<8x128xf32>
    %119 = vector.extract_strided_slice %107 {offsets = [0, 256], sizes = [8, 128], strides = [1, 1]} : vector<8x384xf32> to vector<8x128xf32>
    %120 = vector.extract_strided_slice %108 {offsets = [0, 256], sizes = [8, 128], strides = [1, 1]} : vector<8x384xf32> to vector<8x128xf32>
    %121 = arith.addf %120, %9 : vector<8x128xf32>
    %122 = arith.mulf %117, %121 : vector<8x128xf32>
    %123 = arith.addf %119, %122 : vector<8x128xf32>
    %124 = math.tanh %123 : vector<8x128xf32>
    %cst_43 = arith.constant 1.000000e+00 : f32
    %125 = vector.broadcast %cst_43 : f32 to vector<8x128xf32>
    %126 = arith.subf %125, %118 : vector<8x128xf32>
    %127 = arith.mulf %126, %124 : vector<8x128xf32>
    %128 = arith.mulf %118, %100 : vector<8x128xf32>
    %129 = arith.addf %127, %128 : vector<8x128xf32>
    %130 = arith.index_cast %c3_i32 : i32 to index
    %c0_44 = arith.constant 0 : index
    %c0_45 = arith.constant 0 : index
    %131 = vector.load %arg9[%130, %c0_44, %c0_45] : memref<8x8x128xf32, #tpu.memory_space<vmem>>, vector<1x8x128xf32>
    %132 = vector.shape_cast %131 : vector<1x8x128xf32> to vector<8x128xf32>
    %133 = vector.shape_cast %129 : vector<8x128xf32> to vector<1x8x128xf32>
    tpu.vector_store %arg9[%130, %c0_44, %c0_45], %133 {strides = array<i32>} : memref<8x8x128xf32, #tpu.memory_space<vmem>>, vector<1x8x128xf32>,
    %c4_i32 = arith.constant 4 : i32
    %134 = arith.index_cast %c4_i32 : i32 to index
    %c0_46 = arith.constant 0 : index
    %c0_47 = arith.constant 0 : index
    %135 = vector.load %arg10[%134, %c0_46, %c0_47] : memref<8x8x384xf32, #tpu.memory_space<vmem>>, vector<1x8x384xf32>
    %136 = vector.shape_cast %135 : vector<1x8x384xf32> to vector<8x384xf32>
    %cst_48 = arith.constant dense<0.000000e+00> : vector<8x384xf32>
    %137 = tpu.matmul %129, %3, %cst_48 {dimension_numbers = #tpu.dot_dimension_numbers<[1], [0], [0], [1], [0, 0, 1, 1], [], []>} : vector<8x128xf32>, vector<128x384xf32>, vector<8x384xf32> -> vector<8x384xf32>
    %138 = vector.extract_strided_slice %136 {offsets = [0, 0], sizes = [8, 256], strides = [1, 1]} : vector<8x384xf32> to vector<8x256xf32>
    %139 = vector.extract_strided_slice %137 {offsets = [0, 0], sizes = [8, 256], strides = [1, 1]} : vector<8x384xf32> to vector<8x256xf32>
    %140 = arith.addf %138, %139 : vector<8x256xf32>
    %141 = arith.negf %140 : vector<8x256xf32>
    %142 = math.exp %141 : vector<8x256xf32>
    %cst_49 = arith.constant 1.000000e+00 : f32
    %143 = vector.broadcast %cst_49 : f32 to vector<8x256xf32>
    %144 = arith.addf %143, %142 : vector<8x256xf32>
    %145 = arith.divf %143, %144 : vector<8x256xf32>
    %146 = vector.extract_strided_slice %145 {offsets = [0, 0], sizes = [8, 128], strides = [1, 1]} : vector<8x256xf32> to vector<8x128xf32>
    %147 = vector.extract_strided_slice %145 {offsets = [0, 128], sizes = [8, 128], strides = [1, 1]} : vector<8x256xf32> to vector<8x128xf32>
    %148 = vector.extract_strided_slice %136 {offsets = [0, 256], sizes = [8, 128], strides = [1, 1]} : vector<8x384xf32> to vector<8x128xf32>
    %149 = vector.extract_strided_slice %137 {offsets = [0, 256], sizes = [8, 128], strides = [1, 1]} : vector<8x384xf32> to vector<8x128xf32>
    %150 = arith.addf %149, %9 : vector<8x128xf32>
    %151 = arith.mulf %146, %150 : vector<8x128xf32>
    %152 = arith.addf %148, %151 : vector<8x128xf32>
    %153 = math.tanh %152 : vector<8x128xf32>
    %cst_50 = arith.constant 1.000000e+00 : f32
    %154 = vector.broadcast %cst_50 : f32 to vector<8x128xf32>
    %155 = arith.subf %154, %147 : vector<8x128xf32>
    %156 = arith.mulf %155, %153 : vector<8x128xf32>
    %157 = arith.mulf %147, %129 : vector<8x128xf32>
    %158 = arith.addf %156, %157 : vector<8x128xf32>
    %159 = arith.index_cast %c4_i32 : i32 to index
    %c0_51 = arith.constant 0 : index
    %c0_52 = arith.constant 0 : index
    %160 = vector.load %arg9[%159, %c0_51, %c0_52] : memref<8x8x128xf32, #tpu.memory_space<vmem>>, vector<1x8x128xf32>
    %161 = vector.shape_cast %160 : vector<1x8x128xf32> to vector<8x128xf32>
    %162 = vector.shape_cast %158 : vector<8x128xf32> to vector<1x8x128xf32>
    tpu.vector_store %arg9[%159, %c0_51, %c0_52], %162 {strides = array<i32>} : memref<8x8x128xf32, #tpu.memory_space<vmem>>, vector<1x8x128xf32>,
    %c5_i32 = arith.constant 5 : i32
    %163 = arith.index_cast %c5_i32 : i32 to index
    %c0_53 = arith.constant 0 : index
    %c0_54 = arith.constant 0 : index
    %164 = vector.load %arg10[%163, %c0_53, %c0_54] : memref<8x8x384xf32, #tpu.memory_space<vmem>>, vector<1x8x384xf32>
    %165 = vector.shape_cast %164 : vector<1x8x384xf32> to vector<8x384xf32>
    %cst_55 = arith.constant dense<0.000000e+00> : vector<8x384xf32>
    %166 = tpu.matmul %158, %3, %cst_55 {dimension_numbers = #tpu.dot_dimension_numbers<[1], [0], [0], [1], [0, 0, 1, 1], [], []>} : vector<8x128xf32>, vector<128x384xf32>, vector<8x384xf32> -> vector<8x384xf32>
    %167 = vector.extract_strided_slice %165 {offsets = [0, 0], sizes = [8, 256], strides = [1, 1]} : vector<8x384xf32> to vector<8x256xf32>
    %168 = vector.extract_strided_slice %166 {offsets = [0, 0], sizes = [8, 256], strides = [1, 1]} : vector<8x384xf32> to vector<8x256xf32>
    %169 = arith.addf %167, %168 : vector<8x256xf32>
    %170 = arith.negf %169 : vector<8x256xf32>
    %171 = math.exp %170 : vector<8x256xf32>
    %cst_56 = arith.constant 1.000000e+00 : f32
    %172 = vector.broadcast %cst_56 : f32 to vector<8x256xf32>
    %173 = arith.addf %172, %171 : vector<8x256xf32>
    %174 = arith.divf %172, %173 : vector<8x256xf32>
    %175 = vector.extract_strided_slice %174 {offsets = [0, 0], sizes = [8, 128], strides = [1, 1]} : vector<8x256xf32> to vector<8x128xf32>
    %176 = vector.extract_strided_slice %174 {offsets = [0, 128], sizes = [8, 128], strides = [1, 1]} : vector<8x256xf32> to vector<8x128xf32>
    %177 = vector.extract_strided_slice %165 {offsets = [0, 256], sizes = [8, 128], strides = [1, 1]} : vector<8x384xf32> to vector<8x128xf32>
    %178 = vector.extract_strided_slice %166 {offsets = [0, 256], sizes = [8, 128], strides = [1, 1]} : vector<8x384xf32> to vector<8x128xf32>
    %179 = arith.addf %178, %9 : vector<8x128xf32>
    %180 = arith.mulf %175, %179 : vector<8x128xf32>
    %181 = arith.addf %177, %180 : vector<8x128xf32>
    %182 = math.tanh %181 : vector<8x128xf32>
    %cst_57 = arith.constant 1.000000e+00 : f32
    %183 = vector.broadcast %cst_57 : f32 to vector<8x128xf32>
    %184 = arith.subf %183, %176 : vector<8x128xf32>
    %185 = arith.mulf %184, %182 : vector<8x128xf32>
    %186 = arith.mulf %176, %158 : vector<8x128xf32>
    %187 = arith.addf %185, %186 : vector<8x128xf32>
    %188 = arith.index_cast %c5_i32 : i32 to index
    %c0_58 = arith.constant 0 : index
    %c0_59 = arith.constant 0 : index
    %189 = vector.load %arg9[%188, %c0_58, %c0_59] : memref<8x8x128xf32, #tpu.memory_space<vmem>>, vector<1x8x128xf32>
    %190 = vector.shape_cast %189 : vector<1x8x128xf32> to vector<8x128xf32>
    %191 = vector.shape_cast %187 : vector<8x128xf32> to vector<1x8x128xf32>
    tpu.vector_store %arg9[%188, %c0_58, %c0_59], %191 {strides = array<i32>} : memref<8x8x128xf32, #tpu.memory_space<vmem>>, vector<1x8x128xf32>,
    %c6_i32 = arith.constant 6 : i32
    %192 = arith.index_cast %c6_i32 : i32 to index
    %c0_60 = arith.constant 0 : index
    %c0_61 = arith.constant 0 : index
    %193 = vector.load %arg10[%192, %c0_60, %c0_61] : memref<8x8x384xf32, #tpu.memory_space<vmem>>, vector<1x8x384xf32>
    %194 = vector.shape_cast %193 : vector<1x8x384xf32> to vector<8x384xf32>
    %cst_62 = arith.constant dense<0.000000e+00> : vector<8x384xf32>
    %195 = tpu.matmul %187, %3, %cst_62 {dimension_numbers = #tpu.dot_dimension_numbers<[1], [0], [0], [1], [0, 0, 1, 1], [], []>} : vector<8x128xf32>, vector<128x384xf32>, vector<8x384xf32> -> vector<8x384xf32>
    %196 = vector.extract_strided_slice %194 {offsets = [0, 0], sizes = [8, 256], strides = [1, 1]} : vector<8x384xf32> to vector<8x256xf32>
    %197 = vector.extract_strided_slice %195 {offsets = [0, 0], sizes = [8, 256], strides = [1, 1]} : vector<8x384xf32> to vector<8x256xf32>
    %198 = arith.addf %196, %197 : vector<8x256xf32>
    %199 = arith.negf %198 : vector<8x256xf32>
    %200 = math.exp %199 : vector<8x256xf32>
    %cst_63 = arith.constant 1.000000e+00 : f32
    %201 = vector.broadcast %cst_63 : f32 to vector<8x256xf32>
    %202 = arith.addf %201, %200 : vector<8x256xf32>
    %203 = arith.divf %201, %202 : vector<8x256xf32>
    %204 = vector.extract_strided_slice %203 {offsets = [0, 0], sizes = [8, 128], strides = [1, 1]} : vector<8x256xf32> to vector<8x128xf32>
    %205 = vector.extract_strided_slice %203 {offsets = [0, 128], sizes = [8, 128], strides = [1, 1]} : vector<8x256xf32> to vector<8x128xf32>
    %206 = vector.extract_strided_slice %194 {offsets = [0, 256], sizes = [8, 128], strides = [1, 1]} : vector<8x384xf32> to vector<8x128xf32>
    %207 = vector.extract_strided_slice %195 {offsets = [0, 256], sizes = [8, 128], strides = [1, 1]} : vector<8x384xf32> to vector<8x128xf32>
    %208 = arith.addf %207, %9 : vector<8x128xf32>
    %209 = arith.mulf %204, %208 : vector<8x128xf32>
    %210 = arith.addf %206, %209 : vector<8x128xf32>
    %211 = math.tanh %210 : vector<8x128xf32>
    %cst_64 = arith.constant 1.000000e+00 : f32
    %212 = vector.broadcast %cst_64 : f32 to vector<8x128xf32>
    %213 = arith.subf %212, %205 : vector<8x128xf32>
    %214 = arith.mulf %213, %211 : vector<8x128xf32>
    %215 = arith.mulf %205, %187 : vector<8x128xf32>
    %216 = arith.addf %214, %215 : vector<8x128xf32>
    %217 = arith.index_cast %c6_i32 : i32 to index
    %c0_65 = arith.constant 0 : index
    %c0_66 = arith.constant 0 : index
    %218 = vector.load %arg9[%217, %c0_65, %c0_66] : memref<8x8x128xf32, #tpu.memory_space<vmem>>, vector<1x8x128xf32>
    %219 = vector.shape_cast %218 : vector<1x8x128xf32> to vector<8x128xf32>
    %220 = vector.shape_cast %216 : vector<8x128xf32> to vector<1x8x128xf32>
    tpu.vector_store %arg9[%217, %c0_65, %c0_66], %220 {strides = array<i32>} : memref<8x8x128xf32, #tpu.memory_space<vmem>>, vector<1x8x128xf32>,
    %c7_i32 = arith.constant 7 : i32
    %221 = arith.index_cast %c7_i32 : i32 to index
    %c0_67 = arith.constant 0 : index
    %c0_68 = arith.constant 0 : index
    %222 = vector.load %arg10[%221, %c0_67, %c0_68] : memref<8x8x384xf32, #tpu.memory_space<vmem>>, vector<1x8x384xf32>
    %223 = vector.shape_cast %222 : vector<1x8x384xf32> to vector<8x384xf32>
    %cst_69 = arith.constant dense<0.000000e+00> : vector<8x384xf32>
    %224 = tpu.matmul %216, %3, %cst_69 {dimension_numbers = #tpu.dot_dimension_numbers<[1], [0], [0], [1], [0, 0, 1, 1], [], []>} : vector<8x128xf32>, vector<128x384xf32>, vector<8x384xf32> -> vector<8x384xf32>
    %225 = vector.extract_strided_slice %223 {offsets = [0, 0], sizes = [8, 256], strides = [1, 1]} : vector<8x384xf32> to vector<8x256xf32>
    %226 = vector.extract_strided_slice %224 {offsets = [0, 0], sizes = [8, 256], strides = [1, 1]} : vector<8x384xf32> to vector<8x256xf32>
    %227 = arith.addf %225, %226 : vector<8x256xf32>
    %228 = arith.negf %227 : vector<8x256xf32>
    %229 = math.exp %228 : vector<8x256xf32>
    %cst_70 = arith.constant 1.000000e+00 : f32
    %230 = vector.broadcast %cst_70 : f32 to vector<8x256xf32>
    %231 = arith.addf %230, %229 : vector<8x256xf32>
    %232 = arith.divf %230, %231 : vector<8x256xf32>
    %233 = vector.extract_strided_slice %232 {offsets = [0, 0], sizes = [8, 128], strides = [1, 1]} : vector<8x256xf32> to vector<8x128xf32>
    %234 = vector.extract_strided_slice %232 {offsets = [0, 128], sizes = [8, 128], strides = [1, 1]} : vector<8x256xf32> to vector<8x128xf32>
    %235 = vector.extract_strided_slice %223 {offsets = [0, 256], sizes = [8, 128], strides = [1, 1]} : vector<8x384xf32> to vector<8x128xf32>
    %236 = vector.extract_strided_slice %224 {offsets = [0, 256], sizes = [8, 128], strides = [1, 1]} : vector<8x384xf32> to vector<8x128xf32>
    %237 = arith.addf %236, %9 : vector<8x128xf32>
    %238 = arith.mulf %233, %237 : vector<8x128xf32>
    %239 = arith.addf %235, %238 : vector<8x128xf32>
    %240 = math.tanh %239 : vector<8x128xf32>
    %cst_71 = arith.constant 1.000000e+00 : f32
    %241 = vector.broadcast %cst_71 : f32 to vector<8x128xf32>
    %242 = arith.subf %241, %234 : vector<8x128xf32>
    %243 = arith.mulf %242, %240 : vector<8x128xf32>
    %244 = arith.mulf %234, %216 : vector<8x128xf32>
    %245 = arith.addf %243, %244 : vector<8x128xf32>
    %246 = arith.index_cast %c7_i32 : i32 to index
    %c0_72 = arith.constant 0 : index
    %c0_73 = arith.constant 0 : index
    %247 = vector.load %arg9[%246, %c0_72, %c0_73] : memref<8x8x128xf32, #tpu.memory_space<vmem>>, vector<1x8x128xf32>
    %248 = vector.shape_cast %247 : vector<1x8x128xf32> to vector<8x128xf32>
    %249 = vector.shape_cast %245 : vector<8x128xf32> to vector<1x8x128xf32>
    tpu.vector_store %arg9[%246, %c0_72, %c0_73], %249 {strides = array<i32>} : memref<8x8x128xf32, #tpu.memory_space<vmem>>, vector<1x8x128xf32>,
    %c8_i32 = arith.constant 8 : i32
    %c1 = arith.constant 1 : index
    %c0_74 = arith.constant 0 : index
    %c0_75 = arith.constant 0 : index
    %250 = vector.load %arg2[%c1, %c0_74, %c0_75] : memref<2x128x384xf32, #tpu.memory_space<vmem>>, vector<1x128x384xf32>
    %251 = vector.shape_cast %250 : vector<1x128x384xf32> to vector<128x384xf32>
    %c1_76 = arith.constant 1 : index
    %c0_77 = arith.constant 0 : index
    %c0_78 = arith.constant 0 : index
    %252 = vector.load %arg3[%c1_76, %c0_77, %c0_78] : memref<2x128x384xf32, #tpu.memory_space<vmem>>, vector<1x128x384xf32>
    %253 = vector.shape_cast %252 : vector<1x128x384xf32> to vector<128x384xf32>
    %c1_79 = arith.constant 1 : index
    %c0_80 = arith.constant 0 : index
    %c0_81 = arith.constant 0 : index
    %254 = vector.load %arg4[%c1_79, %c0_80, %c0_81] : memref<2x1x384xf32, #tpu.memory_space<vmem>>, vector<1x1x384xf32>
    %255 = vector.shape_cast %254 : vector<1x1x384xf32> to vector<1x384xf32>
    %c1_82 = arith.constant 1 : index
    %c0_83 = arith.constant 0 : index
    %c0_84 = arith.constant 0 : index
    %256 = vector.load %arg5[%c1_82, %c0_83, %c0_84] : memref<2x1x128xf32, #tpu.memory_space<vmem>>, vector<1x1x128xf32>
    %257 = vector.shape_cast %256 : vector<1x1x128xf32> to vector<1x128xf32>
    %258 = vector.shape_cast %257 : vector<1x128xf32> to vector<1x128xf32>
    %259 = vector.broadcast %258 : vector<1x128xf32> to vector<8x128xf32>
    %c0_85 = arith.constant 0 : index
    %c0_86 = arith.constant 0 : index
    %c0_87 = arith.constant 0 : index
    %260 = vector.load %arg9[%c0_85, %c0_86, %c0_87] : memref<8x8x128xf32, #tpu.memory_space<vmem>>, vector<8x8x128xf32>
    %261 = vector.shape_cast %260 : vector<8x8x128xf32> to vector<64x128xf32>
    %cst_88 = arith.constant dense<0.000000e+00> : vector<64x384xf32>
    %262 = tpu.matmul %261, %251, %cst_88 {dimension_numbers = #tpu.dot_dimension_numbers<[1], [0], [0], [1], [0, 0, 1, 1], [], []>} : vector<64x128xf32>, vector<128x384xf32>, vector<64x384xf32> -> vector<64x384xf32>
    %263 = vector.broadcast %255 : vector<1x384xf32> to vector<64x384xf32>
    %264 = arith.addf %262, %263 : vector<64x384xf32>
    %265 = vector.shape_cast %264 : vector<64x384xf32> to vector<8x8x384xf32>
    %c0_89 = arith.constant 0 : index
    %c0_90 = arith.constant 0 : index
    %c0_91 = arith.constant 0 : index
    %266 = vector.load %arg10[%c0_89, %c0_90, %c0_91] : memref<8x8x384xf32, #tpu.memory_space<vmem>>, vector<8x8x384xf32>
    tpu.vector_store %arg10[%c0_89, %c0_90, %c0_91], %265 {strides = array<i32>} : memref<8x8x384xf32, #tpu.memory_space<vmem>>, vector<8x8x384xf32>,
    %cst_92 = arith.constant 0.000000e+00 : f32
    %267 = vector.broadcast %cst_92 : f32 to vector<8x128xf32>
    %c0_i32_93 = arith.constant 0 : i32
    %268 = arith.index_cast %c0_i32_93 : i32 to index
    %c0_94 = arith.constant 0 : index
    %c0_95 = arith.constant 0 : index
    %269 = vector.load %arg10[%268, %c0_94, %c0_95] : memref<8x8x384xf32, #tpu.memory_space<vmem>>, vector<1x8x384xf32>
    %270 = vector.shape_cast %269 : vector<1x8x384xf32> to vector<8x384xf32>
    %cst_96 = arith.constant dense<0.000000e+00> : vector<8x384xf32>
    %271 = tpu.matmul %267, %253, %cst_96 {dimension_numbers = #tpu.dot_dimension_numbers<[1], [0], [0], [1], [0, 0, 1, 1], [], []>} : vector<8x128xf32>, vector<128x384xf32>, vector<8x384xf32> -> vector<8x384xf32>
    %272 = vector.extract_strided_slice %270 {offsets = [0, 0], sizes = [8, 256], strides = [1, 1]} : vector<8x384xf32> to vector<8x256xf32>
    %273 = vector.extract_strided_slice %271 {offsets = [0, 0], sizes = [8, 256], strides = [1, 1]} : vector<8x384xf32> to vector<8x256xf32>
    %274 = arith.addf %272, %273 : vector<8x256xf32>
    %275 = arith.negf %274 : vector<8x256xf32>
    %276 = math.exp %275 : vector<8x256xf32>
    %cst_97 = arith.constant 1.000000e+00 : f32
    %277 = vector.broadcast %cst_97 : f32 to vector<8x256xf32>
    %278 = arith.addf %277, %276 : vector<8x256xf32>
    %279 = arith.divf %277, %278 : vector<8x256xf32>
    %280 = vector.extract_strided_slice %279 {offsets = [0, 0], sizes = [8, 128], strides = [1, 1]} : vector<8x256xf32> to vector<8x128xf32>
    %281 = vector.extract_strided_slice %279 {offsets = [0, 128], sizes = [8, 128], strides = [1, 1]} : vector<8x256xf32> to vector<8x128xf32>
    %282 = vector.extract_strided_slice %270 {offsets = [0, 256], sizes = [8, 128], strides = [1, 1]} : vector<8x384xf32> to vector<8x128xf32>
    %283 = vector.extract_strided_slice %271 {offsets = [0, 256], sizes = [8, 128], strides = [1, 1]} : vector<8x384xf32> to vector<8x128xf32>
    %284 = arith.addf %283, %259 : vector<8x128xf32>
    %285 = arith.mulf %280, %284 : vector<8x128xf32>
    %286 = arith.addf %282, %285 : vector<8x128xf32>
    %287 = math.tanh %286 : vector<8x128xf32>
    %cst_98 = arith.constant 1.000000e+00 : f32
    %288 = vector.broadcast %cst_98 : f32 to vector<8x128xf32>
    %289 = arith.subf %288, %281 : vector<8x128xf32>
    %290 = arith.mulf %289, %287 : vector<8x128xf32>
    %291 = arith.mulf %281, %267 : vector<8x128xf32>
    %292 = arith.addf %290, %291 : vector<8x128xf32>
    %c1_i32_99 = arith.constant 1 : i32
    %293 = arith.index_cast %c1_i32_99 : i32 to index
    %c0_100 = arith.constant 0 : index
    %c0_101 = arith.constant 0 : index
    %294 = vector.load %arg10[%293, %c0_100, %c0_101] : memref<8x8x384xf32, #tpu.memory_space<vmem>>, vector<1x8x384xf32>
    %295 = vector.shape_cast %294 : vector<1x8x384xf32> to vector<8x384xf32>
    %cst_102 = arith.constant dense<0.000000e+00> : vector<8x384xf32>
    %296 = tpu.matmul %292, %253, %cst_102 {dimension_numbers = #tpu.dot_dimension_numbers<[1], [0], [0], [1], [0, 0, 1, 1], [], []>} : vector<8x128xf32>, vector<128x384xf32>, vector<8x384xf32> -> vector<8x384xf32>
    %297 = vector.extract_strided_slice %295 {offsets = [0, 0], sizes = [8, 256], strides = [1, 1]} : vector<8x384xf32> to vector<8x256xf32>
    %298 = vector.extract_strided_slice %296 {offsets = [0, 0], sizes = [8, 256], strides = [1, 1]} : vector<8x384xf32> to vector<8x256xf32>
    %299 = arith.addf %297, %298 : vector<8x256xf32>
    %300 = arith.negf %299 : vector<8x256xf32>
    %301 = math.exp %300 : vector<8x256xf32>
    %cst_103 = arith.constant 1.000000e+00 : f32
    %302 = vector.broadcast %cst_103 : f32 to vector<8x256xf32>
    %303 = arith.addf %302, %301 : vector<8x256xf32>
    %304 = arith.divf %302, %303 : vector<8x256xf32>
    %305 = vector.extract_strided_slice %304 {offsets = [0, 0], sizes = [8, 128], strides = [1, 1]} : vector<8x256xf32> to vector<8x128xf32>
    %306 = vector.extract_strided_slice %304 {offsets = [0, 128], sizes = [8, 128], strides = [1, 1]} : vector<8x256xf32> to vector<8x128xf32>
    %307 = vector.extract_strided_slice %295 {offsets = [0, 256], sizes = [8, 128], strides = [1, 1]} : vector<8x384xf32> to vector<8x128xf32>
    %308 = vector.extract_strided_slice %296 {offsets = [0, 256], sizes = [8, 128], strides = [1, 1]} : vector<8x384xf32> to vector<8x128xf32>
    %309 = arith.addf %308, %259 : vector<8x128xf32>
    %310 = arith.mulf %305, %309 : vector<8x128xf32>
    %311 = arith.addf %307, %310 : vector<8x128xf32>
    %312 = math.tanh %311 : vector<8x128xf32>
    %cst_104 = arith.constant 1.000000e+00 : f32
    %313 = vector.broadcast %cst_104 : f32 to vector<8x128xf32>
    %314 = arith.subf %313, %306 : vector<8x128xf32>
    %315 = arith.mulf %314, %312 : vector<8x128xf32>
    %316 = arith.mulf %306, %292 : vector<8x128xf32>
    %317 = arith.addf %315, %316 : vector<8x128xf32>
    %c2_i32_105 = arith.constant 2 : i32
    %318 = arith.index_cast %c2_i32_105 : i32 to index
    %c0_106 = arith.constant 0 : index
    %c0_107 = arith.constant 0 : index
    %319 = vector.load %arg10[%318, %c0_106, %c0_107] : memref<8x8x384xf32, #tpu.memory_space<vmem>>, vector<1x8x384xf32>
    %320 = vector.shape_cast %319 : vector<1x8x384xf32> to vector<8x384xf32>
    %cst_108 = arith.constant dense<0.000000e+00> : vector<8x384xf32>
    %321 = tpu.matmul %317, %253, %cst_108 {dimension_numbers = #tpu.dot_dimension_numbers<[1], [0], [0], [1], [0, 0, 1, 1], [], []>} : vector<8x128xf32>, vector<128x384xf32>, vector<8x384xf32> -> vector<8x384xf32>
    %322 = vector.extract_strided_slice %320 {offsets = [0, 0], sizes = [8, 256], strides = [1, 1]} : vector<8x384xf32> to vector<8x256xf32>
    %323 = vector.extract_strided_slice %321 {offsets = [0, 0], sizes = [8, 256], strides = [1, 1]} : vector<8x384xf32> to vector<8x256xf32>
    %324 = arith.addf %322, %323 : vector<8x256xf32>
    %325 = arith.negf %324 : vector<8x256xf32>
    %326 = math.exp %325 : vector<8x256xf32>
    %cst_109 = arith.constant 1.000000e+00 : f32
    %327 = vector.broadcast %cst_109 : f32 to vector<8x256xf32>
    %328 = arith.addf %327, %326 : vector<8x256xf32>
    %329 = arith.divf %327, %328 : vector<8x256xf32>
    %330 = vector.extract_strided_slice %329 {offsets = [0, 0], sizes = [8, 128], strides = [1, 1]} : vector<8x256xf32> to vector<8x128xf32>
    %331 = vector.extract_strided_slice %329 {offsets = [0, 128], sizes = [8, 128], strides = [1, 1]} : vector<8x256xf32> to vector<8x128xf32>
    %332 = vector.extract_strided_slice %320 {offsets = [0, 256], sizes = [8, 128], strides = [1, 1]} : vector<8x384xf32> to vector<8x128xf32>
    %333 = vector.extract_strided_slice %321 {offsets = [0, 256], sizes = [8, 128], strides = [1, 1]} : vector<8x384xf32> to vector<8x128xf32>
    %334 = arith.addf %333, %259 : vector<8x128xf32>
    %335 = arith.mulf %330, %334 : vector<8x128xf32>
    %336 = arith.addf %332, %335 : vector<8x128xf32>
    %337 = math.tanh %336 : vector<8x128xf32>
    %cst_110 = arith.constant 1.000000e+00 : f32
    %338 = vector.broadcast %cst_110 : f32 to vector<8x128xf32>
    %339 = arith.subf %338, %331 : vector<8x128xf32>
    %340 = arith.mulf %339, %337 : vector<8x128xf32>
    %341 = arith.mulf %331, %317 : vector<8x128xf32>
    %342 = arith.addf %340, %341 : vector<8x128xf32>
    %c3_i32_111 = arith.constant 3 : i32
    %343 = arith.index_cast %c3_i32_111 : i32 to index
    %c0_112 = arith.constant 0 : index
    %c0_113 = arith.constant 0 : index
    %344 = vector.load %arg10[%343, %c0_112, %c0_113] : memref<8x8x384xf32, #tpu.memory_space<vmem>>, vector<1x8x384xf32>
    %345 = vector.shape_cast %344 : vector<1x8x384xf32> to vector<8x384xf32>
    %cst_114 = arith.constant dense<0.000000e+00> : vector<8x384xf32>
    %346 = tpu.matmul %342, %253, %cst_114 {dimension_numbers = #tpu.dot_dimension_numbers<[1], [0], [0], [1], [0, 0, 1, 1], [], []>} : vector<8x128xf32>, vector<128x384xf32>, vector<8x384xf32> -> vector<8x384xf32>
    %347 = vector.extract_strided_slice %345 {offsets = [0, 0], sizes = [8, 256], strides = [1, 1]} : vector<8x384xf32> to vector<8x256xf32>
    %348 = vector.extract_strided_slice %346 {offsets = [0, 0], sizes = [8, 256], strides = [1, 1]} : vector<8x384xf32> to vector<8x256xf32>
    %349 = arith.addf %347, %348 : vector<8x256xf32>
    %350 = arith.negf %349 : vector<8x256xf32>
    %351 = math.exp %350 : vector<8x256xf32>
    %cst_115 = arith.constant 1.000000e+00 : f32
    %352 = vector.broadcast %cst_115 : f32 to vector<8x256xf32>
    %353 = arith.addf %352, %351 : vector<8x256xf32>
    %354 = arith.divf %352, %353 : vector<8x256xf32>
    %355 = vector.extract_strided_slice %354 {offsets = [0, 0], sizes = [8, 128], strides = [1, 1]} : vector<8x256xf32> to vector<8x128xf32>
    %356 = vector.extract_strided_slice %354 {offsets = [0, 128], sizes = [8, 128], strides = [1, 1]} : vector<8x256xf32> to vector<8x128xf32>
    %357 = vector.extract_strided_slice %345 {offsets = [0, 256], sizes = [8, 128], strides = [1, 1]} : vector<8x384xf32> to vector<8x128xf32>
    %358 = vector.extract_strided_slice %346 {offsets = [0, 256], sizes = [8, 128], strides = [1, 1]} : vector<8x384xf32> to vector<8x128xf32>
    %359 = arith.addf %358, %259 : vector<8x128xf32>
    %360 = arith.mulf %355, %359 : vector<8x128xf32>
    %361 = arith.addf %357, %360 : vector<8x128xf32>
    %362 = math.tanh %361 : vector<8x128xf32>
    %cst_116 = arith.constant 1.000000e+00 : f32
    %363 = vector.broadcast %cst_116 : f32 to vector<8x128xf32>
    %364 = arith.subf %363, %356 : vector<8x128xf32>
    %365 = arith.mulf %364, %362 : vector<8x128xf32>
    %366 = arith.mulf %356, %342 : vector<8x128xf32>
    %367 = arith.addf %365, %366 : vector<8x128xf32>
    %c4_i32_117 = arith.constant 4 : i32
    %368 = arith.index_cast %c4_i32_117 : i32 to index
    %c0_118 = arith.constant 0 : index
    %c0_119 = arith.constant 0 : index
    %369 = vector.load %arg10[%368, %c0_118, %c0_119] : memref<8x8x384xf32, #tpu.memory_space<vmem>>, vector<1x8x384xf32>
    %370 = vector.shape_cast %369 : vector<1x8x384xf32> to vector<8x384xf32>
    %cst_120 = arith.constant dense<0.000000e+00> : vector<8x384xf32>
    %371 = tpu.matmul %367, %253, %cst_120 {dimension_numbers = #tpu.dot_dimension_numbers<[1], [0], [0], [1], [0, 0, 1, 1], [], []>} : vector<8x128xf32>, vector<128x384xf32>, vector<8x384xf32> -> vector<8x384xf32>
    %372 = vector.extract_strided_slice %370 {offsets = [0, 0], sizes = [8, 256], strides = [1, 1]} : vector<8x384xf32> to vector<8x256xf32>
    %373 = vector.extract_strided_slice %371 {offsets = [0, 0], sizes = [8, 256], strides = [1, 1]} : vector<8x384xf32> to vector<8x256xf32>
    %374 = arith.addf %372, %373 : vector<8x256xf32>
    %375 = arith.negf %374 : vector<8x256xf32>
    %376 = math.exp %375 : vector<8x256xf32>
    %cst_121 = arith.constant 1.000000e+00 : f32
    %377 = vector.broadcast %cst_121 : f32 to vector<8x256xf32>
    %378 = arith.addf %377, %376 : vector<8x256xf32>
    %379 = arith.divf %377, %378 : vector<8x256xf32>
    %380 = vector.extract_strided_slice %379 {offsets = [0, 0], sizes = [8, 128], strides = [1, 1]} : vector<8x256xf32> to vector<8x128xf32>
    %381 = vector.extract_strided_slice %379 {offsets = [0, 128], sizes = [8, 128], strides = [1, 1]} : vector<8x256xf32> to vector<8x128xf32>
    %382 = vector.extract_strided_slice %370 {offsets = [0, 256], sizes = [8, 128], strides = [1, 1]} : vector<8x384xf32> to vector<8x128xf32>
    %383 = vector.extract_strided_slice %371 {offsets = [0, 256], sizes = [8, 128], strides = [1, 1]} : vector<8x384xf32> to vector<8x128xf32>
    %384 = arith.addf %383, %259 : vector<8x128xf32>
    %385 = arith.mulf %380, %384 : vector<8x128xf32>
    %386 = arith.addf %382, %385 : vector<8x128xf32>
    %387 = math.tanh %386 : vector<8x128xf32>
    %cst_122 = arith.constant 1.000000e+00 : f32
    %388 = vector.broadcast %cst_122 : f32 to vector<8x128xf32>
    %389 = arith.subf %388, %381 : vector<8x128xf32>
    %390 = arith.mulf %389, %387 : vector<8x128xf32>
    %391 = arith.mulf %381, %367 : vector<8x128xf32>
    %392 = arith.addf %390, %391 : vector<8x128xf32>
    %c5_i32_123 = arith.constant 5 : i32
    %393 = arith.index_cast %c5_i32_123 : i32 to index
    %c0_124 = arith.constant 0 : index
    %c0_125 = arith.constant 0 : index
    %394 = vector.load %arg10[%393, %c0_124, %c0_125] : memref<8x8x384xf32, #tpu.memory_space<vmem>>, vector<1x8x384xf32>
    %395 = vector.shape_cast %394 : vector<1x8x384xf32> to vector<8x384xf32>
    %cst_126 = arith.constant dense<0.000000e+00> : vector<8x384xf32>
    %396 = tpu.matmul %392, %253, %cst_126 {dimension_numbers = #tpu.dot_dimension_numbers<[1], [0], [0], [1], [0, 0, 1, 1], [], []>} : vector<8x128xf32>, vector<128x384xf32>, vector<8x384xf32> -> vector<8x384xf32>
    %397 = vector.extract_strided_slice %395 {offsets = [0, 0], sizes = [8, 256], strides = [1, 1]} : vector<8x384xf32> to vector<8x256xf32>
    %398 = vector.extract_strided_slice %396 {offsets = [0, 0], sizes = [8, 256], strides = [1, 1]} : vector<8x384xf32> to vector<8x256xf32>
    %399 = arith.addf %397, %398 : vector<8x256xf32>
    %400 = arith.negf %399 : vector<8x256xf32>
    %401 = math.exp %400 : vector<8x256xf32>
    %cst_127 = arith.constant 1.000000e+00 : f32
    %402 = vector.broadcast %cst_127 : f32 to vector<8x256xf32>
    %403 = arith.addf %402, %401 : vector<8x256xf32>
    %404 = arith.divf %402, %403 : vector<8x256xf32>
    %405 = vector.extract_strided_slice %404 {offsets = [0, 0], sizes = [8, 128], strides = [1, 1]} : vector<8x256xf32> to vector<8x128xf32>
    %406 = vector.extract_strided_slice %404 {offsets = [0, 128], sizes = [8, 128], strides = [1, 1]} : vector<8x256xf32> to vector<8x128xf32>
    %407 = vector.extract_strided_slice %395 {offsets = [0, 256], sizes = [8, 128], strides = [1, 1]} : vector<8x384xf32> to vector<8x128xf32>
    %408 = vector.extract_strided_slice %396 {offsets = [0, 256], sizes = [8, 128], strides = [1, 1]} : vector<8x384xf32> to vector<8x128xf32>
    %409 = arith.addf %408, %259 : vector<8x128xf32>
    %410 = arith.mulf %405, %409 : vector<8x128xf32>
    %411 = arith.addf %407, %410 : vector<8x128xf32>
    %412 = math.tanh %411 : vector<8x128xf32>
    %cst_128 = arith.constant 1.000000e+00 : f32
    %413 = vector.broadcast %cst_128 : f32 to vector<8x128xf32>
    %414 = arith.subf %413, %406 : vector<8x128xf32>
    %415 = arith.mulf %414, %412 : vector<8x128xf32>
    %416 = arith.mulf %406, %392 : vector<8x128xf32>
    %417 = arith.addf %415, %416 : vector<8x128xf32>
    %c6_i32_129 = arith.constant 6 : i32
    %418 = arith.index_cast %c6_i32_129 : i32 to index
    %c0_130 = arith.constant 0 : index
    %c0_131 = arith.constant 0 : index
    %419 = vector.load %arg10[%418, %c0_130, %c0_131] : memref<8x8x384xf32, #tpu.memory_space<vmem>>, vector<1x8x384xf32>
    %420 = vector.shape_cast %419 : vector<1x8x384xf32> to vector<8x384xf32>
    %cst_132 = arith.constant dense<0.000000e+00> : vector<8x384xf32>
    %421 = tpu.matmul %417, %253, %cst_132 {dimension_numbers = #tpu.dot_dimension_numbers<[1], [0], [0], [1], [0, 0, 1, 1], [], []>} : vector<8x128xf32>, vector<128x384xf32>, vector<8x384xf32> -> vector<8x384xf32>
    %422 = vector.extract_strided_slice %420 {offsets = [0, 0], sizes = [8, 256], strides = [1, 1]} : vector<8x384xf32> to vector<8x256xf32>
    %423 = vector.extract_strided_slice %421 {offsets = [0, 0], sizes = [8, 256], strides = [1, 1]} : vector<8x384xf32> to vector<8x256xf32>
    %424 = arith.addf %422, %423 : vector<8x256xf32>
    %425 = arith.negf %424 : vector<8x256xf32>
    %426 = math.exp %425 : vector<8x256xf32>
    %cst_133 = arith.constant 1.000000e+00 : f32
    %427 = vector.broadcast %cst_133 : f32 to vector<8x256xf32>
    %428 = arith.addf %427, %426 : vector<8x256xf32>
    %429 = arith.divf %427, %428 : vector<8x256xf32>
    %430 = vector.extract_strided_slice %429 {offsets = [0, 0], sizes = [8, 128], strides = [1, 1]} : vector<8x256xf32> to vector<8x128xf32>
    %431 = vector.extract_strided_slice %429 {offsets = [0, 128], sizes = [8, 128], strides = [1, 1]} : vector<8x256xf32> to vector<8x128xf32>
    %432 = vector.extract_strided_slice %420 {offsets = [0, 256], sizes = [8, 128], strides = [1, 1]} : vector<8x384xf32> to vector<8x128xf32>
    %433 = vector.extract_strided_slice %421 {offsets = [0, 256], sizes = [8, 128], strides = [1, 1]} : vector<8x384xf32> to vector<8x128xf32>
    %434 = arith.addf %433, %259 : vector<8x128xf32>
    %435 = arith.mulf %430, %434 : vector<8x128xf32>
    %436 = arith.addf %432, %435 : vector<8x128xf32>
    %437 = math.tanh %436 : vector<8x128xf32>
    %cst_134 = arith.constant 1.000000e+00 : f32
    %438 = vector.broadcast %cst_134 : f32 to vector<8x128xf32>
    %439 = arith.subf %438, %431 : vector<8x128xf32>
    %440 = arith.mulf %439, %437 : vector<8x128xf32>
    %441 = arith.mulf %431, %417 : vector<8x128xf32>
    %442 = arith.addf %440, %441 : vector<8x128xf32>
    %c7_i32_135 = arith.constant 7 : i32
    %443 = arith.index_cast %c7_i32_135 : i32 to index
    %c0_136 = arith.constant 0 : index
    %c0_137 = arith.constant 0 : index
    %444 = vector.load %arg10[%443, %c0_136, %c0_137] : memref<8x8x384xf32, #tpu.memory_space<vmem>>, vector<1x8x384xf32>
    %445 = vector.shape_cast %444 : vector<1x8x384xf32> to vector<8x384xf32>
    %cst_138 = arith.constant dense<0.000000e+00> : vector<8x384xf32>
    %446 = tpu.matmul %442, %253, %cst_138 {dimension_numbers = #tpu.dot_dimension_numbers<[1], [0], [0], [1], [0, 0, 1, 1], [], []>} : vector<8x128xf32>, vector<128x384xf32>, vector<8x384xf32> -> vector<8x384xf32>
    %447 = vector.extract_strided_slice %445 {offsets = [0, 0], sizes = [8, 256], strides = [1, 1]} : vector<8x384xf32> to vector<8x256xf32>
    %448 = vector.extract_strided_slice %446 {offsets = [0, 0], sizes = [8, 256], strides = [1, 1]} : vector<8x384xf32> to vector<8x256xf32>
    %449 = arith.addf %447, %448 : vector<8x256xf32>
    %450 = arith.negf %449 : vector<8x256xf32>
    %451 = math.exp %450 : vector<8x256xf32>
    %cst_139 = arith.constant 1.000000e+00 : f32
    %452 = vector.broadcast %cst_139 : f32 to vector<8x256xf32>
    %453 = arith.addf %452, %451 : vector<8x256xf32>
    %454 = arith.divf %452, %453 : vector<8x256xf32>
    %455 = vector.extract_strided_slice %454 {offsets = [0, 0], sizes = [8, 128], strides = [1, 1]} : vector<8x256xf32> to vector<8x128xf32>
    %456 = vector.extract_strided_slice %454 {offsets = [0, 128], sizes = [8, 128], strides = [1, 1]} : vector<8x256xf32> to vector<8x128xf32>
    %457 = vector.extract_strided_slice %445 {offsets = [0, 256], sizes = [8, 128], strides = [1, 1]} : vector<8x384xf32> to vector<8x128xf32>
    %458 = vector.extract_strided_slice %446 {offsets = [0, 256], sizes = [8, 128], strides = [1, 1]} : vector<8x384xf32> to vector<8x128xf32>
    %459 = arith.addf %458, %259 : vector<8x128xf32>
    %460 = arith.mulf %455, %459 : vector<8x128xf32>
    %461 = arith.addf %457, %460 : vector<8x128xf32>
    %462 = math.tanh %461 : vector<8x128xf32>
    %cst_140 = arith.constant 1.000000e+00 : f32
    %463 = vector.broadcast %cst_140 : f32 to vector<8x128xf32>
    %464 = arith.subf %463, %456 : vector<8x128xf32>
    %465 = arith.mulf %464, %462 : vector<8x128xf32>
    %466 = arith.mulf %456, %442 : vector<8x128xf32>
    %467 = arith.addf %465, %466 : vector<8x128xf32>
    %c8_i32_141 = arith.constant 8 : i32
    %c0_142 = arith.constant 0 : index
    %c0_143 = arith.constant 0 : index
    %468 = vector.load %arg6[%c0_142, %c0_143] : memref<128x128xf32, #tpu.memory_space<vmem>>, vector<128x128xf32>
    %cst_144 = arith.constant dense<0.000000e+00> : vector<8x128xf32>
    %469 = tpu.matmul %467, %468, %cst_144 {dimension_numbers = #tpu.dot_dimension_numbers<[1], [0], [0], [1], [0, 0, 1, 1], [], []>} : vector<8x128xf32>, vector<128x128xf32>, vector<8x128xf32> -> vector<8x128xf32>
    %c0_145 = arith.constant 0 : index
    %c0_146 = arith.constant 0 : index
    %470 = vector.load %arg7[%c0_145, %c0_146] : memref<1x128xf32, #tpu.memory_space<vmem>>, vector<1x128xf32>
    %471 = vector.broadcast %470 : vector<1x128xf32> to vector<8x128xf32>
    %472 = arith.addf %469, %471 : vector<8x128xf32>
    %c0_147 = arith.constant 0 : index
    %c0_148 = arith.constant 0 : index
    %473 = vector.load %arg8[%c0_147, %c0_148] : memref<8x128xf32, #tpu.memory_space<vmem>>, vector<8x128xf32>
    tpu.vector_store %arg8[%c0_147, %c0_148], %472 {strides = array<i32>} : memref<8x128xf32, #tpu.memory_space<vmem>>, vector<8x128xf32>,
    return
  }
  func.func @transform_0(%arg0: i32) -> (i32, i32, i32) {
    %c0_i32 = arith.constant 0 : i32
    %c0_i32_0 = arith.constant 0 : i32
    %c0_i32_1 = arith.constant 0 : i32
    return %c0_i32, %arg0, %c0_i32_0 : i32, i32, i32
  }
  func.func @transform_1(%arg0: i32) -> (i32, i32, i32) {
    %c0_i32 = arith.constant 0 : i32
    %c0_i32_0 = arith.constant 0 : i32
    %c0_i32_1 = arith.constant 0 : i32
    %c0_i32_2 = arith.constant 0 : i32
    return %c0_i32, %c0_i32_0, %c0_i32_1 : i32, i32, i32
  }
  func.func @transform_2(%arg0: i32) -> (i32, i32, i32) {
    %c0_i32 = arith.constant 0 : i32
    %c0_i32_0 = arith.constant 0 : i32
    %c0_i32_1 = arith.constant 0 : i32
    %c0_i32_2 = arith.constant 0 : i32
    return %c0_i32, %c0_i32_0, %c0_i32_1 : i32, i32, i32
  }
  func.func @transform_3(%arg0: i32) -> (i32, i32, i32) {
    %c0_i32 = arith.constant 0 : i32
    %c0_i32_0 = arith.constant 0 : i32
    %c0_i32_1 = arith.constant 0 : i32
    %c0_i32_2 = arith.constant 0 : i32
    return %c0_i32, %c0_i32_0, %c0_i32_1 : i32, i32, i32
  }
  func.func @transform_4(%arg0: i32) -> (i32, i32, i32) {
    %c0_i32 = arith.constant 0 : i32
    %c0_i32_0 = arith.constant 0 : i32
    %c0_i32_1 = arith.constant 0 : i32
    %c0_i32_2 = arith.constant 0 : i32
    return %c0_i32, %c0_i32_0, %c0_i32_1 : i32, i32, i32
  }
  func.func @transform_5(%arg0: i32) -> (i32, i32) {
    %c0_i32 = arith.constant 0 : i32
    %c0_i32_0 = arith.constant 0 : i32
    %c0_i32_1 = arith.constant 0 : i32
    return %c0_i32, %c0_i32_0 : i32, i32
  }
  func.func @transform_6(%arg0: i32) -> (i32, i32) {
    %c0_i32 = arith.constant 0 : i32
    %c0_i32_0 = arith.constant 0 : i32
    %c0_i32_1 = arith.constant 0 : i32
    return %c0_i32, %c0_i32_0 : i32, i32
  }
  func.func @transform_7(%arg0: i32) -> (i32, i32) {
    %c0_i32 = arith.constant 0 : i32
    %c0_i32_0 = arith.constant 0 : i32
    return %arg0, %c0_i32 : i32, i32
  }
}

</mosaic_0001>

<bundles_post_ra>
// kernel: tpu_custom_call.1
= control target key start
LH: loop header
LB: loop body
LE: loop exit
PB: predicated region body
PF: predicated region fallthrough
CT: control target
= control target key end

     0   :  { %12 = vsyncpa [#allocation5], 0  ;;  %s4550_s0 = inlined_call_operand.hbm [shape: f32[8,8,128], index: 0, kind: input, shape index: {}]   ;;  %s4551_s1 = inlined_call_operand.hbm [shape: f32[2,128,384], index: 1, kind: input, shape index: {}]   ;;  %s4552_s2 = inlined_call_operand.hbm [shape: f32[2,128,384], index: 2, kind: input, shape index: {}]   ;;  %s4553_s3 = inlined_call_operand.hbm [shape: f32[2,1,384], index: 3, kind: input, shape index: {}]   ;;  %s4554_s4 = inlined_call_operand.vmem [shape: f32[2,1,128], index: 4, kind: input, shape index: {}]   ;;  %s4555_s5 = inlined_call_operand.hbm [shape: f32[128,128], index: 5, kind: input, shape index: {}]   ;;  %s4556_s6 = inlined_call_operand.vmem [shape: f32[1,128], index: 6, kind: input, shape index: {}]   ;;  %s4557_s7 = inlined_call_operand.hbm [shape: f32[8,128], index: 7, kind: output, shape index: {}]  }
   0x1   :  { %13 = vsyncpa [#allocation8], 0 }
   0x2   :  { %14 = vsyncpa [#allocation11], 0  ;;  %s33_s26 = sshll.u32 %s4551_s1, 4  ;;  %s34_s26 = int_to_ptr.hbm [resolvable:$true] %s33_s26 }
   0x3   :  { %15 = vsyncpa [#allocation6], 0  ;;  %s2952_s27 = smov [#allocation7]   ;;  %s59_s8 = sshll.u32 %s4553_s3, 4  ;;  %s60_s8 = int_to_ptr.hbm [resolvable:$true] %s59_s8 }
   0x4   :  { %s35_s28 = sshll.u32 %s2952_s27, 4  ;;  %s2953_s9 = smov 384   ;;  %s36_s28 = int_to_ptr.vmem [resolvable:$true] %s35_s28 }
   0x5   :  { %s2954_s10 = smov 24   ;;  %s2955_s11 = smov [#allocation10]  }
   0x6   :  { %41 = dma.hbm_to_vmem [thread:$0]  %s34_s26, 12288, %s36_s28, [#allocation8], %s2953_s9, %s2953_s9, %s2954_s10  }
   0x7   :  { %s61_s12 = sshll.u32 %s2955_s11, 4  ;;  %s2956_s13 = smov 48   ;;  %s62_s12 = int_to_ptr.vmem [resolvable:$true] %s61_s12 }
   0x8   :  { %s2957_s14 = smov 3   ;;  %s20_s16 = sshll.u32 %s4550_s0, 4  ;;  %s21_s16 = int_to_ptr.hbm [resolvable:$true] %s20_s16 }
   0x9   :  { %67 = dma.hbm_to_vmem [thread:$0]  %s60_s8, 96, %s62_s12, [#allocation11], %s2956_s13, %s2956_s13, %s2957_s14  }
   0xa   :  { %s2958_s17 = smov [#allocation4]   ;;  %s46_s20 = sshll.u32 %s4552_s2, 4  ;;  %s47_s20 = int_to_ptr.hbm [resolvable:$true] %s46_s20 }
   0xb   :  { %s22_s18 = sshll.u32 %s2958_s17, 4  ;;  %s2959_s21 = smov 128   ;;  %s23_s18 = int_to_ptr.vmem [resolvable:$true] %s22_s18 }
   0xc   :  { %s2960_s22 = smov 8   ;;  %s2961_s23 = smov [#allocation9]  }
   0xd   :  { %28 = dma.hbm_to_vmem [thread:$0]  %s21_s16, 1024, %s23_s18, [#allocation5], %s2959_s21, %s2959_s21, %s2960_s22  }
   0xe   :  { %s48_s24 = sshll.u32 %s2961_s23, 4  ;;  %s74_s27 = sshll.u32 %s4555_s5, 4  ;;  %s49_s24 = int_to_ptr.vmem [resolvable:$true] %s48_s24  ;;  %s75_s27 = int_to_ptr.hbm [resolvable:$true] %s74_s27 }
   0xf   :  { %54 = dma.hbm_to_vmem [thread:$0]  %s47_s20, 12288, %s49_s24, [#allocation8], %s2953_s9, %s2953_s9, %s2954_s10  }
  0x10   :  { %s2962_s0 = smov [#allocation12]  }
  0x11   :  { %s76_s28 = sshll.u32 %s2962_s0, 4  ;;  %s77_s28 = int_to_ptr.vmem [resolvable:$true] %s76_s28 }
  0x12   :  { %82 = dma.hbm_to_vmem [thread:$0]  %s75_s27, 2048, %s77_s28, [#allocation11], %s2959_s21, %s2959_s21, %s2960_s22  }
  0x13   :  { %2944 = dma.done.wait [#allocation5], 1024  }
  0x14   :  { %2945 = vsyncadd [#allocation5], 4294966272 }
  0x15   :  { %2946 = dma.done.wait [#allocation8], 24576  }
  0x16   :  { %2947 = vsyncadd [#allocation8], 4294942720 }
  0x17   :  { %2948 = dma.done.wait [#allocation11], 2144  }
  0x18   :  { %2949 = vsyncadd [#allocation11], 4294965152  ;;  %v150_v0 = vld [vmem:[#allocation7 + $0x168] sm:$0xff]  ;;  %v147_v2 = vld [vmem:[#allocation7 + $0x150] sm:$0xff]  ;;  %v4558_v47 = vmov 0.0   ;;  %s2964_s13 = smov [#allocation13]  }
  0x19   :  { %v3020_v1 = vld [vmem:[#allocation9 + $0x168] sm:$0xff]  ;;  %221 = vmatpush.msra.mxu0 %v150_v0  ;;  %v3023_v3 = vld [vmem:[#allocation9 + $0x150] sm:$0xff]  ;;  %v144_v4 = vld [vmem:[#allocation7 + $0x138] sm:$0xff]  ;;  %s2479_s14 = sshll.u32 %s2964_s13, 4  ;;  %s2481_s16 = sshll.u32 %s4557_s7, 4  ;;  %s2480_s14 = int_to_ptr.vmem [resolvable:$true] %s2479_s14  ;;  %s2482_s16 = int_to_ptr.hbm [resolvable:$true] %s2481_s16 }
  0x1a   :  { %371 = vmatpush.msra.mxu3 %v3020_v1  ;;  %v3025_v5 = vld [vmem:[#allocation9 + $0x138] sm:$0xff]  ;;  %v141_v6 = vld [vmem:[#allocation7 + $0x120] sm:$0xff]  ;;  %v138_v8 = vld [vmem:[#allocation7 + $0x108] sm:$0xff] }
  0x1b   :  { %222 = vmatpush.msra.mxu0 %v147_v2  ;;  %v3028_v7 = vld [vmem:[#allocation9 + $0x120] sm:$0xff]  ;;  %v3031_v9 = vld [vmem:[#allocation9 + $0x108] sm:$0xff]  ;;  %v135_v10 = vld [vmem:[#allocation7 + $0xf0] sm:$0xff] }
  0x1c   :  { %372 = vmatpush.msra.mxu3 %v3023_v3  ;;  %v3034_v11 = vld [vmem:[#allocation9 + $0xf0] sm:$0xff]  ;;  %v132_v12 = vld [vmem:[#allocation7 + $0xd8] sm:$0xff]  ;;  %v129_v14 = vld [vmem:[#allocation7 + $0xc0] sm:$0xff] }
  0x1d   :  { %223 = vmatpush.msra.mxu0 %v144_v4  ;;  %v3037_v13 = vld [vmem:[#allocation9 + $0xd8] sm:$0xff]  ;;  %v3040_v15 = vld [vmem:[#allocation9 + $0xc0] sm:$0xff]  ;;  %v151_v16 = vld [vmem:[#allocation7 + $0x170] sm:$0xff] }
  0x1e   :  { %373 = vmatpush.msra.mxu3 %v3025_v5  ;;  %v148_v17 = vld [vmem:[#allocation7 + $0x158] sm:$0xff]  ;;  %v126_v18 = vld [vmem:[#allocation7 + $0xa8] sm:$0xff]  ;;  %262 = vmatpush.msra.mxu1 %v151_v16  ;;  %v145_v20 = vld [vmem:[#allocation7 + $0x140] sm:$0xff] }
  0x1f   :  { %224 = vmatpush.msra.mxu0 %v141_v6  ;;  %v3043_v19 = vld [vmem:[#allocation9 + $0xa8] sm:$0xff]  ;;  %v123_v21 = vld [vmem:[#allocation7 + $0x90] sm:$0xff]  ;;  %v120_v24 = vld [vmem:[#allocation7 + $0x78] sm:$0xff] }
  0x20   :  { %374 = vmatpush.msra.mxu3 %v3028_v7  ;;  %v3046_v22 = vld [vmem:[#allocation9 + $0x90] sm:$0xff]  ;;  %263 = vmatpush.msra.mxu1 %v148_v17  ;;  %v142_v23 = vld [vmem:[#allocation7 + $0x128] sm:$0xff]  ;;  %v3049_v25 = vld [vmem:[#allocation9 + $0x78] sm:$0xff] }
  0x21   :  { %225 = vmatpush.msra.mxu0 %v138_v8  ;;  %v117_v26 = vld [vmem:[#allocation7 + $0x60] sm:$0xff]  ;;  %v139_v28 = vld [vmem:[#allocation7 + $0x110] sm:$0xff]  ;;  %v136_v29 = vld [vmem:[#allocation7 + $0xf8] sm:$0xff] }
  0x22   :  { %375 = vmatpush.msra.mxu3 %v3031_v9  ;;  %264 = vmatpush.msra.mxu1 %v145_v20  ;;  %v3052_v27 = vld [vmem:[#allocation9 + $0x60] sm:$0xff]  ;;  %v114_v30 = vld [vmem:[#allocation7 + $0x48] sm:$0xff]  ;;  %v111_v33 = vld [vmem:[#allocation7 + $0x30] sm:$0xff] }
  0x23   :  { %226 = vmatpush.msra.mxu0 %v135_v10  ;;  %v3055_v31 = vld [vmem:[#allocation9 + $0x48] sm:$0xff]  ;;  %v133_v32 = vld [vmem:[#allocation7 + $0xe0] sm:$0xff]  ;;  %v3058_v34 = vld [vmem:[#allocation9 + $0x30] sm:$0xff] }
  0x24   :  { %376 = vmatpush.msra.mxu3 %v3034_v11  ;;  %265 = vmatpush.msra.mxu1 %v142_v23  ;;  %v130_v35 = vld [vmem:[#allocation7 + $0xc8] sm:$0xff]  ;;  %v108_v36 = vld [vmem:[#allocation7 + $0x18] sm:$0xff]  ;;  %v127_v38 = vld [vmem:[#allocation7 + $0xb0] sm:$0xff] }
  0x25   :  { %227 = vmatpush.msra.mxu0 %v132_v12  ;;  %v3061_v37 = vld [vmem:[#allocation9 + $0x18] sm:$0xff]  ;;  %v105_v39 = vld [vmem:[#allocation7] sm:$0xff]  ;;  %v3069_v43 = vld [vmem:[#allocation9 + $0x170] sm:$0xff] }
  0x26   :  { %377 = vmatpush.msra.mxu3 %v3037_v13  ;;  %266 = vmatpush.msra.mxu1 %v139_v28  ;;  %4607 = vst [vmem:[#allocation18_spill] sm:$0xff] %v3061_v37  ;;  %v3064_v40 = vld [vmem:[#allocation9] sm:$0xff]  ;;  %v152_v42 = vld [vmem:[#allocation7 + $0x178] sm:$0xff]  ;;  %v146_v51 = vld [vmem:[#allocation7 + $0x148] sm:$0xff] }
  0x27   :  { %228 = vmatpush.msra.mxu0 %v129_v14  ;;  %4608 = vst [vmem:[#allocation19_spill] sm:$0xff] %v3064_v40  ;;  %v3067_v41 = vld [vmem:[#allocation4] sm:$0xff]  ;;  %v3071_v44 = vld [vmem:[#allocation9 + $0x178] sm:$0xff]  ;;  %303 = vmatpush.msra.mxu2 %v152_v42  ;;  %v3084_v53 = vld [vmem:[#allocation9 + $0x148] sm:$0xff] }
  0x28   :  { %378 = vmatpush.msra.mxu3 %v3040_v15  ;;  %267 = vmatpush.msra.mxu1 %v136_v29  ;;  %v124_v45 = vld [vmem:[#allocation7 + $0x98] sm:$0xff]  ;;  %v149_v46 = vld [vmem:[#allocation7 + $0x160] sm:$0xff]  ;;  %v118_v54 = vld [vmem:[#allocation7 + $0x68] sm:$0xff] }
  0x29   :  { %229 = vmatpush.msra.mxu0 %v126_v18  ;;  %v3076_v48 = vld [vmem:[#allocation9 + $0x158] sm:$0xff]  ;;  %v3078_v49 = vld [vmem:[#allocation9 + $0x160] sm:$0xff]  ;;  %304 = vmatpush.msra.mxu2 %v149_v46  ;;  %v143_v55 = vld [vmem:[#allocation7 + $0x130] sm:$0xff] }
  0x2a   :  { %379 = vmatpush.msra.mxu3 %v3043_v19  ;;  %268 = vmatpush.msra.mxu1 %v133_v32  ;;  %v121_v50 = vld [vmem:[#allocation7 + $0x80] sm:$0xff]  ;;  %v3088_v56 = vld [vmem:[#allocation9 + $0x128] sm:$0xff]  ;;  %v3090_v57 = vld [vmem:[#allocation9 + $0x130] sm:$0xff] }
  0x2b   :  { %230 = vmatpush.msra.mxu0 %v123_v21  ;;  %v3082_v52 = vld [vmem:[#allocation9 + $0x140] sm:$0xff]  ;;  %305 = vmatpush.msra.mxu2 %v146_v51  ;;  %v3093_v58 = vld [vmem:[#allocation4 + $0x8] sm:$0xff]  ;;  %v115_v59 = vld [vmem:[#allocation7 + $0x50] sm:$0xff] }
  0x2c   :  { %380 = vmatpush.msra.mxu3 %v3046_v22  ;;  %269 = vmatpush.msra.mxu1 %v130_v35  ;;  %v3096_v60 = vld [vmem:[#allocation9 + $0x110] sm:$0xff]  ;;  %v3098_v61 = vld [vmem:[#allocation9 + $0x118] sm:$0xff]  ;;  %v3105_v2 = vld [vmem:[#allocation9 + $0x100] sm:$0xff] }
  0x2d   :  { %231 = vmatpush.msra.mxu0 %v120_v24  ;;  %306 = vmatpush.msra.mxu2 %v143_v55  ;;  %v112_v62 = vld [vmem:[#allocation7 + $0x38] sm:$0xff]  ;;  %v109_v4 = vld [vmem:[#allocation7 + $0x20] sm:$0xff]  ;;  %v3111_v10 = vld [vmem:[#allocation9 + $0xe8] sm:$0xff] }
  0x2e   :  { %381 = vmatpush.msra.mxu3 %v3049_v25  ;;  %270 = vmatpush.msra.mxu1 %v127_v38  ;;  %v140_v63 = vld [vmem:[#allocation7 + $0x118] sm:$0xff]  ;;  %v137_v6 = vld [vmem:[#allocation7 + $0x100] sm:$0xff]  ;;  %v106_v12 = vld [vmem:[#allocation7 + $0x8] sm:$0xff] }
  0x2f   :  { %232 = vmatpush.msra.mxu0 %v117_v26  ;;  %v3103_v0 = vld [vmem:[#allocation9 + $0xf8] sm:$0xff]  ;;  %v3109_v8 = vld [vmem:[#allocation9 + $0xe0] sm:$0xff]  ;;  %307 = vmatpush.msra.mxu2 %v140_v63  ;;  %v134_v14 = vld [vmem:[#allocation7 + $0xe8] sm:$0xff] }
  0x30   :  { %382 = vmatpush.msra.mxu3 %v3052_v27  ;;  %271 = vmatpush.msra.mxu1 %v124_v45  ;;  %v3115_v16 = vld [vmem:[#allocation9 + $0xc8] sm:$0xff]  ;;  %v3117_v17 = vld [vmem:[#allocation9 + $0xd0] sm:$0xff]  ;;  %v3125_v21 = vld [vmem:[#allocation9 + $0xb8] sm:$0xff] }
  0x31   :  { %233 = vmatpush.msra.mxu0 %v114_v30  ;;  %308 = vmatpush.msra.mxu2 %v137_v6  ;;  %v3120_v18 = vld [vmem:[#allocation4 + $0x10] sm:$0xff]  ;;  %v3130_v24 = vld [vmem:[#allocation9 + $0x98] sm:$0xff]  ;;  %v3133_v26 = vld [vmem:[#allocation9 + $0xa0] sm:$0xff] }
  0x32   :  { %383 = vmatpush.msra.mxu3 %v3055_v31  ;;  %272 = vmatpush.msra.mxu1 %v121_v50  ;;  %v3123_v20 = vld [vmem:[#allocation9 + $0xb0] sm:$0xff]  ;;  %v128_v28 = vld [vmem:[#allocation7 + $0xb8] sm:$0xff]  ;;  %v3137_v29 = vld [vmem:[#allocation9 + $0x80] sm:$0xff] }
  0x33   :  { %234 = vmatpush.msra.mxu0 %v111_v33  ;;  %309 = vmatpush.msra.mxu2 %v134_v14  ;;  %v131_v23 = vld [vmem:[#allocation7 + $0xd0] sm:$0xff]  ;;  %v3139_v30 = vld [vmem:[#allocation9 + $0x88] sm:$0xff]  ;;  %v125_v32 = vld [vmem:[#allocation7 + $0xa0] sm:$0xff] }
  0x34   :  { %384 = vmatpush.msra.mxu3 %v3058_v34  ;;  %273 = vmatpush.msra.mxu1 %v118_v54  ;;  %v3144_v33 = vld [vmem:[#allocation9 + $0x68] sm:$0xff]  ;;  %v3146_v35 = vld [vmem:[#allocation9 + $0x70] sm:$0xff]  ;;  %v3155_v42 = vld [vmem:[#allocation9 + $0x58] sm:$0xff] }
  0x35   :  { %235 = vmatpush.msra.mxu0 %v108_v36  ;;  %310 = vmatpush.msra.mxu2 %v131_v23  ;;  %v3150_v36 = vld [vmem:[#allocation4 + $0x18] sm:$0xff]  ;;  %v122_v38 = vld [vmem:[#allocation7 + $0x88] sm:$0xff]  ;;  %v119_v45 = vld [vmem:[#allocation7 + $0x70] sm:$0xff] }
  0x36   :  { %385 = vmatpush.msra.mxu3 %v3061_v37  ;;  %274 = vmatpush.msra.mxu1 %v115_v59  ;;  %v3161_v46 = vld [vmem:[#allocation9 + $0x38] sm:$0xff]  ;;  %v3163_v50 = vld [vmem:[#allocation9 + $0x40] sm:$0xff]  ;;  %v3169_v55 = vld [vmem:[#allocation9 + $0x28] sm:$0xff] }
  0x37   :  { %236 = vmatpush.msra.mxu0 %v105_v39  ;;  %311 = vmatpush.msra.mxu2 %v128_v28  ;;  %v3153_v39 = vld [vmem:[#allocation9 + $0x50] sm:$0xff]  ;;  %4609 = vst [vmem:[#allocation20_spill] sm:$0xff] %v3161_v46  ;;  %v116_v51 = vld [vmem:[#allocation7 + $0x58] sm:$0xff]  ;;  %v3167_v54 = vld [vmem:[#allocation9 + $0x20] sm:$0xff] }
  0x38   :  { %386 = vmatpush.msra.mxu3 %v3064_v40  ;;  %237 = vmatmul.f32.vlgmr.msra.gmra.mxu0 %v3067_v41  ;;  %4610 = vst [vmem:[#allocation21_spill] sm:$0xff] %v3167_v54  ;;  %v113_v59 = vld [vmem:[#allocation7 + $0x40] sm:$0xff]  ;;  %v3176_v63 = vld [vmem:[#allocation9 + $0x10] sm:$0xff]  ;;  %v110_v6 = vld [vmem:[#allocation7 + $0x28] sm:$0xff] }
  0x39   :  { %387 = vmatmul.f32.vlgmr.msra.gmra.mxu3 %v4558_v47  ;;  %411 = vmatpush.msrb.mxu0 %v3071_v44  ;;  %4611 = vst [vmem:[#allocation22_spill] sm:$0xff] %v3169_v55  ;;  %v3194_v14 = vld [vmem:[#allocation4 + $0x28] sm:$0xff]  ;;  %v201_v23 = vld [vmem:[#allocation10] sm:$0x7] }
  0x3a   :  { %391 = vmatpush.msrb.mxu3 %v3069_v43  ;;  %275 = vmatpush.msra.mxu1 %v112_v62  ;;  %v3174_v62 = vld [vmem:[#allocation9 + $0x8] sm:$0xff]  ;;  %4613 = vst [vmem:[#allocation24_spill] sm:$0xff] %v3176_v63 }
  0x3b   :  { %412 = vmatpush.msrb.mxu0 %v3078_v49  ;;  %312 = vmatpush.msra.mxu2 %v125_v32  ;;  %4612 = vst [vmem:[#allocation23_spill] sm:$0xff] %v3174_v62  ;;  %v3337_v32 = vperm.slane %v201_v23, 0 }
  0x3c   :  { %392 = vmatpush.msrb.mxu3 %v3076_v48  ;;  %276 = vmatpush.msra.mxu1 %v109_v4  ;;  %v3180_v4 = vld [vmem:[#allocation4 + $0x20] sm:$0xff] }
  0x3d   :  { %413 = vmatpush.msrb.mxu0 %v3084_v53  ;;  %313 = vmatpush.msra.mxu2 %v122_v38  ;;  %4615 = vst [vmem:[#allocation26_spill] sm:$0xff] %v3337_v32 }
  0x3e   :  { %393 = vmatpush.msrb.mxu3 %v3082_v52  ;;  %277 = vmatpush.msra.mxu1 %v106_v12  ;;  %v107_v12 = vld [vmem:[#allocation7 + $0x10] sm:$0xff] }
  0x3f   :  { %414 = vmatpush.msrb.mxu0 %v3090_v57  ;;  %278 = vmatmul.f32.vlgmr.msra.gmra.mxu1 %v3067_v41 }
  0x40   :  { %394 = vmatpush.msrb.mxu3 %v3088_v56  ;;  %240 = vmatmul.f32.gmra.mxu0 %v3093_v58 }
  0x41   :  { %415 = vmatpush.msrb.mxu0 %v3098_v61  ;;  %484 = vmatpush.msrb.mxu1 %v3020_v1 }
  0x42   :  { %395 = vmatpush.msrb.mxu3 %v3096_v60  ;;  %314 = vmatpush.msra.mxu2 %v119_v45 }
  0x43   :  { %416 = vmatpush.msrb.mxu0 %v3105_v2  ;;  %485 = vmatpush.msrb.mxu1 %v3023_v3 }
  0x44   :  { %396 = vmatpush.msrb.mxu3 %v3103_v0  ;;  %315 = vmatpush.msra.mxu2 %v116_v51 }
  0x45   :  { %417 = vmatpush.msrb.mxu0 %v3111_v10  ;;  %486 = vmatpush.msrb.mxu1 %v3025_v5 }
  0x46   :  { %397 = vmatpush.msrb.mxu3 %v3109_v8  ;;  %316 = vmatpush.msra.mxu2 %v113_v59 }
  0x47   :  { %418 = vmatpush.msrb.mxu0 %v3117_v17  ;;  %281 = vmatmul.f32.gmra.mxu1 %v3093_v58 }
  0x48   :  { %398 = vmatpush.msrb.mxu3 %v3115_v16  ;;  %243 = vmatmul.f32.gmra.mxu0 %v3120_v18 }
  0x49   :  { %419 = vmatpush.msrb.mxu0 %v3125_v21  ;;  %487 = vmatpush.msrb.mxu1 %v3028_v7 }
  0x4a   :  { %399 = vmatpush.msrb.mxu3 %v3123_v20  ;;  %317 = vmatpush.msra.mxu2 %v110_v6 }
  0x4b   :  { %420 = vmatpush.msrb.mxu0 %v3133_v26  ;;  %488 = vmatpush.msrb.mxu1 %v3031_v9 }
  0x4c   :  { %400 = vmatpush.msrb.mxu3 %v3130_v24  ;;  %318 = vmatpush.msra.mxu2 %v107_v12  ;;  %v3344_v12 = vperm.slane %v201_v23, 1 }
  0x4d   :  { %421 = vmatpush.msrb.mxu0 %v3139_v30  ;;  %489 = vmatpush.msrb.mxu1 %v3034_v11 }
  0x4e   :  { %401 = vmatpush.msrb.mxu3 %v3137_v29  ;;  %319 = vmatmul.f32.vlgmr.msra.gmra.mxu2 %v3067_v41  ;;  %v3212_v41 = vld [vmem:[#allocation4 + $0x30] sm:$0xff]  ;;  %4618 = vst [vmem:[#allocation29_spill] sm:$0xff] %v3344_v12 }
  0x4f   :  { %422 = vmatpush.msrb.mxu0 %v3146_v35  ;;  %284 = vmatmul.f32.gmra.mxu1 %v3120_v18 }
  0x50   :  { %402 = vmatpush.msrb.mxu3 %v3144_v33  ;;  %246 = vmatmul.f32.gmra.mxu0 %v3150_v36 }
  0x51   :  { %423 = vmatpush.msrb.mxu0 %v3155_v42  ;;  %490 = vmatpush.msrb.mxu1 %v3037_v13 }
  0x52   :  { %403 = vmatpush.msrb.mxu3 %v3153_v39  ;;  %504 = vmatpush.msrb.mxu2 %v3069_v43 }
  0x53   :  { %424 = vmatpush.msrb.mxu0 %v3163_v50  ;;  %491 = vmatpush.msrb.mxu1 %v3040_v15 }
  0x54   :  { %404 = vmatpush.msrb.mxu3 %v3161_v46  ;;  %505 = vmatpush.msrb.mxu2 %v3076_v48 }
  0x55   :  { %425 = vmatpush.msrb.mxu0 %v3169_v55  ;;  %492 = vmatpush.msrb.mxu1 %v3043_v19 }
  0x56   :  { %405 = vmatpush.msrb.mxu3 %v3167_v54  ;;  %506 = vmatpush.msrb.mxu2 %v3082_v52 }
  0x57   :  { %426 = vmatpush.msrb.mxu0 %v3176_v63  ;;  %493 = vmatpush.msrb.mxu1 %v3046_v22 }
  0x58   :  { %406 = vmatpush.msrb.mxu3 %v3174_v62  ;;  %249 = vmatmul.f32.gmra.mxu0 %v3180_v4 }
  0x59   :  { %407 = vmatmul.f32.vlgmr.msrb.gmra.mxu3 %v4558_v47  ;;  %598 = vmatpush.msra.mxu0 %v3020_v1 }
  0x5a   :  { %524 = vmatpush.msra.mxu3 %v3071_v44  ;;  %287 = vmatmul.f32.gmra.mxu1 %v3150_v36 }
  0x5b   :  { %507 = vmatpush.msrb.mxu2 %v3088_v56  ;;  %494 = vmatpush.msrb.mxu1 %v3049_v25 }
  0x5c   :  { %525 = vmatpush.msra.mxu3 %v3078_v49  ;;  %322 = vmatmul.f32.gmra.mxu2 %v3093_v58  ;;  %v3230_v58 = vld [vmem:[#allocation4 + $0x38] sm:$0xff] }
  0x5d   :  { %508 = vmatpush.msrb.mxu2 %v3096_v60  ;;  %495 = vmatpush.msrb.mxu1 %v3052_v27 }
  0x5e   :  { %526 = vmatpush.msra.mxu3 %v3084_v53  ;;  %599 = vmatpush.msra.mxu0 %v3023_v3 }
  0x5f   :  { %509 = vmatpush.msrb.mxu2 %v3103_v0  ;;  %496 = vmatpush.msrb.mxu1 %v3055_v31 }
  0x60   :  { %252 = vmatmul.f32.gmra.mxu0 %v3194_v14  ;;  %527 = vmatpush.msra.mxu3 %v3090_v57 }
  0x61   :  { %510 = vmatpush.msrb.mxu2 %v3109_v8  ;;  %497 = vmatpush.msrb.mxu1 %v3058_v34 }
  0x62   :  { %528 = vmatpush.msra.mxu3 %v3098_v61  ;;  %290 = vmatmul.f32.gmra.mxu1 %v3180_v4 }
  0x63   :  { %511 = vmatpush.msrb.mxu2 %v3115_v16  ;;  %498 = vmatpush.msrb.mxu1 %v3061_v37 }
  0x64   :  { %529 = vmatpush.msra.mxu3 %v3105_v2  ;;  %325 = vmatmul.f32.gmra.mxu2 %v3120_v18 }
  0x65   :  { %512 = vmatpush.msrb.mxu2 %v3123_v20  ;;  %499 = vmatpush.msrb.mxu1 %v3064_v40 }
  0x66   :  { %530 = vmatpush.msra.mxu3 %v3111_v10  ;;  %600 = vmatpush.msra.mxu0 %v3025_v5 }
  0x67   :  { %618 = vmatpush.msra.mxu1 %v3069_v43  ;;  %513 = vmatpush.msrb.mxu2 %v3130_v24 }
  0x68   :  { %255 = vmatmul.f32.gmra.mxu0 %v3212_v41  ;;  %531 = vmatpush.msra.mxu3 %v3117_v17 }
  0x69   :  { %514 = vmatpush.msrb.mxu2 %v3137_v29  ;;  %619 = vmatpush.msra.mxu1 %v3076_v48 }
  0x6a   :  { %532 = vmatpush.msra.mxu3 %v3125_v21  ;;  %293 = vmatmul.f32.gmra.mxu1 %v3194_v14 }
  0x6b   :  { %515 = vmatpush.msrb.mxu2 %v3144_v33  ;;  %620 = vmatpush.msra.mxu1 %v3082_v52 }
  0x6c   :  { %533 = vmatpush.msra.mxu3 %v3133_v26  ;;  %328 = vmatmul.f32.gmra.mxu2 %v3150_v36 }
  0x6d   :  { %516 = vmatpush.msrb.mxu2 %v3153_v39  ;;  %601 = vmatpush.msra.mxu0 %v3028_v7 }
  0x6e   :  { %534 = vmatpush.msra.mxu3 %v3139_v30  ;;  %621 = vmatpush.msra.mxu1 %v3088_v56 }
  0x6f   :  { %517 = vmatpush.msrb.mxu2 %v3161_v46  ;;  %602 = vmatpush.msra.mxu0 %v3031_v9 }
  0x70   :  { %258 = vmatmul.f32.gmra.mxu0 %v3230_v58  ;;  %535 = vmatpush.msra.mxu3 %v3146_v35 }
  0x71   :  { %518 = vmatpush.msrb.mxu2 %v3167_v54  ;;  %622 = vmatpush.msra.mxu1 %v3096_v60 }
  0x72   :  { %536 = vmatpush.msra.mxu3 %v3155_v42  ;;  %296 = vmatmul.f32.gmra.mxu1 %v3212_v41 }
  0x73   :  { %603 = vmatpush.msra.mxu0 %v3034_v11  ;;  %519 = vmatpush.msrb.mxu2 %v3174_v62 }
  0x74   :  { %537 = vmatpush.msra.mxu3 %v3163_v50  ;;  %623 = vmatpush.msra.mxu1 %v3103_v0 }
  0x75   :  { %331 = vmatmul.f32.gmra.mxu2 %v3180_v4  ;;  %604 = vmatpush.msra.mxu0 %v3037_v13 }
  0x76   :  { %538 = vmatpush.msra.mxu3 %v3169_v55  ;;  %638 = vmatpush.msra.mxu2 %v3071_v44 }
  0x77   :  { %624 = vmatpush.msra.mxu1 %v3109_v8  ;;  %605 = vmatpush.msra.mxu0 %v3040_v15 }
  0x78   :  { %427 = vmatmul.f32.vlgmr.msrb.gmra.mxu0 %v4558_v47  ;;  %539 = vmatpush.msra.mxu3 %v3176_v63 }
  0x79   :  { %639 = vmatpush.msra.mxu2 %v3078_v49  ;;  %625 = vmatpush.msra.mxu1 %v3115_v16 }
  0x7a   :  { %712 = vmatpush.msrb.mxu3 %v3020_v1  ;;  %606 = vmatpush.msra.mxu0 %v3043_v19 }
  0x7b   :  { %640 = vmatpush.msra.mxu2 %v3084_v53  ;;  %626 = vmatpush.msra.mxu1 %v3123_v20 }
  0x7c   :  { %713 = vmatpush.msrb.mxu3 %v3023_v3  ;;  %299 = vmatmul.f32.gmra.mxu1 %v3230_v58 }
  0x7d   :  { %607 = vmatpush.msra.mxu0 %v3046_v22  ;;  %641 = vmatpush.msra.mxu2 %v3090_v57 }
  0x7e   :  { %627 = vmatpush.msra.mxu1 %v3130_v24  ;;  %334 = vmatmul.f32.gmra.mxu2 %v3194_v14 }
  0x7f   :  { %608 = vmatpush.msra.mxu0 %v3049_v25  ;;  %642 = vmatpush.msra.mxu2 %v3098_v61 }
  0x80   :  { %628 = vmatpush.msra.mxu1 %v3137_v29  ;;  %714 = vmatpush.msrb.mxu3 %v3025_v5 }
  0x81   :  { %609 = vmatpush.msra.mxu0 %v3052_v27  ;;  %643 = vmatpush.msra.mxu2 %v3105_v2 }
  0x82   :  { %629 = vmatpush.msra.mxu1 %v3144_v33  ;;  %715 = vmatpush.msrb.mxu3 %v3028_v7 }
  0x83   :  { %610 = vmatpush.msra.mxu0 %v3055_v31  ;;  %644 = vmatpush.msra.mxu2 %v3111_v10 }
  0x84   :  { %630 = vmatpush.msra.mxu1 %v3153_v39  ;;  %716 = vmatpush.msrb.mxu3 %v3031_v9 }
  0x85   :  { %611 = vmatpush.msra.mxu0 %v3058_v34  ;;  %645 = vmatpush.msra.mxu2 %v3117_v17 }
  0x86   :  { %631 = vmatpush.msra.mxu1 %v3161_v46  ;;  %337 = vmatmul.f32.gmra.mxu2 %v3212_v41 }
  0x87   :  { %612 = vmatpush.msra.mxu0 %v3061_v37  ;;  %646 = vmatpush.msra.mxu2 %v3125_v21 }
  0x88   :  { %632 = vmatpush.msra.mxu1 %v3167_v54  ;;  %717 = vmatpush.msrb.mxu3 %v3034_v11 }
  0x89   :  { %613 = vmatpush.msra.mxu0 %v3064_v40  ;;  %647 = vmatpush.msra.mxu2 %v3133_v26 }
  0x8a   :  { %633 = vmatpush.msra.mxu1 %v3174_v62  ;;  %718 = vmatpush.msrb.mxu3 %v3037_v13 }
  0x8b   :  { %732 = vmatpush.msrb.mxu0 %v3069_v43  ;;  %648 = vmatpush.msra.mxu2 %v3139_v30 }
  0x8c   :  { %719 = vmatpush.msrb.mxu3 %v3040_v15 }
  0x8d   :  { %733 = vmatpush.msrb.mxu0 %v3076_v48  ;;  %649 = vmatpush.msra.mxu2 %v3146_v35 }
  0x8e   :  { %340 = vmatmul.f32.gmra.mxu2 %v3230_v58  ;;  %720 = vmatpush.msrb.mxu3 %v3043_v19 }
  0x8f   :  { %734 = vmatpush.msrb.mxu0 %v3082_v52  ;;  %650 = vmatpush.msra.mxu2 %v3155_v42 }
  0x90   :  { %721 = vmatpush.msrb.mxu3 %v3046_v22 }
  0x91   :  { %735 = vmatpush.msrb.mxu0 %v3088_v56  ;;  %651 = vmatpush.msra.mxu2 %v3163_v50 }
  0x92   :  { %722 = vmatpush.msrb.mxu3 %v3049_v25 }
  0x93   :  { %736 = vmatpush.msrb.mxu0 %v3096_v60  ;;  %652 = vmatpush.msra.mxu2 %v3169_v55 }
  0x94   :  { %723 = vmatpush.msrb.mxu3 %v3052_v27 }
  0x95   :  { %737 = vmatpush.msrb.mxu0 %v3103_v0  ;;  %653 = vmatpush.msra.mxu2 %v3176_v63 }
  0x96   :  { %724 = vmatpush.msrb.mxu3 %v3055_v31 }
  0x97   :  { %738 = vmatpush.msrb.mxu0 %v3109_v8 }
  0x98   :  { %725 = vmatpush.msrb.mxu3 %v3058_v34 }
  0x99   :  { %739 = vmatpush.msrb.mxu0 %v3115_v16 }
  0x9a   :  { %726 = vmatpush.msrb.mxu3 %v3061_v37 }
  0x9b   :  { %740 = vmatpush.msrb.mxu0 %v3123_v20 }
  0x9c   :  { %727 = vmatpush.msrb.mxu3 %v3064_v40 }
  0x9d   :  { %741 = vmatpush.msrb.mxu0 %v3130_v24 }
  0x9f   :  { %742 = vmatpush.msrb.mxu0 %v3137_v29 }
  0xa1   :  { %743 = vmatpush.msrb.mxu0 %v3144_v33 }
  0xa3   :  { %744 = vmatpush.msrb.mxu0 %v3153_v39 }
  0xa5   :  { %745 = vmatpush.msrb.mxu0 %v3161_v46 }
  0xa7   :  { %746 = vmatpush.msrb.mxu0 %v3167_v54 }
  0xa9   :  { %747 = vmatpush.msrb.mxu0 %v3174_v62 }
  0xb5   :  { %v238_v18 = vpop.f32.mrf.mxu0 }
  0xb6   :  { %v239_v38 = vadd.f32 %v238_v18, %v3337_v32 }
  0xbc   :  { %v388_v36 = vpop.f32.mrf.mxu3  ;;  %v279_v41 = vpop.f32.mrf.mxu1 }
  0xbd   :  { %v3335_v28 = vpop.f32.mrf.mxu0  ;;  %v431_v51 = vadd.f32 %v388_v36, %v239_v38 }
  0xbe   :  { %4614 = vst [vmem:[#allocation25_spill] sm:$0xff] %v3335_v28  ;;  %v280_v28 = vadd.f32 %v279_v41, %v3344_v12 }
  0xbf   :  { %v2493_v59 = vmul.f32 -1.442695, %v431_v51 }
  0xc1   :  { %2542 = vpow2.f32 %v2493_v59 }
  0xc5   :  { %v3340_v45 = vpop.f32.mrf.mxu0 }
  0xc6   :  { %4616 = vst [vmem:[#allocation27_spill] sm:$0xff] %v3340_v45 }
  0xc7   :  { %v2543_v6 = vpop.eup %2542 }
  0xc8   :  { %v439_v47 = vadd.f32 1.0, %v2543_v6 }
  0xca   :  { %2544 = vrcp.f32 %v439_v47  ;;  %v452_v54 = vand.u32 2147483648, %v439_v47  ;;  %vm446_vm1 = vweird.f32 %v439_v47 }
  0xcd   :  { %v3342_v4 = vpop.f32.mrf.mxu0 }
  0xce   :  { %4617 = vst [vmem:[#allocation28_spill] sm:$0xff] %v3342_v4 }
  0xd0   :  { %v2545_v59 = vpop.eup %2544 }
  0xd1   :  { %v320_v51 = vpop.f32.mrf.mxu2  ;;  %v442_v4 = vmul.f32 %v2545_v59, %v439_v47  ;;  %vm447_vm0 = vweird.f32 %v2545_v59 }
  0xd2   :  { %vm448_vm2 = vmor %vm446_vm1, %vm447_vm0 }
  0xd5   :  { %v250_v14 = vpop.f32.mrf.mxu0 }
  0xd6   :  { %v3347_v58 = vadd.f32 %v250_v14, %v3337_v32 }
  0xd8   :  { %4619 = vst [vmem:[#allocation30_spill] sm:$0xff] %v3347_v58  ;;  %v443_v58 = vsub.f32 1.0, %v442_v4  ;;  %v3368_v4 = vperm.slane %v201_v23, 2 }
  0xda   :  { %4625 = vst [vmem:[#allocation36_spill] sm:$0xff] %v3368_v4 }
  0xdc   :  { %v408_v18 = vpop.f32.mrf.mxu3 }
  0xdd   :  { %v432_v62 = vadd.f32 %v408_v18, %v280_v28  ;;  %v253_v45 = vpop.f32.mrf.mxu0  ;;  %v444_v28 = vmul.f32 %v2545_v59, %v443_v58 }
  0xde   :  { %v3351_v38 = vadd.f32 %v253_v45, %v3337_v32 }
  0xdf   :  { %v2494_v36 = vmul.f32 -1.442695, %v432_v62  ;;  %v3356_v41 = vpop.f32.mrf.mxu2 }
  0xe0   :  { %4620 = vst [vmem:[#allocation31_spill] sm:$0xff] %v3351_v38  ;;  %v445_v38 = vadd.f32 %v2545_v59, %v444_v28 }
  0xe1   :  { %2546 = vpow2.f32 %v2494_v36  ;;  %4622 = vst [vmem:[#allocation33_spill] sm:$0xff] %v3356_v41 }
  0xe5   :  { %v256_v40 = vpop.f32.mrf.mxu0 }
  0xe6   :  { %v3354_v14 = vadd.f32 %v256_v40, %v3337_v32  ;;  %v3366_v40 = vld [vmem:[%s4554_s4] ss:$0 sm:$0xff] }
  0xe7   :  { %v2547_v63 = vpop.eup %2546  ;;  %v3361_v12 = vpop.f32.mrf.mxu2 }
  0xe8   :  { %4621 = vst [vmem:[#allocation32_spill] sm:$0xff] %v3354_v14  ;;  %v440_v6 = vadd.f32 1.0, %v2547_v63  ;;  %v450_v63 = vand.u32 2147483647, %v439_v47  ;;  %v453_v14 = vor.u32 1.1754944e-38, %v452_v54 }
  0xe9   :  { %4624 = vst [vmem:[#allocation35_spill] sm:$0xff] %v3361_v12  ;;  %v321_v12 = vadd.f32 %v320_v51, %v3368_v4 }
  0xea   :  { %2548 = vrcp.f32 %v440_v6  ;;  %vm451_vm3 = vcmp.eq.f32.partialorder %v450_v63, 8.507059e+37  ;;  %vm461_vm4 = vweird.f32 %v440_v6  ;;  %v465_v47 = vand.u32 2147483647, %v440_v6 }
  0xec   :  { %vm466_vm7 = vcmp.eq.f32.partialorder %v465_v47, 8.507059e+37 }
  0xed   :  { %v259_v18 = vpop.f32.mrf.mxu0 }
  0xee   :  { %v3359_v62 = vadd.f32 %v259_v18, %v3337_v32  ;;  %v449_v18 = vsel %vm448_vm2, %v2545_v59, %v445_v38  ;;  %v467_v32 = vand.u32 2147483648, %v440_v6 }
  0xef   :  { %v454_v41 = vsel %vm451_vm3, %v453_v14, %v449_v18  ;;  %v329_v46 = vpop.f32.mrf.mxu2 }
  0xf0   :  { %4623 = vst [vmem:[#allocation34_spill] sm:$0xff] %v3359_v62  ;;  %v2549_v45 = vpop.eup %2548  ;;  %v3373_v23 = vadd.f32 %v329_v46, %v3368_v4  ;;  %v468_v54 = vor.u32 1.1754944e-38, %v467_v32 }
  0xf1   :  { %v457_v36 = vmul.f32 %v2549_v45, %v440_v6  ;;  %vm462_vm5 = vweird.f32 %v2549_v45 }
  0xf2   :  { %vm463_vm6 = vmor %vm461_vm4, %vm462_vm5 }
  0xf3   :  { %v458_v37 = vsub.f32 1.0, %v457_v36 }
  0xf5   :  { %v459_v58 = vmul.f32 %v2549_v45, %v458_v37  ;;  %v428_v62 = vpop.f32.mrf.mxu0 }
  0xf6   :  { %v471_v28 = vadd.f32 %v3366_v40, %v428_v62 }
  0xf7   :  { %v460_v36 = vadd.f32 %v2549_v45, %v459_v58 }
  0xf8   :  { %v472_v55 = vmul.f32 %v471_v28, %v454_v41  ;;  %v332_v62 = vpop.f32.mrf.mxu2  ;;  %v4643_v28 = vld [vmem:[#allocation25_spill] sm:$0xff] }
  0xf9   :  { %v464_v38 = vsel %vm463_vm6, %v2549_v45, %v460_v36  ;;  %v3376_v63 = vadd.f32 %v332_v62, %v3368_v4  ;;  %v4642_v45 = vld [vmem:[#allocation26_spill] sm:$0xff] }
  0xfa   :  { %v473_v37 = vadd.f32 %v472_v55, %v321_v12  ;;  %v469_v59 = vsel %vm466_vm7, %v468_v54, %v464_v38  ;;  %v242_v36 = vadd.f32 %v4643_v28, %v4642_v45  ;;  %v4644_v54 = vld [vmem:[#allocation29_spill] sm:$0xff] }
  0xfb   :  { %v475_v51 = vsub.f32 1.0, %v469_v59  ;;  %4626 = vst [vmem:[#allocation37_spill] sm:$0xff] %v3376_v63  ;;  %v477_v41 = vmul.f32 0.0, %v469_v59 }
  0xfc   :  { %2550 = vtanh.f32 %v473_v37 }
 0x101   :  { %v335_v46 = vpop.f32.mrf.mxu2 }
 0x102   :  { %v2551_v14 = vpop.eup %2550  ;;  %v3385_v55 = vadd.f32 %v335_v46, %v3368_v4 }
 0x103   :  { %v476_v58 = vmul.f32 %v2551_v14, %v475_v51 }
 0x104   :  { %4628 = vst [vmem:[#allocation39_spill] sm:$0xff] %v3385_v55 }
 0x105   :  { %v3378_v18 = vadd.f32 %v477_v41, %v476_v58 }
 0x107   :  { %4627 = vst [vmem:[#allocation38_spill] sm:$0xff] %v3378_v18  ;;  %500 = vmatmul.f32.vlgmr.msrb.gmra.mxu1 %v3378_v18  ;;  %520 = vmatmul.f32.vlgmr.msrb.gmra.mxu2 %v3378_v18 }
 0x108   :  { %540 = vmatmul.f32.vlgmr.msra.gmra.mxu3 %v3378_v18  ;;  %752 = vmatpush.msrb.mxu1 %v3071_v44 }
 0x109   :  { %826 = vmatpush.msrb.mxu2 %v3020_v1  ;;  %846 = vmatpush.msra.mxu3 %v3069_v43  ;;  %v338_v1 = vpop.f32.mrf.mxu2 }
 0x10a   :  { %753 = vmatpush.msrb.mxu1 %v3078_v49  ;;  %v3400_v32 = vadd.f32 %v338_v1, %v3368_v4 }
 0x10b   :  { %827 = vmatpush.msrb.mxu2 %v3023_v3  ;;  %847 = vmatpush.msra.mxu3 %v3076_v48  ;;  %v4630_v3 = vld [vmem:[#allocation20_spill] sm:$0xff] }
 0x10c   :  { %754 = vmatpush.msrb.mxu1 %v3084_v53  ;;  %4629 = vst [vmem:[#allocation40_spill] sm:$0xff] %v3400_v32 }
 0x10d   :  { %828 = vmatpush.msrb.mxu2 %v3025_v5  ;;  %848 = vmatpush.msra.mxu3 %v3082_v52  ;;  %v4631_v5 = vld [vmem:[#allocation22_spill] sm:$0xff] }
 0x10e   :  { %755 = vmatpush.msrb.mxu1 %v3090_v57 }
 0x10f   :  { %829 = vmatpush.msrb.mxu2 %v3028_v7  ;;  %849 = vmatpush.msra.mxu3 %v3088_v56  ;;  %v4632_v7 = vld [vmem:[#allocation18_spill] sm:$0xff] }
 0x110   :  { %756 = vmatpush.msrb.mxu1 %v3098_v61 }
 0x111   :  { %830 = vmatpush.msrb.mxu2 %v3031_v9  ;;  %850 = vmatpush.msra.mxu3 %v3096_v60  ;;  %v4633_v9 = vld [vmem:[#allocation21_spill] sm:$0xff]  ;;  %v3449_v6 = vpop.f32.mrf.mxu2 }
 0x112   :  { %757 = vmatpush.msrb.mxu1 %v3105_v2 }
 0x113   :  { %831 = vmatpush.msrb.mxu2 %v3034_v11  ;;  %851 = vmatpush.msra.mxu3 %v3103_v0  ;;  %v4634_v11 = vld [vmem:[#allocation24_spill] sm:$0xff] }
 0x114   :  { %758 = vmatpush.msrb.mxu1 %v3111_v10  ;;  %4641 = vst [vmem:[#allocation24_spill] sm:$0xff] %v3449_v6 }
 0x115   :  { %832 = vmatpush.msrb.mxu2 %v3037_v13  ;;  %852 = vmatpush.msra.mxu3 %v3109_v8  ;;  %v4635_v13 = vld [vmem:[#allocation19_spill] sm:$0xff] }
 0x116   :  { %759 = vmatpush.msrb.mxu1 %v3117_v17 }
 0x117   :  { %833 = vmatpush.msrb.mxu2 %v3040_v15  ;;  %853 = vmatpush.msra.mxu3 %v3115_v16  ;;  %v4636_v15 = vld [vmem:[#allocation23_spill] sm:$0xff] }
 0x118   :  { %760 = vmatpush.msrb.mxu1 %v3125_v21 }
 0x119   :  { %834 = vmatpush.msrb.mxu2 %v3043_v19  ;;  %854 = vmatpush.msra.mxu3 %v3123_v20  ;;  %v282_v19 = vpop.f32.mrf.mxu1 }
 0x11a   :  { %761 = vmatpush.msrb.mxu1 %v3133_v26  ;;  %v283_v59 = vadd.f32 %v282_v19, %v4644_v54 }
 0x11b   :  { %835 = vmatpush.msrb.mxu2 %v3046_v22  ;;  %855 = vmatpush.msra.mxu3 %v3130_v24 }
 0x11c   :  { %762 = vmatpush.msrb.mxu1 %v3139_v30 }
 0x11d   :  { %836 = vmatpush.msrb.mxu2 %v3049_v25  ;;  %856 = vmatpush.msra.mxu3 %v3137_v29 }
 0x11e   :  { %763 = vmatpush.msrb.mxu1 %v3146_v35 }
 0x11f   :  { %837 = vmatpush.msrb.mxu2 %v3052_v27  ;;  %857 = vmatpush.msra.mxu3 %v3144_v33 }
 0x120   :  { %764 = vmatpush.msrb.mxu1 %v3155_v42 }
 0x121   :  { %838 = vmatpush.msrb.mxu2 %v3055_v31  ;;  %858 = vmatpush.msra.mxu3 %v3153_v39  ;;  %v3437_v22 = vpop.f32.mrf.mxu1 }
 0x122   :  { %765 = vmatpush.msrb.mxu1 %v3163_v50 }
 0x123   :  { %839 = vmatpush.msrb.mxu2 %v3058_v34  ;;  %859 = vmatpush.msra.mxu3 %v4630_v3 }
 0x124   :  { %766 = vmatpush.msrb.mxu1 %v4631_v5 }
 0x125   :  { %840 = vmatpush.msrb.mxu2 %v4632_v7  ;;  %860 = vmatpush.msra.mxu3 %v4633_v9 }
 0x126   :  { %767 = vmatpush.msrb.mxu1 %v4634_v11 }
 0x127   :  { %841 = vmatpush.msrb.mxu2 %v4635_v13  ;;  %861 = vmatpush.msra.mxu3 %v4636_v15 }
 0x129   :  { %v3439_v25 = vpop.f32.mrf.mxu1 }
 0x131   :  { %v3441_v27 = vpop.f32.mrf.mxu1 }
 0x132   :  { %4637 = vst [vmem:[#allocation20_spill] sm:$0xff] %v3441_v27 }
 0x139   :  { %v3443_v31 = vpop.f32.mrf.mxu1 }
 0x13a   :  { %4638 = vst [vmem:[#allocation22_spill] sm:$0xff] %v3443_v31 }
 0x141   :  { %v3445_v34 = vpop.f32.mrf.mxu1 }
 0x142   :  { %4639 = vst [vmem:[#allocation18_spill] sm:$0xff] %v3445_v34 }
 0x149   :  { %v3447_v12 = vpop.f32.mrf.mxu1 }
 0x14a   :  { %4640 = vst [vmem:[#allocation21_spill] sm:$0xff] %v3447_v12 }
 0x184   :  { %v501_v47 = vpop.f32.mrf.mxu1 }
 0x185   :  { %v544_v37 = vadd.f32 %v501_v47, %v242_v36 }
 0x187   :  { %v2495_v38 = vmul.f32 -1.442695, %v544_v37 }
 0x189   :  { %2552 = vpow2.f32 %v2495_v38 }
 0x18a   :  { %v521_v62 = vpop.f32.mrf.mxu2 }
 0x18b   :  { %v545_v51 = vadd.f32 %v521_v62, %v283_v59  ;;  %v541_v19 = vpop.f32.mrf.mxu3 }
 0x18d   :  { %v2496_v14 = vmul.f32 -1.442695, %v545_v51 }
 0x18f   :  { %v2553_v58 = vpop.eup %2552  ;;  %2554 = vpow2.f32 %v2496_v14  ;;  %v584_v14 = vadd.f32 %v3366_v40, %v541_v19 }
 0x190   :  { %v552_v41 = vadd.f32 1.0, %v2553_v58  ;;  %v4645_v58 = vld [vmem:[#allocation33_spill] sm:$0xff] }
 0x192   :  { %2556 = vrcp.f32 %v552_v41  ;;  %v565_v28 = vand.u32 2147483648, %v552_v41  ;;  %v563_v36 = vand.u32 2147483647, %v552_v41  ;;  %vm559_vm9 = vweird.f32 %v552_v41 }
 0x194   :  { %v566_v59 = vor.u32 1.1754944e-38, %v565_v28  ;;  %vm564_vm11 = vcmp.eq.f32.partialorder %v563_v36, 8.507059e+37 }
 0x195   :  { %v2555_v46 = vpop.eup %2554 }
 0x196   :  { %v553_v1 = vadd.f32 1.0, %v2555_v46  ;;  %v324_v46 = vadd.f32 %v4645_v58, %v3368_v4 }
 0x198   :  { %v2557_v7 = vpop.eup %2556  ;;  %2558 = vrcp.f32 %v553_v1  ;;  %v578_v55 = vand.u32 2147483647, %v553_v1  ;;  %vm574_vm13 = vweird.f32 %v553_v1 }
 0x199   :  { %v555_v13 = vmul.f32 %v2557_v7, %v552_v41  ;;  %vm560_vm8 = vweird.f32 %v2557_v7 }
 0x19a   :  { %vm561_vm10 = vmor %vm559_vm9, %vm560_vm8  ;;  %vm579_vm15 = vcmp.eq.f32.partialorder %v578_v55, 8.507059e+37  ;;  %v3469_v55 = vld [vmem:[#allocation9 + $0x150] sm:$0xff] }
 0x19b   :  { %v556_v6 = vsub.f32 1.0, %v555_v13 }
 0x19d   :  { %v557_v12 = vmul.f32 %v2557_v7, %v556_v6  ;;  %v580_v6 = vand.u32 2147483648, %v553_v1 }
 0x19e   :  { %v2559_v47 = vpop.eup %2558 }
 0x19f   :  { %v570_v37 = vmul.f32 %v2559_v47, %v553_v1  ;;  %v558_v38 = vadd.f32 %v2557_v7, %v557_v12  ;;  %vm575_vm12 = vweird.f32 %v2559_v47  ;;  %v581_v41 = vor.u32 1.1754944e-38, %v580_v6 }
 0x1a0   :  { %vm576_vm14 = vmor %vm574_vm13, %vm575_vm12 }
 0x1a1   :  { %v571_v62 = vsub.f32 1.0, %v570_v37  ;;  %v562_v51 = vsel %vm561_vm10, %v2557_v7, %v558_v38 }
 0x1a2   :  { %v567_v13 = vsel %vm564_vm11, %v566_v59, %v562_v51 }
 0x1a3   :  { %v572_v32 = vmul.f32 %v2559_v47, %v571_v62  ;;  %v585_v34 = vmul.f32 %v584_v14, %v567_v13 }
 0x1a5   :  { %v573_v31 = vadd.f32 %v2559_v47, %v572_v32  ;;  %v586_v12 = vadd.f32 %v585_v34, %v324_v46  ;;  %v3464_v32 = vld [vmem:[#allocation9 + $0x168] sm:$0xff] }
 0x1a7   :  { %v577_v28 = vsel %vm576_vm14, %v2559_v47, %v573_v31  ;;  %2560 = vtanh.f32 %v586_v12  ;;  %v3474_v31 = vld [vmem:[#allocation9 + $0x138] sm:$0xff] }
 0x1a8   :  { %v582_v7 = vsel %vm579_vm15, %v581_v41, %v577_v28  ;;  %v4651_v41 = vld [vmem:[#allocation35_spill] sm:$0xff] }
 0x1a9   :  { %v588_v36 = vsub.f32 1.0, %v582_v7  ;;  %v590_v38 = vmul.f32 %v582_v7, %v3378_v18  ;;  %v327_v28 = vadd.f32 %v4651_v41, %v3368_v4  ;;  %v3637_v41 = vld [vmem:[#allocation9 + $0x68] sm:$0xff] }
 0x1ad   :  { %v2561_v19 = vpop.eup %2560 }
 0x1ae   :  { %v589_v37 = vmul.f32 %v2561_v19, %v588_v36 }
 0x1b0   :  { %v3458_v59 = vadd.f32 %v590_v38, %v589_v37 }
 0x1b2   :  { %4646 = vst [vmem:[#allocation19_spill] sm:$0xff] %v3458_v59  ;;  %614 = vmatmul.f32.vlgmr.msra.gmra.mxu0 %v3458_v59  ;;  %634 = vmatmul.f32.vlgmr.msra.gmra.mxu1 %v3458_v59 }
 0x1b3   :  { %654 = vmatmul.f32.vlgmr.msra.gmra.mxu2 %v3458_v59  ;;  %866 = vmatpush.msra.mxu0 %v3071_v44  ;;  %v3479_v44 = vld [vmem:[#allocation9 + $0x120] sm:$0xff] }
 0x1b4   :  { %940 = vmatpush.msra.mxu1 %v3464_v32  ;;  %960 = vmatpush.msra.mxu2 %v3069_v43  ;;  %v3484_v43 = vld [vmem:[#allocation9 + $0x108] sm:$0xff] }
 0x1b5   :  { %867 = vmatpush.msra.mxu0 %v3078_v49  ;;  %v3494_v49 = vld [vmem:[#allocation9 + $0xd8] sm:$0xff] }
 0x1b6   :  { %941 = vmatpush.msra.mxu1 %v3469_v55  ;;  %961 = vmatpush.msra.mxu2 %v3076_v48  ;;  %v3489_v48 = vld [vmem:[#allocation9 + $0xf0] sm:$0xff] }
 0x1b7   :  { %868 = vmatpush.msra.mxu0 %v3084_v53  ;;  %v3504_v53 = vld [vmem:[#allocation9 + $0xa8] sm:$0xff] }
 0x1b8   :  { %942 = vmatpush.msra.mxu1 %v3474_v31  ;;  %962 = vmatpush.msra.mxu2 %v3082_v52  ;;  %v3499_v52 = vld [vmem:[#allocation9 + $0xc0] sm:$0xff] }
 0x1b9   :  { %869 = vmatpush.msra.mxu0 %v3090_v57  ;;  %v3514_v57 = vld [vmem:[#allocation9 + $0x78] sm:$0xff] }
 0x1ba   :  { %943 = vmatpush.msra.mxu1 %v3479_v44  ;;  %963 = vmatpush.msra.mxu2 %v3088_v56  ;;  %v3509_v56 = vld [vmem:[#allocation9 + $0x90] sm:$0xff] }
 0x1bb   :  { %870 = vmatpush.msra.mxu0 %v3098_v61  ;;  %v3524_v61 = vld [vmem:[#allocation9 + $0x48] sm:$0xff] }
 0x1bc   :  { %944 = vmatpush.msra.mxu1 %v3484_v43  ;;  %964 = vmatpush.msra.mxu2 %v3096_v60  ;;  %v3519_v60 = vld [vmem:[#allocation9 + $0x60] sm:$0xff] }
 0x1bd   :  { %871 = vmatpush.msra.mxu0 %v3105_v2  ;;  %v3534_v2 = vld [vmem:[#allocation9 + $0x18] sm:$0xff] }
 0x1be   :  { %945 = vmatpush.msra.mxu1 %v3489_v48  ;;  %965 = vmatpush.msra.mxu2 %v3103_v0  ;;  %v3529_v0 = vld [vmem:[#allocation9 + $0x30] sm:$0xff]  ;;  %4648 = vst [vmem:[#allocation26_spill] sm:$0xff] %v3534_v2 }
 0x1bf   :  { %872 = vmatpush.msra.mxu0 %v3111_v10  ;;  %4647 = vst [vmem:[#allocation23_spill] sm:$0xff] %v3529_v0  ;;  %v4650_v10 = vld [vmem:[#allocation27_spill] sm:$0xff] }
 0x1c0   :  { %946 = vmatpush.msra.mxu1 %v3494_v49  ;;  %966 = vmatpush.msra.mxu2 %v3109_v8  ;;  %v3539_v8 = vld [vmem:[#allocation9] sm:$0xff] }
 0x1c1   :  { %873 = vmatpush.msra.mxu0 %v3117_v17  ;;  %4649 = vst [vmem:[#allocation25_spill] sm:$0xff] %v3539_v8  ;;  %v286_v17 = vadd.f32 %v3437_v22, %v4644_v54 }
 0x1c2   :  { %947 = vmatpush.msra.mxu1 %v3499_v52  ;;  %967 = vmatpush.msra.mxu2 %v3115_v16  ;;  %v245_v16 = vadd.f32 %v4650_v10, %v4642_v45 }
 0x1c3   :  { %874 = vmatpush.msra.mxu0 %v3125_v21 }
 0x1c4   :  { %948 = vmatpush.msra.mxu1 %v3504_v53  ;;  %968 = vmatpush.msra.mxu2 %v3123_v20 }
 0x1c5   :  { %875 = vmatpush.msra.mxu0 %v3133_v26 }
 0x1c6   :  { %949 = vmatpush.msra.mxu1 %v3509_v56  ;;  %969 = vmatpush.msra.mxu2 %v3130_v24 }
 0x1c7   :  { %876 = vmatpush.msra.mxu0 %v3139_v30 }
 0x1c8   :  { %950 = vmatpush.msra.mxu1 %v3514_v57  ;;  %970 = vmatpush.msra.mxu2 %v3137_v29 }
 0x1c9   :  { %877 = vmatpush.msra.mxu0 %v3146_v35 }
 0x1ca   :  { %951 = vmatpush.msra.mxu1 %v3519_v60  ;;  %971 = vmatpush.msra.mxu2 %v3144_v33 }
 0x1cb   :  { %878 = vmatpush.msra.mxu0 %v3155_v42 }
 0x1cc   :  { %952 = vmatpush.msra.mxu1 %v3524_v61  ;;  %972 = vmatpush.msra.mxu2 %v3153_v39 }
 0x1cd   :  { %879 = vmatpush.msra.mxu0 %v3163_v50 }
 0x1ce   :  { %953 = vmatpush.msra.mxu1 %v3529_v0  ;;  %973 = vmatpush.msra.mxu2 %v4630_v3 }
 0x1cf   :  { %880 = vmatpush.msra.mxu0 %v4631_v5 }
 0x1d0   :  { %954 = vmatpush.msra.mxu1 %v3534_v2  ;;  %974 = vmatpush.msra.mxu2 %v4633_v9 }
 0x1d1   :  { %881 = vmatpush.msra.mxu0 %v4634_v11 }
 0x1d2   :  { %955 = vmatpush.msra.mxu1 %v3539_v8  ;;  %975 = vmatpush.msra.mxu2 %v4636_v15 }
 0x22f   :  { %v615_v20 = vpop.f32.mrf.mxu0  ;;  %v635_v21 = vpop.f32.mrf.mxu1 }
 0x230   :  { %v658_v24 = vadd.f32 %v615_v20, %v245_v16  ;;  %v659_v26 = vadd.f32 %v635_v21, %v286_v17 }
 0x232   :  { %v2497_v29 = vmul.f32 -1.442695, %v658_v24  ;;  %v2498_v30 = vmul.f32 -1.442695, %v659_v26 }
 0x234   :  { %2562 = vpow2.f32 %v2497_v29  ;;  %v3556_v29 = vld [vmem:[#allocation9 + $0x178] sm:$0xff] }
 0x235   :  { %2564 = vpow2.f32 %v2498_v30  ;;  %v3560_v30 = vld [vmem:[#allocation9 + $0x170] sm:$0xff] }
 0x236   :  { %v655_v51 = vpop.f32.mrf.mxu2 }
 0x237   :  { %v698_v13 = vadd.f32 %v3366_v40, %v655_v51  ;;  %v3612_v51 = vld [vmem:[#allocation9 + $0xb8] sm:$0xff] }
 0x23a   :  { %v2563_v33 = vpop.eup %2562 }
 0x23b   :  { %v2565_v35 = vpop.eup %2564  ;;  %v666_v39 = vadd.f32 1.0, %v2563_v33  ;;  %v3563_v33 = vld [vmem:[#allocation9 + $0x160] sm:$0xff] }
 0x23c   :  { %v667_v42 = vadd.f32 1.0, %v2565_v35  ;;  %v3567_v35 = vld [vmem:[#allocation9 + $0x158] sm:$0xff] }
 0x23d   :  { %2566 = vrcp.f32 %v666_v39  ;;  %v679_v34 = vand.u32 2147483648, %v666_v39  ;;  %v677_v47 = vand.u32 2147483647, %v666_v39  ;;  %vm673_vm1 = vweird.f32 %v666_v39 }
 0x23e   :  { %2568 = vrcp.f32 %v667_v42  ;;  %v694_v7 = vand.u32 2147483648, %v667_v42  ;;  %vm688_vm5 = vweird.f32 %v667_v42  ;;  %v692_v19 = vand.u32 2147483647, %v667_v42 }
 0x23f   :  { %v680_v58 = vor.u32 1.1754944e-38, %v679_v34  ;;  %vm678_vm3 = vcmp.eq.f32.partialorder %v677_v47, 8.507059e+37  ;;  %v3598_v34 = vld [vmem:[#allocation9 + $0xe8] sm:$0xff]  ;;  %v3605_v47 = vld [vmem:[#allocation9 + $0xd0] sm:$0xff] }
 0x240   :  { %v695_v10 = vor.u32 1.1754944e-38, %v694_v7  ;;  %vm693_vm7 = vcmp.eq.f32.partialorder %v692_v19, 8.507059e+37  ;;  %v3644_v7 = vld [vmem:[#allocation9 + $0x50] sm:$0xff]  ;;  %v3651_v19 = vld [vmem:[#allocation9 + $0x38] sm:$0xff] }
 0x241   :  { %4652 = vst [vmem:[#allocation33_spill] sm:$0xff] %v3651_v19 }
 0x243   :  { %v2567_v50 = vpop.eup %2566 }
 0x244   :  { %v2569_v3 = vpop.eup %2568  ;;  %v669_v5 = vmul.f32 %v2567_v50, %v666_v39  ;;  %vm674_vm0 = vweird.f32 %v2567_v50  ;;  %v3570_v39 = vld [vmem:[#allocation9 + $0x148] sm:$0xff] }
 0x245   :  { %v684_v9 = vmul.f32 %v2569_v3, %v667_v42  ;;  %vm675_vm2 = vmor %vm673_vm1, %vm674_vm0  ;;  %vm689_vm4 = vweird.f32 %v2569_v3  ;;  %v3574_v42 = vld [vmem:[#allocation9 + $0x140] sm:$0xff] }
 0x246   :  { %v670_v15 = vsub.f32 1.0, %v669_v5  ;;  %vm690_vm6 = vmor %vm688_vm5, %vm689_vm4  ;;  %v3584_v5 = vld [vmem:[#allocation9 + $0x118] sm:$0xff] }
 0x247   :  { %v685_v22 = vsub.f32 1.0, %v684_v9  ;;  %v3588_v9 = vld [vmem:[#allocation9 + $0x110] sm:$0xff] }
 0x248   :  { %v671_v1 = vmul.f32 %v2567_v50, %v670_v15  ;;  %v3591_v15 = vld [vmem:[#allocation9 + $0x100] sm:$0xff] }
 0x249   :  { %v686_v62 = vmul.f32 %v2569_v3, %v685_v22  ;;  %v3595_v22 = vld [vmem:[#allocation9 + $0xf8] sm:$0xff] }
 0x24a   :  { %v672_v14 = vadd.f32 %v2567_v50, %v671_v1  ;;  %v3602_v1 = vld [vmem:[#allocation9 + $0xe0] sm:$0xff] }
 0x24b   :  { %v687_v6 = vadd.f32 %v2569_v3, %v686_v62  ;;  %v3609_v62 = vld [vmem:[#allocation9 + $0xc8] sm:$0xff] }
 0x24c   :  { %v676_v46 = vsel %vm675_vm2, %v2567_v50, %v672_v14  ;;  %v3577_v50 = vld [vmem:[#allocation9 + $0x130] sm:$0xff] }
 0x24d   :  { %v681_v12 = vsel %vm678_vm3, %v680_v58, %v676_v46  ;;  %v691_v38 = vsel %vm690_vm6, %v2569_v3, %v687_v6  ;;  %v3581_v3 = vld [vmem:[#allocation9 + $0x128] sm:$0xff]  ;;  %v3616_v14 = vld [vmem:[#allocation9 + $0xb0] sm:$0xff]  ;;  %v3619_v58 = vld [vmem:[#allocation9 + $0xa0] sm:$0xff] }
 0x24e   :  { %v699_v36 = vmul.f32 %v698_v13, %v681_v12  ;;  %v696_v16 = vsel %vm693_vm7, %v695_v10, %v691_v38  ;;  %v3623_v46 = vld [vmem:[#allocation9 + $0x98] sm:$0xff]  ;;  %v3626_v13 = vld [vmem:[#allocation9 + $0x88] sm:$0xff]  ;;  %v3630_v6 = vld [vmem:[#allocation9 + $0x80] sm:$0xff] }
 0x24f   :  { %v702_v17 = vsub.f32 1.0, %v696_v16  ;;  %v704_v24 = vmul.f32 %v696_v16, %v3458_v59  ;;  %v3633_v12 = vld [vmem:[#allocation9 + $0x70] sm:$0xff]  ;;  %v3658_v38 = vld [vmem:[#allocation9 + $0x20] sm:$0xff]  ;;  %v3663_v10 = vld [vmem:[#allocation9 + $0x8] sm:$0xff]  ;;  %v289_v16 = vadd.f32 %v3439_v25, %v4644_v54 }
 0x250   :  { %v700_v37 = vadd.f32 %v699_v36, %v327_v28  ;;  %v3640_v28 = vld [vmem:[#allocation9 + $0x58] sm:$0xff]  ;;  %v3647_v36 = vld [vmem:[#allocation9 + $0x40] sm:$0xff]  ;;  %4654 = vst [vmem:[#allocation35_spill] sm:$0xff] %v3658_v38 }
 0x251   :  { %4655 = vst [vmem:[#allocation41_spill] sm:$0xff] %v3663_v10 }
 0x252   :  { %2570 = vtanh.f32 %v700_v37  ;;  %v3654_v37 = vld [vmem:[#allocation9 + $0x28] sm:$0xff] }
 0x253   :  { %4653 = vst [vmem:[#allocation27_spill] sm:$0xff] %v3654_v37 }
 0x258   :  { %v2571_v20 = vpop.eup %2570 }
 0x259   :  { %v703_v21 = vmul.f32 %v2571_v20, %v702_v17 }
 0x25b   :  { %v3551_v26 = vadd.f32 %v704_v24, %v703_v21  ;;  %v4656_v24 = vld [vmem:[#allocation28_spill] sm:$0xff] }
 0x25c   :  { %v248_v4 = vadd.f32 %v4656_v24, %v4642_v45 }
 0x25d   :  { %728 = vmatmul.f32.vlgmr.msrb.gmra.mxu3 %v3551_v26  ;;  %748 = vmatmul.f32.vlgmr.msrb.gmra.mxu0 %v3551_v26 }
 0x25e   :  { %768 = vmatmul.f32.vlgmr.msrb.gmra.mxu1 %v3551_v26  ;;  %980 = vmatpush.msrb.mxu3 %v3556_v29 }
 0x25f   :  { %1054 = vmatpush.msrb.mxu0 %v3464_v32  ;;  %1074 = vmatpush.msrb.mxu1 %v3560_v30 }
 0x260   :  { %981 = vmatpush.msrb.mxu3 %v3563_v33 }
 0x261   :  { %1055 = vmatpush.msrb.mxu0 %v3469_v55  ;;  %1075 = vmatpush.msrb.mxu1 %v3567_v35 }
 0x262   :  { %982 = vmatpush.msrb.mxu3 %v3570_v39 }
 0x263   :  { %1056 = vmatpush.msrb.mxu0 %v3474_v31  ;;  %1076 = vmatpush.msrb.mxu1 %v3574_v42 }
 0x264   :  { %983 = vmatpush.msrb.mxu3 %v3577_v50 }
 0x265   :  { %1057 = vmatpush.msrb.mxu0 %v3479_v44  ;;  %1077 = vmatpush.msrb.mxu1 %v3581_v3 }
 0x266   :  { %984 = vmatpush.msrb.mxu3 %v3584_v5 }
 0x267   :  { %1058 = vmatpush.msrb.mxu0 %v3484_v43  ;;  %1078 = vmatpush.msrb.mxu1 %v3588_v9 }
 0x268   :  { %985 = vmatpush.msrb.mxu3 %v3591_v15 }
 0x269   :  { %1059 = vmatpush.msrb.mxu0 %v3489_v48  ;;  %1079 = vmatpush.msrb.mxu1 %v3595_v22 }
 0x26a   :  { %986 = vmatpush.msrb.mxu3 %v3598_v34 }
 0x26b   :  { %1060 = vmatpush.msrb.mxu0 %v3494_v49  ;;  %1080 = vmatpush.msrb.mxu1 %v3602_v1 }
 0x26c   :  { %987 = vmatpush.msrb.mxu3 %v3605_v47 }
 0x26d   :  { %1061 = vmatpush.msrb.mxu0 %v3499_v52  ;;  %1081 = vmatpush.msrb.mxu1 %v3609_v62 }
 0x26e   :  { %988 = vmatpush.msrb.mxu3 %v3612_v51 }
 0x26f   :  { %1062 = vmatpush.msrb.mxu0 %v3504_v53  ;;  %1082 = vmatpush.msrb.mxu1 %v3616_v14 }
 0x270   :  { %989 = vmatpush.msrb.mxu3 %v3619_v58 }
 0x271   :  { %1063 = vmatpush.msrb.mxu0 %v3509_v56  ;;  %1083 = vmatpush.msrb.mxu1 %v3623_v46 }
 0x272   :  { %990 = vmatpush.msrb.mxu3 %v3626_v13 }
 0x273   :  { %1064 = vmatpush.msrb.mxu0 %v3514_v57  ;;  %1084 = vmatpush.msrb.mxu1 %v3630_v6 }
 0x274   :  { %991 = vmatpush.msrb.mxu3 %v3633_v12 }
 0x275   :  { %1065 = vmatpush.msrb.mxu0 %v3519_v60  ;;  %1085 = vmatpush.msrb.mxu1 %v3637_v41 }
 0x276   :  { %992 = vmatpush.msrb.mxu3 %v3640_v28 }
 0x277   :  { %1066 = vmatpush.msrb.mxu0 %v3524_v61  ;;  %1086 = vmatpush.msrb.mxu1 %v3644_v7 }
 0x278   :  { %993 = vmatpush.msrb.mxu3 %v3647_v36 }
 0x279   :  { %1067 = vmatpush.msrb.mxu0 %v3529_v0  ;;  %1087 = vmatpush.msrb.mxu1 %v3651_v19 }
 0x27a   :  { %994 = vmatpush.msrb.mxu3 %v3654_v37 }
 0x27b   :  { %1068 = vmatpush.msrb.mxu0 %v3534_v2  ;;  %1088 = vmatpush.msrb.mxu1 %v3658_v38 }
 0x27c   :  { %995 = vmatpush.msrb.mxu3 %v4634_v11 }
 0x27d   :  { %1069 = vmatpush.msrb.mxu0 %v3539_v8  ;;  %1089 = vmatpush.msrb.mxu1 %v3663_v10 }
 0x2da   :  { %v749_v17 = vpop.f32.mrf.mxu0 }
 0x2db   :  { %v773_v20 = vadd.f32 %v749_v17, %v289_v16 }
 0x2dd   :  { %v2500_v21 = vmul.f32 -1.442695, %v773_v20 }
 0x2df   :  { %2572 = vpow2.f32 %v2500_v21 }
 0x2e0   :  { %v729_v59 = vpop.f32.mrf.mxu3 }
 0x2e1   :  { %v772_v18 = vadd.f32 %v729_v59, %v248_v4  ;;  %v769_v4 = vpop.f32.mrf.mxu1 }
 0x2e2   :  { %v812_v59 = vadd.f32 %v3366_v40, %v769_v4 }
 0x2e3   :  { %v2499_v63 = vmul.f32 -1.442695, %v772_v18 }
 0x2e5   :  { %v2573_v11 = vpop.eup %2572  ;;  %2574 = vpow2.f32 %v2499_v63 }
 0x2e6   :  { %v781_v27 = vadd.f32 1.0, %v2573_v11 }
 0x2e8   :  { %2576 = vrcp.f32 %v781_v27  ;;  %v808_v19 = vand.u32 2147483648, %v781_v27  ;;  %vm802_vm13 = vweird.f32 %v781_v27 }
 0x2ea   :  { %v809_v0 = vor.u32 1.1754944e-38, %v808_v19 }
 0x2eb   :  { %v2575_v8 = vpop.eup %2574 }
 0x2ec   :  { %v780_v38 = vadd.f32 1.0, %v2575_v8 }
 0x2ee   :  { %2578 = vrcp.f32 %v780_v38  ;;  %v2577_v10 = vpop.eup %2576  ;;  %v793_v20 = vand.u32 2147483648, %v780_v38  ;;  %v791_v45 = vand.u32 2147483647, %v780_v38  ;;  %vm787_vm9 = vweird.f32 %v780_v38 }
 0x2ef   :  { %v798_v2 = vmul.f32 %v2577_v10, %v781_v27  ;;  %vm803_vm12 = vweird.f32 %v2577_v10 }
 0x2f0   :  { %v794_v63 = vor.u32 1.1754944e-38, %v793_v20  ;;  %vm792_vm11 = vcmp.eq.f32.partialorder %v791_v45, 8.507059e+37  ;;  %vm804_vm14 = vmor %vm802_vm13, %vm803_vm12 }
 0x2f1   :  { %v799_v16 = vsub.f32 1.0, %v798_v2 }
 0x2f3   :  { %v800_v21 = vmul.f32 %v2577_v10, %v799_v16 }
 0x2f4   :  { %v2579_v25 = vpop.eup %2578 }
 0x2f5   :  { %v783_v54 = vmul.f32 %v2579_v25, %v780_v38  ;;  %vm788_vm8 = vweird.f32 %v2579_v25  ;;  %v801_v24 = vadd.f32 %v2577_v10, %v800_v21 }
 0x2f6   :  { %vm789_vm10 = vmor %vm787_vm9, %vm788_vm8 }
 0x2f7   :  { %v784_v17 = vsub.f32 1.0, %v783_v54  ;;  %v806_v54 = vand.u32 2147483647, %v781_v27  ;;  %v805_v16 = vsel %vm804_vm14, %v2577_v10, %v801_v24  ;;  %v4658_v27 = vld [vmem:[#allocation33_spill] sm:$0xff] }
 0x2f9   :  { %v785_v37 = vmul.f32 %v2579_v25, %v784_v17  ;;  %vm807_vm15 = vcmp.eq.f32.partialorder %v806_v54, 8.507059e+37 }
 0x2fb   :  { %v786_v18 = vadd.f32 %v2579_v25, %v785_v37  ;;  %v810_v37 = vsel %vm807_vm15, %v809_v0, %v805_v16 }
 0x2fc   :  { %v816_v38 = vsub.f32 1.0, %v810_v37 }
 0x2fd   :  { %v790_v8 = vsel %vm789_vm10, %v2579_v25, %v786_v18  ;;  %v818_v25 = vmul.f32 %v810_v37, %v3551_v26  ;;  %v4667_v37 = vld [vmem:[#allocation37_spill] sm:$0xff] }
 0x2fe   :  { %v795_v11 = vsel %vm792_vm11, %v794_v63, %v790_v8 }
 0x2ff   :  { %v813_v2 = vmul.f32 %v812_v59, %v795_v11 }
 0x301   :  { %v814_v17 = vadd.f32 %v813_v2, %v3373_v23  ;;  %v4657_v23 = vld [vmem:[#allocation23_spill] sm:$0xff] }
 0x303   :  { %2580 = vtanh.f32 %v814_v17 }
 0x309   :  { %v2581_v20 = vpop.eup %2580 }
 0x30a   :  { %v817_v45 = vmul.f32 %v2581_v20, %v816_v38 }
 0x30c   :  { %v3673_v21 = vadd.f32 %v818_v25, %v817_v45 }
 0x30e   :  { %842 = vmatmul.f32.vlgmr.msrb.gmra.mxu2 %v3673_v21  ;;  %862 = vmatmul.f32.vlgmr.msra.gmra.mxu3 %v3673_v21 }
 0x30f   :  { %882 = vmatmul.f32.vlgmr.msra.gmra.mxu0 %v3673_v21  ;;  %1094 = vmatpush.msrb.mxu2 %v3556_v29 }
 0x310   :  { %1168 = vmatpush.msra.mxu3 %v3464_v32  ;;  %1188 = vmatpush.msra.mxu0 %v3560_v30  ;;  %v4659_v32 = vld [vmem:[#allocation27_spill] sm:$0xff] }
 0x311   :  { %1095 = vmatpush.msrb.mxu2 %v3563_v33 }
 0x312   :  { %1169 = vmatpush.msra.mxu3 %v3469_v55  ;;  %1189 = vmatpush.msra.mxu0 %v3567_v35  ;;  %v4660_v55 = vld [vmem:[#allocation26_spill] sm:$0xff] }
 0x313   :  { %1096 = vmatpush.msrb.mxu2 %v3570_v39 }
 0x314   :  { %1170 = vmatpush.msra.mxu3 %v3474_v31  ;;  %1190 = vmatpush.msra.mxu0 %v3574_v42  ;;  %v4661_v31 = vld [vmem:[#allocation35_spill] sm:$0xff] }
 0x315   :  { %1097 = vmatpush.msrb.mxu2 %v3577_v50 }
 0x316   :  { %1171 = vmatpush.msra.mxu3 %v3479_v44  ;;  %1191 = vmatpush.msra.mxu0 %v3581_v3  ;;  %v3723_v44 = vld [vmem:[#allocation9 + $0x10] sm:$0xff] }
 0x317   :  { %1098 = vmatpush.msrb.mxu2 %v3584_v5 }
 0x318   :  { %1172 = vmatpush.msra.mxu3 %v3484_v43  ;;  %1192 = vmatpush.msra.mxu0 %v3588_v9  ;;  %v4662_v43 = vld [vmem:[#allocation25_spill] sm:$0xff] }
 0x319   :  { %1099 = vmatpush.msrb.mxu2 %v3591_v15 }
 0x31a   :  { %1173 = vmatpush.msra.mxu3 %v3489_v48  ;;  %1193 = vmatpush.msra.mxu0 %v3595_v22  ;;  %v4663_v48 = vld [vmem:[#allocation41_spill] sm:$0xff] }
 0x31b   :  { %1100 = vmatpush.msrb.mxu2 %v3598_v34 }
 0x31c   :  { %1174 = vmatpush.msra.mxu3 %v3494_v49  ;;  %1194 = vmatpush.msra.mxu0 %v3602_v1  ;;  %v4664_v49 = vld [vmem:[#allocation29_spill] sm:$0xff] }
 0x31d   :  { %1101 = vmatpush.msrb.mxu2 %v3605_v47 }
 0x31e   :  { %1175 = vmatpush.msra.mxu3 %v3499_v52  ;;  %1195 = vmatpush.msra.mxu0 %v3609_v62  ;;  %v4665_v52 = vld [vmem:[#allocation20_spill] sm:$0xff] }
 0x31f   :  { %1102 = vmatpush.msrb.mxu2 %v3612_v51 }
 0x320   :  { %1176 = vmatpush.msra.mxu3 %v3504_v53  ;;  %1196 = vmatpush.msra.mxu0 %v3616_v14  ;;  %v292_v53 = vadd.f32 %v4665_v52, %v4664_v49  ;;  %v1297_v52 = vld [vmem:[#allocation7 + $0x210] sm:$0xff] }
 0x321   :  { %1103 = vmatpush.msrb.mxu2 %v3619_v58 }
 0x322   :  { %1177 = vmatpush.msra.mxu3 %v3509_v56  ;;  %1197 = vmatpush.msra.mxu0 %v3623_v46 }
 0x323   :  { %1104 = vmatpush.msrb.mxu2 %v3626_v13 }
 0x324   :  { %1178 = vmatpush.msra.mxu3 %v3514_v57  ;;  %1198 = vmatpush.msra.mxu0 %v3630_v6 }
 0x325   :  { %1105 = vmatpush.msrb.mxu2 %v3633_v12 }
 0x326   :  { %1179 = vmatpush.msra.mxu3 %v3519_v60  ;;  %1199 = vmatpush.msra.mxu0 %v3637_v41  ;;  %v4666_v60 = vld [vmem:[#allocation30_spill] sm:$0xff] }
 0x327   :  { %1106 = vmatpush.msrb.mxu2 %v3640_v28 }
 0x328   :  { %1180 = vmatpush.msra.mxu3 %v3524_v61  ;;  %1200 = vmatpush.msra.mxu0 %v3644_v7 }
 0x329   :  { %1107 = vmatpush.msrb.mxu2 %v3647_v36 }
 0x32a   :  { %1181 = vmatpush.msra.mxu3 %v4657_v23  ;;  %1201 = vmatpush.msra.mxu0 %v4658_v27 }
 0x32b   :  { %1108 = vmatpush.msrb.mxu2 %v4659_v32 }
 0x32c   :  { %1182 = vmatpush.msra.mxu3 %v4660_v55  ;;  %1202 = vmatpush.msra.mxu0 %v4661_v31 }
 0x32d   :  { %1109 = vmatpush.msrb.mxu2 %v3723_v44 }
 0x32e   :  { %1183 = vmatpush.msra.mxu3 %v4662_v43  ;;  %1203 = vmatpush.msra.mxu0 %v4663_v48  ;;  %v1300_v43 = vld [vmem:[#allocation7 + $0x228] sm:$0xff] }
 0x38c   :  { %v883_v4 = vpop.f32.mrf.mxu0 }
 0x38d   :  { %v926_v8 = vadd.f32 %v3366_v40, %v883_v4 }
 0x391   :  { %v843_v56 = vpop.f32.mrf.mxu2  ;;  %v863_v57 = vpop.f32.mrf.mxu3 }
 0x392   :  { %v886_v61 = vadd.f32 %v843_v56, %v4666_v60  ;;  %v887_v0 = vadd.f32 %v863_v57, %v292_v53  ;;  %v1294_v56 = vld [vmem:[#allocation7 + $0x1f8] sm:$0xff]  ;;  %v1291_v60 = vld [vmem:[#allocation7 + $0x1e0] sm:$0xff] }
 0x394   :  { %v2501_v30 = vmul.f32 -1.442695, %v886_v61  ;;  %v2502_v35 = vmul.f32 -1.442695, %v887_v0  ;;  %v1288_v61 = vld [vmem:[#allocation7 + $0x1c8] sm:$0xff]  ;;  %v1285_v0 = vld [vmem:[#allocation7 + $0x1b0] sm:$0xff] }
 0x396   :  { %2582 = vpow2.f32 %v2501_v30 }
 0x397   :  { %2584 = vpow2.f32 %v2502_v35  ;;  %v1282_v35 = vld [vmem:[#allocation7 + $0x198] sm:$0xff] }
 0x39c   :  { %v2583_v42 = vpop.eup %2582 }
 0x39d   :  { %v2585_v3 = vpop.eup %2584  ;;  %v894_v9 = vadd.f32 1.0, %v2583_v42 }
 0x39e   :  { %v895_v22 = vadd.f32 1.0, %v2585_v3  ;;  %v1279_v3 = vld [vmem:[#allocation7 + $0x180] sm:$0xff] }
 0x39f   :  { %2586 = vrcp.f32 %v894_v9  ;;  %v907_v41 = vand.u32 2147483648, %v894_v9  ;;  %v905_v10 = vand.u32 2147483647, %v894_v9  ;;  %vm901_vm1 = vweird.f32 %v894_v9 }
 0x3a0   :  { %2588 = vrcp.f32 %v895_v22  ;;  %v922_v17 = vand.u32 2147483648, %v895_v22  ;;  %vm916_vm5 = vweird.f32 %v895_v22  ;;  %v920_v16 = vand.u32 2147483647, %v895_v22 }
 0x3a1   :  { %v908_v59 = vor.u32 1.1754944e-38, %v907_v41  ;;  %vm906_vm3 = vcmp.eq.f32.partialorder %v905_v10, 8.507059e+37 }
 0x3a2   :  { %v923_v25 = vor.u32 1.1754944e-38, %v922_v17  ;;  %vm921_vm7 = vcmp.eq.f32.partialorder %v920_v16, 8.507059e+37  ;;  %v4670_v16 = vld [vmem:[#allocation39_spill] sm:$0xff] }
 0x3a5   :  { %v2587_v1 = vpop.eup %2586 }
 0x3a6   :  { %v2589_v62 = vpop.eup %2588  ;;  %v897_v14 = vmul.f32 %v2587_v1, %v894_v9  ;;  %vm902_vm0 = vweird.f32 %v2587_v1 }
 0x3a7   :  { %v912_v46 = vmul.f32 %v2589_v62, %v895_v22  ;;  %vm903_vm2 = vmor %vm901_vm1, %vm902_vm0  ;;  %vm917_vm4 = vweird.f32 %v2589_v62 }
 0x3a8   :  { %v898_v6 = vsub.f32 1.0, %v897_v14  ;;  %vm918_vm6 = vmor %vm916_vm5, %vm917_vm4 }
 0x3a9   :  { %v913_v7 = vsub.f32 1.0, %v912_v46 }
 0x3aa   :  { %v899_v19 = vmul.f32 %v2587_v1, %v898_v6 }
 0x3ab   :  { %v914_v18 = vmul.f32 %v2589_v62, %v913_v7 }
 0x3ac   :  { %v900_v63 = vadd.f32 %v2587_v1, %v899_v19 }
 0x3ad   :  { %v915_v2 = vadd.f32 %v2589_v62, %v914_v18 }
 0x3ae   :  { %v904_v24 = vsel %vm903_vm2, %v2587_v1, %v900_v63  ;;  %v3761_v63 = vld [vmem:[%s4554_s4] ss:$0 sm:$0xff] }
 0x3af   :  { %v909_v11 = vsel %vm906_vm3, %v908_v59, %v904_v24  ;;  %v919_v20 = vsel %vm918_vm6, %v2589_v62, %v915_v2 }
 0x3b0   :  { %v927_v54 = vmul.f32 %v926_v8, %v909_v11  ;;  %v924_v45 = vsel %vm921_vm7, %v923_v25, %v919_v20 }
 0x3b1   :  { %v930_v23 = vsub.f32 1.0, %v924_v45  ;;  %v932_v55 = vmul.f32 %v924_v45, %v3673_v21 }
 0x3b2   :  { %v928_v38 = vadd.f32 %v927_v54, %v4667_v37 }
 0x3b4   :  { %2590 = vtanh.f32 %v928_v38 }
 0x3ba   :  { %v2591_v27 = vpop.eup %2590 }
 0x3bb   :  { %v931_v40 = vmul.f32 %v2591_v27, %v930_v23 }
 0x3bd   :  { %v3734_v31 = vadd.f32 %v932_v55, %v931_v40 }
 0x3bf   :  { %956 = vmatmul.f32.vlgmr.msra.gmra.mxu1 %v3734_v31  ;;  %976 = vmatmul.f32.vlgmr.msra.gmra.mxu2 %v3734_v31 }
 0x3c0   :  { %996 = vmatmul.f32.vlgmr.msrb.gmra.mxu3 %v3734_v31  ;;  %1208 = vmatpush.msra.mxu1 %v3556_v29  ;;  %v1324_v29 = vld [vmem:[#allocation7 + $0x2e8] sm:$0xff] }
 0x3c1   :  { %1398 = vmatpush.msra.mxu2 %v1324_v29  ;;  %v4671_v29 = vld [vmem:[#allocation38_spill] sm:$0xff] }
 0x3c2   :  { %1209 = vmatpush.msra.mxu1 %v3563_v33  ;;  %v1321_v33 = vld [vmem:[#allocation7 + $0x2d0] sm:$0xff] }
 0x3c3   :  { %1399 = vmatpush.msra.mxu2 %v1321_v33  ;;  %v4672_v33 = vld [vmem:[#allocation19_spill] sm:$0xff] }
 0x3c4   :  { %1210 = vmatpush.msra.mxu1 %v3570_v39  ;;  %v1318_v39 = vld [vmem:[#allocation7 + $0x2b8] sm:$0xff] }
 0x3c5   :  { %1400 = vmatpush.msra.mxu2 %v1318_v39  ;;  %v3777_v39 = vld [vmem:[#allocation9 + $0x2e8] sm:$0xff] }
 0x3c6   :  { %1211 = vmatpush.msra.mxu1 %v3577_v50  ;;  %v1315_v50 = vld [vmem:[#allocation7 + $0x2a0] sm:$0xff] }
 0x3c7   :  { %1401 = vmatpush.msra.mxu2 %v1315_v50  ;;  %v3780_v50 = vld [vmem:[#allocation9 + $0x2d0] sm:$0xff] }
 0x3c8   :  { %1212 = vmatpush.msra.mxu1 %v3584_v5  ;;  %v1312_v5 = vld [vmem:[#allocation7 + $0x288] sm:$0xff] }
 0x3c9   :  { %1402 = vmatpush.msra.mxu2 %v1312_v5  ;;  %v3783_v5 = vld [vmem:[#allocation9 + $0x2b8] sm:$0xff] }
 0x3ca   :  { %1213 = vmatpush.msra.mxu1 %v3591_v15 }
 0x3cc   :  { %1214 = vmatpush.msra.mxu1 %v3598_v34  ;;  %v4668_v34 = vld [vmem:[#allocation31_spill] sm:$0xff] }
 0x3ce   :  { %1215 = vmatpush.msra.mxu1 %v3605_v47 }
 0x3d0   :  { %1216 = vmatpush.msra.mxu1 %v3612_v51  ;;  %v1309_v51 = vld [vmem:[#allocation7 + $0x270] sm:$0xff] }
 0x3d1   :  { %1403 = vmatpush.msra.mxu2 %v1309_v51  ;;  %v3789_v51 = vld [vmem:[#allocation9 + $0x288] sm:$0xff] }
 0x3d2   :  { %1217 = vmatpush.msra.mxu1 %v3619_v58 }
 0x3d4   :  { %1218 = vmatpush.msra.mxu1 %v3626_v13  ;;  %v1306_v13 = vld [vmem:[#allocation7 + $0x258] sm:$0xff] }
 0x3d5   :  { %1404 = vmatpush.msra.mxu2 %v1306_v13  ;;  %v1323_v13 = vld [vmem:[#allocation7 + $0x2e0] sm:$0xff] }
 0x3d6   :  { %1219 = vmatpush.msra.mxu1 %v3633_v12  ;;  %v4669_v12 = vld [vmem:[#allocation22_spill] sm:$0xff] }
 0x3d8   :  { %1220 = vmatpush.msra.mxu1 %v3640_v28  ;;  %v295_v28 = vadd.f32 %v4669_v12, %v4664_v49  ;;  %v3792_v12 = vld [vmem:[#allocation9 + $0x270] sm:$0xff] }
 0x3da   :  { %1221 = vmatpush.msra.mxu1 %v3647_v36  ;;  %v1303_v36 = vld [vmem:[#allocation7 + $0x240] sm:$0xff] }
 0x3db   :  { %1405 = vmatpush.msra.mxu2 %v1303_v36  ;;  %v1320_v36 = vld [vmem:[#allocation7 + $0x2c8] sm:$0xff] }
 0x3dc   :  { %1222 = vmatpush.msra.mxu1 %v4659_v32 }
 0x3dd   :  { %1406 = vmatpush.msra.mxu2 %v1300_v43  ;;  %v1317_v43 = vld [vmem:[#allocation7 + $0x2b0] sm:$0xff] }
 0x3de   :  { %1223 = vmatpush.msra.mxu1 %v3723_v44 }
 0x3df   :  { %1407 = vmatpush.msra.mxu2 %v1297_v52  ;;  %v4673_v52 = vld [vmem:[#allocation18_spill] sm:$0xff] }
 0x3e1   :  { %1408 = vmatpush.msra.mxu2 %v1294_v56  ;;  %v1313_v56 = vld [vmem:[#allocation7 + $0x290] sm:$0xff] }
 0x3e3   :  { %1409 = vmatpush.msra.mxu2 %v1291_v60  ;;  %v3803_v60 = vld [vmem:[#allocation9 + $0x228] sm:$0xff] }
 0x3e5   :  { %1410 = vmatpush.msra.mxu2 %v1288_v61 }
 0x3e7   :  { %1411 = vmatpush.msra.mxu2 %v1285_v0 }
 0x3e9   :  { %1412 = vmatpush.msra.mxu2 %v1282_v35 }
 0x3eb   :  { %1413 = vmatpush.msra.mxu2 %v1279_v3  ;;  %v1310_v3 = vld [vmem:[#allocation7 + $0x278] sm:$0xff] }
 0x43c   :  { %v957_v15 = vpop.f32.mrf.mxu1 }
 0x43d   :  { %v1000_v47 = vadd.f32 %v957_v15, %v4668_v34  ;;  %v3786_v15 = vld [vmem:[#allocation9 + $0x2a0] sm:$0xff]  ;;  %v1325_v34 = vld [vmem:[#allocation7 + $0x2f0] sm:$0xff] }
 0x43e   :  { %1439 = vmatpush.msrb.mxu3 %v1325_v34  ;;  %v1287_v34 = vld [vmem:[#allocation7 + $0x1c0] sm:$0xff] }
 0x43f   :  { %v2503_v58 = vmul.f32 -1.442695, %v1000_v47  ;;  %v1326_v47 = vld [vmem:[#allocation7 + $0x2f8] sm:$0xff] }
 0x441   :  { %2592 = vpow2.f32 %v2503_v58  ;;  %v1322_v58 = vld [vmem:[#allocation7 + $0x2d8] sm:$0xff] }
 0x442   :  { %v977_v32 = vpop.f32.mrf.mxu2  ;;  %1440 = vmatpush.msrb.mxu3 %v1322_v58  ;;  %v1283_v58 = vld [vmem:[#allocation7 + $0x1a0] sm:$0xff] }
 0x443   :  { %v1001_v44 = vadd.f32 %v977_v32, %v295_v28  ;;  %v997_v41 = vpop.f32.mrf.mxu3  ;;  %v1319_v28 = vld [vmem:[#allocation7 + $0x2c0] sm:$0xff]  ;;  %v3795_v32 = vld [vmem:[#allocation9 + $0x258] sm:$0xff] }
 0x444   :  { %v1040_v59 = vadd.f32 %v3761_v63, %v997_v41  ;;  %1441 = vmatpush.msrb.mxu3 %v1319_v28  ;;  %v1304_v41 = vld [vmem:[#allocation7 + $0x248] sm:$0xff] }
 0x445   :  { %v2504_v48 = vmul.f32 -1.442695, %v1001_v44  ;;  %v1316_v44 = vld [vmem:[#allocation7 + $0x2a8] sm:$0xff] }
 0x446   :  { %1442 = vmatpush.msrb.mxu3 %v1316_v44 }
 0x447   :  { %v2593_v53 = vpop.eup %2592  ;;  %2594 = vpow2.f32 %v2504_v48  ;;  %v3798_v48 = vld [vmem:[#allocation9 + $0x240] sm:$0xff] }
 0x448   :  { %v1008_v57 = vadd.f32 1.0, %v2593_v53  ;;  %v298_v53 = vadd.f32 %v4673_v52, %v4664_v49  ;;  %1443 = vmatpush.msrb.mxu3 %v1313_v56  ;;  %v1281_v52 = vld [vmem:[#allocation7 + $0x190] sm:$0xff] }
 0x44a   :  { %2596 = vrcp.f32 %v1008_v57  ;;  %v1021_v62 = vand.u32 2147483648, %v1008_v57  ;;  %v1019_v46 = vand.u32 2147483647, %v1008_v57  ;;  %vm1015_vm9 = vweird.f32 %v1008_v57  ;;  %1444 = vmatpush.msrb.mxu3 %v1310_v3 }
 0x44c   :  { %v1022_v10 = vor.u32 1.1754944e-38, %v1021_v62  ;;  %vm1020_vm11 = vcmp.eq.f32.partialorder %v1019_v46, 8.507059e+37  ;;  %v1308_v46 = vld [vmem:[#allocation7 + $0x268] sm:$0xff] }
 0x44d   :  { %v2595_v30 = vpop.eup %2594 }
 0x44e   :  { %v1009_v42 = vadd.f32 1.0, %v2595_v30  ;;  %v4674_v30 = vld [vmem:[#allocation32_spill] sm:$0xff] }
 0x450   :  { %v2597_v9 = vpop.eup %2596  ;;  %2598 = vrcp.f32 %v1009_v42  ;;  %v1036_v11 = vand.u32 2147483648, %v1009_v42  ;;  %v1034_v54 = vand.u32 2147483647, %v1009_v42  ;;  %vm1030_vm13 = vweird.f32 %v1009_v42 }
 0x451   :  { %v1011_v22 = vmul.f32 %v2597_v9, %v1008_v57  ;;  %vm1016_vm8 = vweird.f32 %v2597_v9  ;;  %v1314_v57 = vld [vmem:[#allocation7 + $0x298] sm:$0xff] }
 0x452   :  { %vm1017_vm10 = vmor %vm1015_vm9, %vm1016_vm8  ;;  %v1037_v38 = vor.u32 1.1754944e-38, %v1036_v11  ;;  %vm1035_vm15 = vcmp.eq.f32.partialorder %v1034_v54, 8.507059e+37  ;;  %v1296_v54 = vld [vmem:[#allocation7 + $0x208] sm:$0xff] }
 0x453   :  { %v1012_v1 = vsub.f32 1.0, %v1011_v22  ;;  %v3807_v22 = vld [vmem:[#allocation9 + $0x210] sm:$0xff] }
 0x455   :  { %v1013_v14 = vmul.f32 %v2597_v9, %v1012_v1 }
 0x456   :  { %v2599_v6 = vpop.eup %2598 }
 0x457   :  { %v1026_v7 = vmul.f32 %v2599_v6, %v1009_v42  ;;  %v1014_v19 = vadd.f32 %v2597_v9, %v1013_v14  ;;  %vm1031_vm12 = vweird.f32 %v2599_v6  ;;  %v1307_v14 = vld [vmem:[#allocation7 + $0x260] sm:$0xff] }
 0x458   :  { %vm1032_vm14 = vmor %vm1030_vm13, %vm1031_vm12  ;;  %1445 = vmatpush.msrb.mxu3 %v1307_v14 }
 0x459   :  { %v1027_v4 = vsub.f32 1.0, %v1026_v7  ;;  %v1018_v18 = vsel %vm1017_vm10, %v2597_v9, %v1014_v19  ;;  %v1311_v9 = vld [vmem:[#allocation7 + $0x280] sm:$0xff]  ;;  %v1305_v7 = vld [vmem:[#allocation7 + $0x250] sm:$0xff] }
 0x45a   :  { %v1023_v8 = vsel %vm1020_vm11, %v1022_v10, %v1018_v18  ;;  %v3813_v19 = vld [vmem:[#allocation9 + $0x1e0] sm:$0xff]  ;;  %1446 = vmatpush.msrb.mxu3 %v1304_v41  ;;  %v1301_v10 = vld [vmem:[#allocation7 + $0x230] sm:$0xff]  ;;  %v3816_v18 = vld [vmem:[#allocation9 + $0x1c8] sm:$0xff] }
 0x45b   :  { %v1028_v24 = vmul.f32 %v2599_v6, %v1027_v4  ;;  %v1041_v2 = vmul.f32 %v1040_v59, %v1023_v8  ;;  %v1302_v4 = vld [vmem:[#allocation7 + $0x238] sm:$0xff]  ;;  %v1299_v8 = vld [vmem:[#allocation7 + $0x220] sm:$0xff] }
 0x45c   :  { %1447 = vmatpush.msrb.mxu3 %v1301_v10  ;;  %v1298_v59 = vld [vmem:[#allocation7 + $0x218] sm:$0xff] }
 0x45d   :  { %v1029_v17 = vadd.f32 %v2599_v6, %v1028_v24  ;;  %v1042_v37 = vadd.f32 %v1041_v2, %v4670_v16  ;;  %v3819_v24 = vld [vmem:[#allocation9 + $0x1b0] sm:$0xff]  ;;  %v1295_v2 = vld [vmem:[#allocation7 + $0x200] sm:$0xff] }
 0x45e   :  { %1448 = vmatpush.msrb.mxu3 %v1298_v59  ;;  %v4676_v10 = vld [vmem:[#allocation40_spill] sm:$0xff] }
 0x45f   :  { %v1033_v20 = vsel %vm1032_vm14, %v2599_v6, %v1029_v17  ;;  %2600 = vtanh.f32 %v1042_v37  ;;  %v3810_v6 = vld [vmem:[#allocation9 + $0x1f8] sm:$0xff] }
 0x460   :  { %v1038_v25 = vsel %vm1035_vm15, %v1037_v38, %v1033_v20  ;;  %v3822_v17 = vld [vmem:[#allocation9 + $0x198] sm:$0xff]  ;;  %1449 = vmatpush.msrb.mxu3 %v1295_v2  ;;  %v1292_v38 = vld [vmem:[#allocation7 + $0x1e8] sm:$0xff]  ;;  %v1293_v20 = vld [vmem:[#allocation7 + $0x1f0] sm:$0xff] }
 0x461   :  { %v1044_v45 = vsub.f32 1.0, %v1038_v25  ;;  %v1046_v40 = vmul.f32 %v1038_v25, %v3734_v31  ;;  %v3824_v25 = vld [vmem:[#allocation9 + $0x180] sm:$0xff] }
 0x462   :  { %4675 = vst [vmem:[#allocation28_spill] sm:$0xff] %v3824_v25  ;;  %1450 = vmatpush.msrb.mxu3 %v1292_v38 }
 0x465   :  { %v2601_v23 = vpop.eup %2600 }
 0x466   :  { %v1045_v27 = vmul.f32 %v2601_v23, %v1044_v45  ;;  %v1289_v23 = vld [vmem:[#allocation7 + $0x1d0] sm:$0xff] }
 0x467   :  { %1451 = vmatpush.msrb.mxu3 %v1289_v23  ;;  %v3843_v23 = vld [vmem:[#allocation9 + $0x2c0] sm:$0xff] }
 0x468   :  { %v3766_v55 = vadd.f32 %v1046_v40, %v1045_v27  ;;  %v1290_v27 = vld [vmem:[#allocation7 + $0x1d8] sm:$0xff] }
 0x469   :  { %v1286_v40 = vld [vmem:[#allocation7 + $0x1b8] sm:$0xff] }
 0x46a   :  { %1070 = vmatmul.f32.vlgmr.msrb.gmra.mxu0 %v3766_v55  ;;  %1090 = vmatmul.f32.vlgmr.msrb.gmra.mxu1 %v3766_v55 }
 0x46b   :  { %1110 = vmatmul.f32.vlgmr.msrb.gmra.mxu2 %v3766_v55  ;;  %1548 = vmatpush.msrb.mxu1 %v3777_v39 }
 0x46c   :  { %1480 = vmatpush.msrb.mxu0 %v1326_v47  ;;  %1452 = vmatpush.msrb.mxu3 %v1286_v40  ;;  %v3853_v40 = vld [vmem:[#allocation9 + $0x290] sm:$0xff] }
 0x46d   :  { %1549 = vmatpush.msrb.mxu1 %v3780_v50 }
 0x46e   :  { %1481 = vmatpush.msrb.mxu0 %v1323_v13  ;;  %v1284_v13 = vld [vmem:[#allocation7 + $0x1a8] sm:$0xff]  ;;  %1453 = vmatpush.msrb.mxu3 %v1283_v58  ;;  %v3864_v58 = vld [vmem:[#allocation9 + $0x260] sm:$0xff] }
 0x46f   :  { %1550 = vmatpush.msrb.mxu1 %v3783_v5 }
 0x470   :  { %1482 = vmatpush.msrb.mxu0 %v1320_v36 }
 0x471   :  { %1551 = vmatpush.msrb.mxu1 %v3786_v15 }
 0x472   :  { %1483 = vmatpush.msrb.mxu0 %v1317_v43  ;;  %v1280_v43 = vld [vmem:[#allocation7 + $0x188] sm:$0xff] }
 0x473   :  { %1414 = vmatmul.f32.vlgmr.msra.gmra.mxu2 %v4671_v29  ;;  %1552 = vmatpush.msrb.mxu1 %v3789_v51 }
 0x474   :  { %1484 = vmatpush.msrb.mxu0 %v1314_v57  ;;  %1454 = vmatpush.msrb.mxu3 %v1280_v43  ;;  %v3901_v43 = vld [vmem:[#allocation9 + $0x1b8] sm:$0xff] }
 0x475   :  { %1553 = vmatpush.msrb.mxu1 %v3792_v12 }
 0x476   :  { %1485 = vmatpush.msrb.mxu0 %v1311_v9 }
 0x477   :  { %1554 = vmatpush.msrb.mxu1 %v3795_v32 }
 0x478   :  { %1486 = vmatpush.msrb.mxu0 %v1308_v46 }
 0x479   :  { %1555 = vmatpush.msrb.mxu1 %v3798_v48 }
 0x47a   :  { %1487 = vmatpush.msrb.mxu0 %v1305_v7 }
 0x47b   :  { %1417 = vmatmul.f32.gmra.mxu2 %v4672_v33  ;;  %1556 = vmatpush.msrb.mxu1 %v3803_v60 }
 0x47c   :  { %1488 = vmatpush.msrb.mxu0 %v1302_v4 }
 0x47d   :  { %1557 = vmatpush.msrb.mxu1 %v3807_v22 }
 0x47e   :  { %1489 = vmatpush.msrb.mxu0 %v1299_v8 }
 0x47f   :  { %1558 = vmatpush.msrb.mxu1 %v3810_v6 }
 0x480   :  { %1490 = vmatpush.msrb.mxu0 %v1296_v54 }
 0x481   :  { %1559 = vmatpush.msrb.mxu1 %v3813_v19 }
 0x482   :  { %1491 = vmatpush.msrb.mxu0 %v1293_v20  ;;  %v3833_v20 = vld [vmem:[#allocation9 + $0x2f0] sm:$0xff] }
 0x483   :  { %1420 = vmatmul.f32.gmra.mxu2 %v3551_v26  ;;  %1560 = vmatpush.msrb.mxu1 %v3816_v18 }
 0x484   :  { %1492 = vmatpush.msrb.mxu0 %v1290_v27  ;;  %v3848_v27 = vld [vmem:[#allocation9 + $0x2a8] sm:$0xff] }
 0x485   :  { %1561 = vmatpush.msrb.mxu1 %v3819_v24 }
 0x486   :  { %1493 = vmatpush.msrb.mxu0 %v1287_v34  ;;  %v4677_v34 = vmov 0.0  }
 0x487   :  { %1562 = vmatpush.msrb.mxu1 %v3822_v17 }
 0x488   :  { %1494 = vmatpush.msrb.mxu0 %v1284_v13  ;;  %v3869_v13 = vld [vmem:[#allocation9 + $0x248] sm:$0xff] }
 0x489   :  { %1563 = vmatpush.msrb.mxu1 %v3824_v25 }
 0x48a   :  { %1495 = vmatpush.msrb.mxu0 %v1281_v52  ;;  %v3903_v52 = vld [vmem:[#allocation9 + $0x2f8] sm:$0xff] }
 0x48b   :  { %1423 = vmatmul.f32.gmra.mxu2 %v3673_v21 }
 0x48c   :  { %1588 = vmatpush.msrb.mxu2 %v3903_v52 }
 0x493   :  { %1426 = vmatmul.f32.gmra.mxu2 %v3734_v31 }
 0x49b   :  { %1429 = vmatmul.f32.gmra.mxu2 %v3766_v55 }
 0x4e7   :  { %v1071_v61 = vpop.f32.mrf.mxu0  ;;  %v1091_v0 = vpop.f32.mrf.mxu1 }
 0x4e8   :  { %v1114_v35 = vadd.f32 %v1071_v61, %v4674_v30  ;;  %v1115_v42 = vadd.f32 %v1091_v0, %v298_v53 }
 0x4ea   :  { %v2505_v1 = vmul.f32 -1.442695, %v1114_v35  ;;  %v2506_v62 = vmul.f32 -1.442695, %v1115_v42 }
 0x4ec   :  { %2602 = vpow2.f32 %v2505_v1 }
 0x4ed   :  { %2604 = vpow2.f32 %v2506_v62 }
 0x4ee   :  { %v1111_v35 = vpop.f32.mrf.mxu2 }
 0x4ef   :  { %v1154_v1 = vadd.f32 %v3761_v63, %v1111_v35 }
 0x4f2   :  { %v2603_v11 = vpop.eup %2602 }
 0x4f3   :  { %v2605_v16 = vpop.eup %2604  ;;  %v1122_v37 = vadd.f32 1.0, %v2603_v11 }
 0x4f4   :  { %v1123_v45 = vadd.f32 1.0, %v2605_v16 }
 0x4f5   :  { %2606 = vrcp.f32 %v1122_v37  ;;  %v1135_v57 = vand.u32 2147483648, %v1122_v37  ;;  %v1133_v0 = vand.u32 2147483647, %v1122_v37  ;;  %vm1129_vm1 = vweird.f32 %v1122_v37 }
 0x4f6   :  { %2608 = vrcp.f32 %v1123_v45  ;;  %v1150_v46 = vand.u32 2147483648, %v1123_v45  ;;  %vm1144_vm5 = vweird.f32 %v1123_v45  ;;  %v1148_v7 = vand.u32 2147483647, %v1123_v45 }
 0x4f7   :  { %v1136_v3 = vor.u32 1.1754944e-38, %v1135_v57  ;;  %vm1134_vm3 = vcmp.eq.f32.partialorder %v1133_v0, 8.507059e+37  ;;  %v3966_v0 = vld [vmem:[#allocation9 + $0x2b0] sm:$0xff] }
 0x4f8   :  { %v1151_v8 = vor.u32 1.1754944e-38, %v1150_v46  ;;  %vm1149_vm7 = vcmp.eq.f32.partialorder %v1148_v7, 8.507059e+37  ;;  %v3988_v46 = vld [vmem:[#allocation9 + $0x238] sm:$0xff] }
 0x4fb   :  { %v2607_v47 = vpop.eup %2606 }
 0x4fc   :  { %v2609_v28 = vpop.eup %2608  ;;  %v1125_v36 = vmul.f32 %v2607_v47, %v1122_v37  ;;  %vm1130_vm0 = vweird.f32 %v2607_v47 }
 0x4fd   :  { %v1140_v44 = vmul.f32 %v2609_v28, %v1123_v45  ;;  %vm1131_vm2 = vmor %vm1129_vm1, %vm1130_vm0  ;;  %vm1145_vm4 = vweird.f32 %v2609_v28  ;;  %v3839_v45 = vld [vmem:[#allocation9 + $0x2d8] sm:$0xff] }
 0x4fe   :  { %v1126_v53 = vsub.f32 1.0, %v1125_v36  ;;  %vm1146_vm6 = vmor %vm1144_vm5, %vm1145_vm4  ;;  %v3885_v36 = vld [vmem:[#allocation9 + $0x200] sm:$0xff] }
 0x4ff   :  { %v1141_v56 = vsub.f32 1.0, %v1140_v44  ;;  %v3890_v44 = vld [vmem:[#allocation9 + $0x1e8] sm:$0xff] }
 0x500   :  { %v1127_v61 = vmul.f32 %v2607_v47, %v1126_v53  ;;  %v3908_v53 = vld [vmem:[#allocation9 + $0x1a0] sm:$0xff] }
 0x501   :  { %v1142_v30 = vmul.f32 %v2609_v28, %v1141_v56  ;;  %4678 = vst [vmem:[#allocation23_spill] sm:$0xff] %v3908_v53  ;;  %v3913_v56 = vld [vmem:[#allocation9 + $0x188] sm:$0xff] }
 0x502   :  { %v1128_v42 = vadd.f32 %v2607_v47, %v1127_v61  ;;  %4679 = vst [vmem:[#allocation33_spill] sm:$0xff] %v3913_v56 }
 0x503   :  { %v1143_v62 = vadd.f32 %v2609_v28, %v1142_v30  ;;  %v3968_v30 = vld [vmem:[#allocation9 + $0x298] sm:$0xff] }
 0x504   :  { %v1132_v9 = vsel %vm1131_vm2, %v2607_v47, %v1128_v42  ;;  %v3860_v47 = vld [vmem:[#allocation9 + $0x278] sm:$0xff]  ;;  %v3972_v42 = vld [vmem:[#allocation9 + $0x280] sm:$0xff] }
 0x505   :  { %v1137_v14 = vsel %vm1134_vm3, %v1136_v3, %v1132_v9  ;;  %v1147_v59 = vsel %vm1146_vm6, %v2609_v28, %v1143_v62  ;;  %v3880_v28 = vld [vmem:[#allocation9 + $0x218] sm:$0xff]  ;;  %v4681_v9 = vld [vmem:[#allocation34_spill] sm:$0xff] }
 0x506   :  { %v1155_v41 = vmul.f32 %v1154_v1, %v1137_v14  ;;  %v1152_v11 = vsel %vm1149_vm7, %v1151_v8, %v1147_v59  ;;  %v3983_v62 = vld [vmem:[#allocation9 + $0x250] sm:$0xff]  ;;  %v4004_v8 = vld [vmem:[#allocation9 + $0x208] sm:$0xff] }
 0x507   :  { %v1158_v2 = vsub.f32 1.0, %v1152_v11  ;;  %v1160_v37 = vmul.f32 %v1152_v11, %v3766_v55  ;;  %v4009_v11 = vld [vmem:[#allocation9 + $0x1f0] sm:$0xff] }
 0x508   :  { %v1156_v4 = vadd.f32 %v1155_v41, %v4676_v10  ;;  %v4000_v10 = vld [vmem:[#allocation9 + $0x220] sm:$0xff] }
 0x50a   :  { %2610 = vtanh.f32 %v1156_v4 }
 0x510   :  { %v2611_v54 = vpop.eup %2610 }
 0x511   :  { %v1159_v16 = vmul.f32 %v2611_v54, %v1158_v2  ;;  %v4016_v54 = vld [vmem:[#allocation9 + $0x1d8] sm:$0xff] }
 0x512   :  { %4682 = vst [vmem:[#allocation27_spill] sm:$0xff] %v4016_v54 }
 0x513   :  { %v3831_v38 = vadd.f32 %v1160_v37, %v1159_v16  ;;  %v4023_v37 = vld [vmem:[#allocation9 + $0x1c0] sm:$0xff] }
 0x514   :  { %4683 = vst [vmem:[#allocation26_spill] sm:$0xff] %v4023_v37 }
 0x515   :  { %1184 = vmatmul.f32.vlgmr.msra.gmra.mxu3 %v3831_v38  ;;  %1204 = vmatmul.f32.vlgmr.msra.gmra.mxu0 %v3831_v38 }
 0x516   :  { %1224 = vmatmul.f32.vlgmr.msra.gmra.mxu1 %v3831_v38  ;;  %1432 = vmatmul.f32.gmra.mxu2 %v3831_v38 }
 0x517   :  { %1568 = vmatpush.msra.mxu1 %v3833_v20  ;;  %1659 = vmatpush.msra.mxu3 %v3777_v39 }
 0x518   :  { %1679 = vmatpush.msra.mxu0 %v3833_v20 }
 0x519   :  { %1569 = vmatpush.msra.mxu1 %v3839_v45  ;;  %1660 = vmatpush.msra.mxu3 %v3780_v50 }
 0x51a   :  { %1680 = vmatpush.msra.mxu0 %v3839_v45 }
 0x51b   :  { %1570 = vmatpush.msra.mxu1 %v3843_v23  ;;  %1661 = vmatpush.msra.mxu3 %v3783_v5 }
 0x51c   :  { %1681 = vmatpush.msra.mxu0 %v3843_v23 }
 0x51d   :  { %1571 = vmatpush.msra.mxu1 %v3848_v27  ;;  %1455 = vmatmul.f32.vlgmr.msrb.gmra.mxu3 %v4671_v29 }
 0x51e   :  { %1496 = vmatmul.f32.vlgmr.msrb.gmra.mxu0 %v4671_v29  ;;  %1564 = vmatmul.f32.vlgmr.msrb.gmra.mxu1 %v4677_v34  ;;  %v3874_v29 = vld [vmem:[#allocation9 + $0x230] sm:$0xff] }
 0x51f   :  { %1572 = vmatpush.msra.mxu1 %v3853_v40  ;;  %1662 = vmatpush.msra.mxu3 %v3786_v15 }
 0x520   :  { %1682 = vmatpush.msra.mxu0 %v3848_v27 }
 0x521   :  { %1573 = vmatpush.msra.mxu1 %v3860_v47  ;;  %1663 = vmatpush.msra.mxu3 %v3789_v51 }
 0x522   :  { %1683 = vmatpush.msra.mxu0 %v3853_v40 }
 0x523   :  { %1574 = vmatpush.msra.mxu1 %v3864_v58  ;;  %1664 = vmatpush.msra.mxu3 %v3792_v12 }
 0x524   :  { %1684 = vmatpush.msra.mxu0 %v3860_v47 }
 0x525   :  { %1575 = vmatpush.msra.mxu1 %v3869_v13  ;;  %1458 = vmatmul.f32.gmra.mxu3 %v4672_v33 }
 0x526   :  { %1499 = vmatmul.f32.gmra.mxu0 %v4672_v33  ;;  %1665 = vmatpush.msra.mxu3 %v3795_v32  ;;  %v3895_v33 = vld [vmem:[#allocation9 + $0x1d0] sm:$0xff] }
 0x527   :  { %1576 = vmatpush.msra.mxu1 %v3874_v29  ;;  %1685 = vmatpush.msra.mxu0 %v3864_v58 }
 0x528   :  { %1666 = vmatpush.msra.mxu3 %v3798_v48 }
 0x529   :  { %1577 = vmatpush.msra.mxu1 %v3880_v28  ;;  %1686 = vmatpush.msra.mxu0 %v3869_v13 }
 0x52a   :  { %1667 = vmatpush.msra.mxu3 %v3803_v60 }
 0x52b   :  { %1578 = vmatpush.msra.mxu1 %v3885_v36  ;;  %1687 = vmatpush.msra.mxu0 %v3874_v29 }
 0x52c   :  { %1668 = vmatpush.msra.mxu3 %v3807_v22 }
 0x52d   :  { %1579 = vmatpush.msra.mxu1 %v3890_v44  ;;  %1461 = vmatmul.f32.gmra.mxu3 %v3551_v26 }
 0x52e   :  { %1502 = vmatmul.f32.gmra.mxu0 %v3551_v26  ;;  %1669 = vmatpush.msra.mxu3 %v3810_v6  ;;  %v3954_v26 = vld [vmem:[#allocation9 + $0x2e0] sm:$0xff] }
 0x52f   :  { %1580 = vmatpush.msra.mxu1 %v3895_v33  ;;  %1688 = vmatpush.msra.mxu0 %v3880_v28 }
 0x530   :  { %1670 = vmatpush.msra.mxu3 %v3813_v19  ;;  %1589 = vmatpush.msrb.mxu2 %v3954_v26 }
 0x531   :  { %1581 = vmatpush.msra.mxu1 %v3901_v43  ;;  %1689 = vmatpush.msra.mxu0 %v3885_v36 }
 0x532   :  { %1671 = vmatpush.msra.mxu3 %v3816_v18 }
 0x533   :  { %1582 = vmatpush.msra.mxu1 %v3908_v53  ;;  %1690 = vmatpush.msra.mxu0 %v3890_v44 }
 0x534   :  { %1672 = vmatpush.msra.mxu3 %v3819_v24 }
 0x535   :  { %1583 = vmatpush.msra.mxu1 %v3913_v56  ;;  %1464 = vmatmul.f32.gmra.mxu3 %v3673_v21 }
 0x536   :  { %1584 = vmatmul.f32.vlgmr.msra.gmra.mxu1 %v4677_v34  ;;  %1505 = vmatmul.f32.gmra.mxu0 %v3673_v21  ;;  %v3956_v21 = vld [vmem:[#allocation9 + $0x2c8] sm:$0xff] }
 0x537   :  { %1699 = vmatpush.msrb.mxu1 %v3903_v52  ;;  %1673 = vmatpush.msra.mxu3 %v3822_v17 }
 0x538   :  { %1691 = vmatpush.msra.mxu0 %v3895_v33  ;;  %1590 = vmatpush.msrb.mxu2 %v3956_v21 }
 0x539   :  { %1674 = vmatpush.msra.mxu3 %v3824_v25  ;;  %1700 = vmatpush.msrb.mxu1 %v3954_v26 }
 0x53a   :  { %1692 = vmatpush.msra.mxu0 %v3901_v43  ;;  %1591 = vmatpush.msrb.mxu2 %v3966_v0 }
 0x53b   :  { %1790 = vmatpush.msrb.mxu3 %v3833_v20  ;;  %1701 = vmatpush.msrb.mxu1 %v3956_v21 }
 0x53c   :  { %1693 = vmatpush.msra.mxu0 %v3908_v53  ;;  %1592 = vmatpush.msrb.mxu2 %v3968_v30 }
 0x53d   :  { %1791 = vmatpush.msrb.mxu3 %v3839_v45  ;;  %1702 = vmatpush.msrb.mxu1 %v3966_v0 }
 0x53e   :  { %1467 = vmatmul.f32.gmra.mxu3 %v3734_v31  ;;  %1508 = vmatmul.f32.gmra.mxu0 %v3734_v31  ;;  %v4680_v31 = vld [vmem:[#allocation21_spill] sm:$0xff] }
 0x53f   :  { %1792 = vmatpush.msrb.mxu3 %v3843_v23  ;;  %1694 = vmatpush.msra.mxu0 %v3913_v56 }
 0x540   :  { %1703 = vmatpush.msrb.mxu1 %v3968_v30  ;;  %1593 = vmatpush.msrb.mxu2 %v3972_v42 }
 0x541   :  { %1810 = vmatpush.msrb.mxu0 %v3903_v52  ;;  %1793 = vmatpush.msrb.mxu3 %v3848_v27 }
 0x542   :  { %1704 = vmatpush.msrb.mxu1 %v3972_v42 }
 0x543   :  { %1794 = vmatpush.msrb.mxu3 %v3853_v40  ;;  %1811 = vmatpush.msrb.mxu0 %v3954_v26 }
 0x545   :  { %1795 = vmatpush.msrb.mxu3 %v3860_v47  ;;  %1812 = vmatpush.msrb.mxu0 %v3956_v21 }
 0x546   :  { %1470 = vmatmul.f32.gmra.mxu3 %v3766_v55  ;;  %1511 = vmatmul.f32.gmra.mxu0 %v3766_v55  ;;  %v301_v55 = vadd.f32 %v4680_v31, %v4664_v49  ;;  %v3977_v49 = vld [vmem:[#allocation9 + $0x268] sm:$0xff] }
 0x547   :  { %1796 = vmatpush.msrb.mxu3 %v3864_v58  ;;  %1813 = vmatpush.msrb.mxu0 %v3966_v0 }
 0x548   :  { %1594 = vmatpush.msrb.mxu2 %v3977_v49  ;;  %1705 = vmatpush.msrb.mxu1 %v3977_v49 }
 0x549   :  { %1797 = vmatpush.msrb.mxu3 %v3869_v13  ;;  %1814 = vmatpush.msrb.mxu0 %v3968_v30 }
 0x54a   :  { %1595 = vmatpush.msrb.mxu2 %v3983_v62  ;;  %1706 = vmatpush.msrb.mxu1 %v3983_v62 }
 0x54b   :  { %1798 = vmatpush.msrb.mxu3 %v3874_v29  ;;  %1815 = vmatpush.msrb.mxu0 %v3972_v42 }
 0x54c   :  { %1596 = vmatpush.msrb.mxu2 %v3988_v46  ;;  %1707 = vmatpush.msrb.mxu1 %v3988_v46 }
 0x54d   :  { %1799 = vmatpush.msrb.mxu3 %v3880_v28  ;;  %1816 = vmatpush.msrb.mxu0 %v3977_v49 }
 0x54e   :  { %1473 = vmatmul.f32.gmra.mxu3 %v3831_v38  ;;  %1514 = vmatmul.f32.gmra.mxu0 %v3831_v38 }
 0x54f   :  { %1800 = vmatpush.msrb.mxu3 %v3885_v36  ;;  %1817 = vmatpush.msrb.mxu0 %v3983_v62 }
 0x550   :  { %1597 = vmatpush.msrb.mxu2 %v4000_v10  ;;  %1708 = vmatpush.msrb.mxu1 %v4000_v10 }
 0x551   :  { %1801 = vmatpush.msrb.mxu3 %v3890_v44  ;;  %1818 = vmatpush.msrb.mxu0 %v3988_v46 }
 0x552   :  { %1598 = vmatpush.msrb.mxu2 %v4004_v8  ;;  %1709 = vmatpush.msrb.mxu1 %v4004_v8 }
 0x553   :  { %1802 = vmatpush.msrb.mxu3 %v3895_v33  ;;  %1819 = vmatpush.msrb.mxu0 %v4000_v10 }
 0x554   :  { %1599 = vmatpush.msrb.mxu2 %v4009_v11  ;;  %1710 = vmatpush.msrb.mxu1 %v4009_v11 }
 0x555   :  { %1803 = vmatpush.msrb.mxu3 %v3901_v43  ;;  %1820 = vmatpush.msrb.mxu0 %v4004_v8 }
 0x556   :  { %1600 = vmatpush.msrb.mxu2 %v4016_v54  ;;  %1711 = vmatpush.msrb.mxu1 %v4016_v54 }
 0x557   :  { %1804 = vmatpush.msrb.mxu3 %v3908_v53  ;;  %1821 = vmatpush.msrb.mxu0 %v4009_v11 }
 0x558   :  { %1601 = vmatpush.msrb.mxu2 %v4023_v37  ;;  %1712 = vmatpush.msrb.mxu1 %v4023_v37 }
 0x559   :  { %1805 = vmatpush.msrb.mxu3 %v3913_v56  ;;  %1822 = vmatpush.msrb.mxu0 %v4016_v54 }
 0x55b   :  { %1823 = vmatpush.msrb.mxu0 %v4023_v37 }
 0x592   :  { %v1205_v57 = vpop.f32.mrf.mxu0 }
 0x593   :  { %v1229_v61 = vadd.f32 %v1205_v57, %v301_v55  ;;  %v4028_v55 = vld [vmem:[#allocation9 + $0x1a8] sm:$0xff]  ;;  %v4030_v57 = vld [vmem:[#allocation9 + $0x190] sm:$0xff] }
 0x594   :  { %4684 = vst [vmem:[#allocation35_spill] sm:$0xff] %v4028_v55  ;;  %1602 = vmatpush.msrb.mxu2 %v4028_v55  ;;  %1713 = vmatpush.msrb.mxu1 %v4028_v55 }
 0x595   :  { %v2508_v35 = vmul.f32 -1.442695, %v1229_v61  ;;  %4685 = vst [vmem:[#allocation25_spill] sm:$0xff] %v4030_v57  ;;  %1824 = vmatpush.msrb.mxu0 %v4028_v55 }
 0x596   :  { %1603 = vmatpush.msrb.mxu2 %v4030_v57  ;;  %1714 = vmatpush.msrb.mxu1 %v4030_v57 }
 0x597   :  { %2612 = vpow2.f32 %v2508_v35  ;;  %1825 = vmatpush.msrb.mxu0 %v4030_v57 }
 0x598   :  { %v1185_v3 = vpop.f32.mrf.mxu3  ;;  %1770 = vmatpush.msra.mxu2 %v3777_v39  ;;  %1881 = vmatpush.msra.mxu1 %v3777_v39 }
 0x599   :  { %v1228_v1 = vadd.f32 %v1185_v3, %v4681_v9 }
 0x59a   :  { %1771 = vmatpush.msra.mxu2 %v3780_v50  ;;  %1882 = vmatpush.msra.mxu1 %v3780_v50 }
 0x59b   :  { %v2507_v14 = vmul.f32 -1.442695, %v1228_v1 }
 0x59c   :  { %1772 = vmatpush.msra.mxu2 %v3783_v5  ;;  %1883 = vmatpush.msra.mxu1 %v3783_v5 }
 0x59d   :  { %v2613_v41 = vpop.eup %2612  ;;  %2614 = vpow2.f32 %v2507_v14 }
 0x59e   :  { %v3994_v7 = vadd.f32 1.0, %v2613_v41  ;;  %v1225_v41 = vpop.f32.mrf.mxu1  ;;  %1773 = vmatpush.msra.mxu2 %v3786_v15  ;;  %1884 = vmatpush.msra.mxu1 %v3786_v15 }
 0x59f   :  { %v1268_v57 = vadd.f32 %v3761_v63, %v1225_v41 }
 0x5a0   :  { %2616 = vrcp.f32 %v3994_v7  ;;  %vm1258_vm13 = vweird.f32 %v3994_v7  ;;  %v1262_v63 = vand.u32 2147483647, %v3994_v7  ;;  %1774 = vmatpush.msra.mxu2 %v3789_v51  ;;  %1885 = vmatpush.msra.mxu1 %v3789_v51 }
 0x5a2   :  { %1775 = vmatpush.msra.mxu2 %v3792_v12  ;;  %1886 = vmatpush.msra.mxu1 %v3792_v12  ;;  %vm1263_vm15 = vcmp.eq.f32.partialorder %v1262_v63, 8.507059e+37 }
 0x5a3   :  { %v2615_v4 = vpop.eup %2614 }
 0x5a4   :  { %v1236_v59 = vadd.f32 1.0, %v2615_v4  ;;  %1776 = vmatpush.msra.mxu2 %v3795_v32  ;;  %1887 = vmatpush.msra.mxu1 %v3795_v32 }
 0x5a6   :  { %2618 = vrcp.f32 %v1236_v59  ;;  %v4012_v2 = vpop.eup %2616  ;;  %v1249_v9 = vand.u32 2147483648, %v1236_v59  ;;  %v1247_v14 = vand.u32 2147483647, %v1236_v59  ;;  %vm1243_vm9 = vweird.f32 %v1236_v59  ;;  %1777 = vmatpush.msra.mxu2 %v3798_v48  ;;  %1888 = vmatpush.msra.mxu1 %v3798_v48 }
 0x5a7   :  { %v1254_v16 = vmul.f32 %v4012_v2, %v3994_v7  ;;  %vm1259_vm12 = vweird.f32 %v4012_v2 }
 0x5a8   :  { %vm1248_vm11 = vcmp.eq.f32.partialorder %v1247_v14, 8.507059e+37  ;;  %vm1260_vm14 = vmor %vm1258_vm13, %vm1259_vm12  ;;  %1778 = vmatpush.msra.mxu2 %v3803_v60  ;;  %1889 = vmatpush.msra.mxu1 %v3803_v60 }
 0x5a9   :  { %v1255_v35 = vsub.f32 1.0, %v1254_v16 }
 0x5aa   :  { %1779 = vmatpush.msra.mxu2 %v3807_v22  ;;  %1890 = vmatpush.msra.mxu1 %v3807_v22 }
 0x5ab   :  { %v1256_v4 = vmul.f32 %v4012_v2, %v1255_v35  ;;  %v4687_v35 = vld [vmem:[#allocation24_spill] sm:$0xff] }
 0x5ac   :  { %v2619_v31 = vpop.eup %2618  ;;  %1780 = vmatpush.msra.mxu2 %v3810_v6  ;;  %1891 = vmatpush.msra.mxu1 %v3810_v6 }
 0x5ad   :  { %v1239_v61 = vmul.f32 %v2619_v31, %v1236_v59  ;;  %vm1244_vm8 = vweird.f32 %v2619_v31  ;;  %v1257_v37 = vadd.f32 %v4012_v2, %v1256_v4  ;;  %v4686_v59 = vld [vmem:[#allocation36_spill] sm:$0xff] }
 0x5ae   :  { %vm1245_vm10 = vmor %vm1243_vm9, %vm1244_vm8  ;;  %1781 = vmatpush.msra.mxu2 %v3813_v19  ;;  %1892 = vmatpush.msra.mxu1 %v3813_v19  ;;  %v1377_v4 = vld [vmem:[#allocation10 + $0x3] sm:$0x7] }
 0x5af   :  { %v1240_v3 = vsub.f32 1.0, %v1239_v61  ;;  %v1250_v61 = vor.u32 1.1754944e-38, %v1249_v9  ;;  %v1264_v9 = vand.u32 2147483648, %v3994_v7  ;;  %v1261_v14 = vsel %vm1260_vm14, %v4012_v2, %v1257_v37 }
 0x5b0   :  { %1782 = vmatpush.msra.mxu2 %v3816_v18  ;;  %1893 = vmatpush.msra.mxu1 %v3816_v18 }
 0x5b1   :  { %v1241_v1 = vmul.f32 %v2619_v31, %v1240_v3  ;;  %v1265_v41 = vor.u32 1.1754944e-38, %v1264_v9  ;;  %v1456_v9 = vpop.f32.mrf.mxu3 }
 0x5b2   :  { %1783 = vmatpush.msra.mxu2 %v3819_v24  ;;  %1894 = vmatpush.msra.mxu1 %v3819_v24 }
 0x5b3   :  { %v1242_v16 = vadd.f32 %v2619_v31, %v1241_v1  ;;  %v342_v1 = vadd.f32 %v4687_v35, %v4686_v59 }
 0x5b4   :  { %1784 = vmatpush.msra.mxu2 %v3822_v17  ;;  %1895 = vmatpush.msra.mxu1 %v3822_v17 }
 0x5b5   :  { %v1246_v3 = vsel %vm1245_vm10, %v2619_v31, %v1242_v16 }
 0x5b6   :  { %v1251_v55 = vsel %vm1248_vm11, %v1250_v61, %v1246_v3  ;;  %1785 = vmatpush.msra.mxu2 %v3824_v25  ;;  %1896 = vmatpush.msra.mxu1 %v3824_v25  ;;  %v4103_v61 = vperm.slane %v1377_v4, 0  ;;  %v1565_v3 = vpop.f32.mrf.mxu1 }
 0x5b7   :  { %v1269_v54 = vmul.f32 %v1268_v57, %v1251_v55  ;;  %v1266_v55 = vsel %vm1263_vm15, %v1265_v41, %v1261_v14 }
 0x5b8   :  { %v1272_v7 = vsub.f32 1.0, %v1266_v55  ;;  %v1274_v37 = vmul.f32 %v1266_v55, %v3831_v38  ;;  %v1415_v38 = vpop.f32.mrf.mxu2  ;;  %4690 = vst [vmem:[#allocation20_spill] sm:$0xff] %v4103_v61 }
 0x5b9   :  { %v1270_v31 = vadd.f32 %v1269_v54, %v342_v1  ;;  %v1416_v59 = vadd.f32 %v1415_v38, %v4103_v61  ;;  %v4106_v1 = vperm.slane %v1377_v4, 1 }
 0x5bb   :  { %2620 = vtanh.f32 %v1270_v31  ;;  %v1608_v35 = vadd.f32 %v1565_v3, %v1416_v59  ;;  %4691 = vst [vmem:[#allocation30_spill] sm:$0xff] %v4106_v1  ;;  %v1457_v41 = vadd.f32 %v1456_v9, %v4106_v1 }
 0x5bd   :  { %v2510_v31 = vmul.f32 -1.442695, %v1608_v35 }
 0x5be   :  { %v1585_v14 = vpop.f32.mrf.mxu1 }
 0x5bf   :  { %v1609_v55 = vadd.f32 %v1585_v14, %v1457_v41  ;;  %2622 = vpow2.f32 %v2510_v31 }
 0x5c1   :  { %v2621_v2 = vpop.eup %2620 }
 0x5c2   :  { %v1273_v54 = vmul.f32 %v2621_v2, %v1272_v7  ;;  %v2511_v7 = vmul.f32 -1.442695, %v1609_v55 }
 0x5c4   :  { %v1275_v57 = vadd.f32 %v1274_v37, %v1273_v54  ;;  %2624 = vpow2.f32 %v2511_v7 }
 0x5c5   :  { %v2623_v54 = vpop.eup %2622 }
 0x5c6   :  { %1435 = vmatmul.f32.gmra.mxu2 %v1275_v57  ;;  %1476 = vmatmul.f32.gmra.mxu3 %v1275_v57  ;;  %v1616_v37 = vadd.f32 1.0, %v2623_v54  ;;  %v4122_v54 = vld [vmem:[%s4554_s4 + $0x1] ss:$0 sm:$0xff] }
 0x5c7   :  { %1517 = vmatmul.f32.gmra.mxu0 %v1275_v57 }
 0x5c8   :  { %2626 = vrcp.f32 %v1616_v37  ;;  %v1629_v7 = vand.u32 2147483648, %v1616_v37  ;;  %vm1623_vm1 = vweird.f32 %v1616_v37 }
 0x5ca   :  { %v2625_v57 = vpop.eup %2624  ;;  %v1630_v61 = vor.u32 1.1754944e-38, %v1629_v7 }
 0x5cb   :  { %v1617_v3 = vadd.f32 1.0, %v2625_v57  ;;  %v1627_v57 = vand.u32 2147483647, %v1616_v37 }
 0x5cd   :  { %2628 = vrcp.f32 %v1617_v3  ;;  %vm1628_vm3 = vcmp.eq.f32.partialorder %v1627_v57, 8.507059e+37  ;;  %v1644_v25 = vand.u32 2147483648, %v1617_v3  ;;  %vm1638_vm5 = vweird.f32 %v1617_v3 }
 0x5ce   :  { %1604 = vmatmul.f32.vlgmr.msrb.gmra.mxu2 %v4677_v34  ;;  %v4099_v34 = vpop.f32.mrf.mxu2  ;;  %v2627_v59 = vpop.eup %2626 }
 0x5cf   :  { %1901 = vmatpush.msrb.mxu2 %v3833_v20  ;;  %4688 = vst [vmem:[#allocation41_spill] sm:$0xff] %v4099_v34  ;;  %vm1624_vm0 = vweird.f32 %v2627_v59  ;;  %v1497_v34 = vpop.f32.mrf.mxu0 }
 0x5d0   :  { %vm1625_vm2 = vmor %vm1623_vm1, %vm1624_vm0 }
 0x5d1   :  { %1902 = vmatpush.msrb.mxu2 %v3839_v45 }
 0x5d3   :  { %1903 = vmatpush.msrb.mxu2 %v3843_v23 }
 0x5d5   :  { %1904 = vmatpush.msrb.mxu2 %v3848_v27 }
 0x5d6   :  { %v4101_v16 = vpop.f32.mrf.mxu2 }
 0x5d7   :  { %1905 = vmatpush.msrb.mxu2 %v3853_v40  ;;  %4689 = vst [vmem:[#allocation29_spill] sm:$0xff] %v4101_v16  ;;  %v2629_v16 = vpop.eup %2628 }
 0x5d8   :  { %v1634_v14 = vmul.f32 %v2629_v16, %v1617_v3  ;;  %vm1639_vm4 = vweird.f32 %v2629_v16 }
 0x5d9   :  { %1906 = vmatpush.msrb.mxu2 %v3860_v47  ;;  %vm1640_vm6 = vmor %vm1638_vm5, %vm1639_vm4 }
 0x5da   :  { %v1635_v55 = vsub.f32 1.0, %v1634_v14 }
 0x5db   :  { %1907 = vmatpush.msrb.mxu2 %v3864_v58 }
 0x5dd   :  { %1908 = vmatpush.msrb.mxu2 %v3869_v13 }
 0x5de   :  { %v4108_v63 = vpop.f32.mrf.mxu2 }
 0x5df   :  { %1909 = vmatpush.msrb.mxu2 %v3874_v29  ;;  %4692 = vst [vmem:[#allocation37_spill] sm:$0xff] %v4108_v63  ;;  %v1619_v63 = vmul.f32 %v2627_v59, %v1616_v37  ;;  %v1642_v37 = vand.u32 2147483647, %v1617_v3 }
 0x5e1   :  { %1910 = vmatpush.msrb.mxu2 %v3880_v28  ;;  %v1620_v9 = vsub.f32 1.0, %v1619_v63  ;;  %vm1643_vm7 = vcmp.eq.f32.partialorder %v1642_v37, 8.507059e+37  ;;  %v4713_v37 = vld [vmem:[#allocation41_spill] sm:$0xff] }
 0x5e3   :  { %1911 = vmatpush.msrb.mxu2 %v3885_v36  ;;  %v1621_v31 = vmul.f32 %v2627_v59, %v1620_v9 }
 0x5e5   :  { %1912 = vmatpush.msrb.mxu2 %v3890_v44 }
 0x5e6   :  { %v4111_v2 = vpop.f32.mrf.mxu2 }
 0x5e7   :  { %1913 = vmatpush.msrb.mxu2 %v3895_v33  ;;  %4693 = vst [vmem:[#allocation31_spill] sm:$0xff] %v4111_v2  ;;  %v1622_v2 = vadd.f32 %v2627_v59, %v1621_v31 }
 0x5e9   :  { %1914 = vmatpush.msrb.mxu2 %v3901_v43  ;;  %v1626_v63 = vsel %vm1625_vm2, %v2627_v59, %v1622_v2  ;;  %v1645_v2 = vor.u32 1.1754944e-38, %v1644_v25 }
 0x5ea   :  { %v1631_v31 = vsel %vm1628_vm3, %v1630_v61, %v1626_v63 }
 0x5eb   :  { %1915 = vmatpush.msrb.mxu2 %v3908_v53 }
 0x5ed   :  { %1916 = vmatpush.msrb.mxu2 %v3913_v56 }
 0x5ee   :  { %v4113_v38 = vpop.f32.mrf.mxu2 }
 0x5ef   :  { %4694 = vst [vmem:[#allocation22_spill] sm:$0xff] %v4113_v38  ;;  %v1636_v38 = vmul.f32 %v2629_v16, %v1635_v55 }
 0x5f6   :  { %v4115_v35 = vpop.f32.mrf.mxu2 }
 0x5f7   :  { %4695 = vst [vmem:[#allocation39_spill] sm:$0xff] %v4115_v35  ;;  %v4124_v35 = vperm.slane %v1377_v4, 2 }
 0x5f9   :  { %v1498_v1 = vadd.f32 %v1497_v34, %v4124_v35 }
 0x649   :  { %v4117_v41 = vpop.f32.mrf.mxu2 }
 0x64a   :  { %4696 = vst [vmem:[#allocation38_spill] sm:$0xff] %v4117_v41  ;;  %v1637_v41 = vadd.f32 %v2629_v16, %v1636_v38  ;;  %v4711_v38 = vld [vmem:[#allocation30_spill] sm:$0xff] }
 0x64c   :  { %v1641_v4 = vsel %vm1640_vm6, %v2629_v16, %v1637_v41 }
 0x64d   :  { %v1646_v59 = vsel %vm1643_vm7, %v1645_v2, %v1641_v4 }
 0x64e   :  { %v1652_v7 = vsub.f32 1.0, %v1646_v59 }
 0x651   :  { %v1605_v9 = vpop.f32.mrf.mxu2 }
 0x652   :  { %v1648_v14 = vadd.f32 %v4122_v54, %v1605_v9  ;;  %v1654_v9 = vmul.f32 0.0, %v1646_v59 }
 0x654   :  { %v1649_v56 = vmul.f32 %v1648_v14, %v1631_v31  ;;  %v4712_v31 = vld [vmem:[#allocation20_spill] sm:$0xff] }
 0x656   :  { %v1650_v55 = vadd.f32 %v1649_v56, %v1498_v1 }
 0x658   :  { %2630 = vtanh.f32 %v1650_v55  ;;  %v1419_v55 = vadd.f32 %v4713_v37, %v4712_v31 }
 0x65e   :  { %v2631_v57 = vpop.eup %2630 }
 0x65f   :  { %v1653_v53 = vmul.f32 %v2631_v57, %v1652_v7 }
 0x661   :  { %v4128_v61 = vadd.f32 %v1654_v9, %v1653_v53 }
 0x663   :  { %1675 = vmatmul.f32.vlgmr.msra.gmra.mxu3 %v4128_v61  ;;  %1695 = vmatmul.f32.vlgmr.msra.gmra.mxu0 %v4128_v61 }
 0x664   :  { %1715 = vmatmul.f32.vlgmr.msrb.gmra.mxu1 %v4128_v61  ;;  %1921 = vmatpush.msra.mxu3 %v3903_v52 }
 0x665   :  { %1992 = vmatpush.msra.mxu0 %v3777_v39  ;;  %2012 = vmatpush.msrb.mxu1 %v3833_v20  ;;  %v4697_v39 = vld [vmem:[#allocation27_spill] sm:$0xff] }
 0x666   :  { %1922 = vmatpush.msra.mxu3 %v3954_v26 }
 0x667   :  { %1993 = vmatpush.msra.mxu0 %v3780_v50  ;;  %2013 = vmatpush.msrb.mxu1 %v3839_v45  ;;  %v4698_v50 = vld [vmem:[#allocation26_spill] sm:$0xff] }
 0x668   :  { %1923 = vmatpush.msra.mxu3 %v3956_v21 }
 0x669   :  { %1994 = vmatpush.msra.mxu0 %v3783_v5  ;;  %2014 = vmatpush.msrb.mxu1 %v3843_v23  ;;  %v4699_v5 = vld [vmem:[#allocation35_spill] sm:$0xff] }
 0x66a   :  { %1924 = vmatpush.msra.mxu3 %v3966_v0 }
 0x66b   :  { %1995 = vmatpush.msra.mxu0 %v3786_v15  ;;  %2015 = vmatpush.msrb.mxu1 %v3848_v27  ;;  %v4700_v15 = vld [vmem:[#allocation23_spill] sm:$0xff] }
 0x66c   :  { %1925 = vmatpush.msra.mxu3 %v3968_v30 }
 0x66d   :  { %1996 = vmatpush.msra.mxu0 %v3789_v51  ;;  %2016 = vmatpush.msrb.mxu1 %v3853_v40  ;;  %v4701_v51 = vld [vmem:[#allocation25_spill] sm:$0xff] }
 0x66e   :  { %1926 = vmatpush.msra.mxu3 %v3972_v42 }
 0x66f   :  { %1997 = vmatpush.msra.mxu0 %v3792_v12  ;;  %2017 = vmatpush.msrb.mxu1 %v3860_v47  ;;  %v4702_v12 = vld [vmem:[#allocation28_spill] sm:$0xff] }
 0x670   :  { %1927 = vmatpush.msra.mxu3 %v3977_v49 }
 0x671   :  { %1998 = vmatpush.msra.mxu0 %v3795_v32  ;;  %2018 = vmatpush.msrb.mxu1 %v3864_v58  ;;  %v4703_v32 = vld [vmem:[#allocation33_spill] sm:$0xff] }
 0x672   :  { %1928 = vmatpush.msra.mxu3 %v3983_v62 }
 0x673   :  { %1999 = vmatpush.msra.mxu0 %v3798_v48  ;;  %2019 = vmatpush.msrb.mxu1 %v3869_v13  ;;  %v1500_v48 = vpop.f32.mrf.mxu0 }
 0x674   :  { %1929 = vmatpush.msra.mxu3 %v3988_v46 }
 0x675   :  { %2000 = vmatpush.msra.mxu0 %v3803_v60  ;;  %2020 = vmatpush.msrb.mxu1 %v3874_v29  ;;  %v1459_v60 = vpop.f32.mrf.mxu3 }
 0x676   :  { %1930 = vmatpush.msra.mxu3 %v4000_v10  ;;  %v1460_v3 = vadd.f32 %v1459_v60, %v4711_v38 }
 0x677   :  { %2001 = vmatpush.msra.mxu0 %v3807_v22  ;;  %2021 = vmatpush.msrb.mxu1 %v3880_v28 }
 0x678   :  { %1931 = vmatpush.msra.mxu3 %v4004_v8 }
 0x679   :  { %2002 = vmatpush.msra.mxu0 %v3810_v6  ;;  %2022 = vmatpush.msrb.mxu1 %v3885_v36 }
 0x67a   :  { %1932 = vmatpush.msra.mxu3 %v4009_v11 }
 0x67b   :  { %2003 = vmatpush.msra.mxu0 %v3813_v19  ;;  %2023 = vmatpush.msrb.mxu1 %v3890_v44  ;;  %v4181_v22 = vpop.f32.mrf.mxu0 }
 0x67c   :  { %1933 = vmatpush.msra.mxu3 %v4697_v39 }
 0x67d   :  { %2004 = vmatpush.msra.mxu0 %v3816_v18  ;;  %2024 = vmatpush.msrb.mxu1 %v3895_v33  ;;  %v4183_v6 = vpop.f32.mrf.mxu3 }
 0x67e   :  { %1934 = vmatpush.msra.mxu3 %v4698_v50 }
 0x67f   :  { %2005 = vmatpush.msra.mxu0 %v3819_v24  ;;  %2025 = vmatpush.msrb.mxu1 %v3901_v43 }
 0x680   :  { %1935 = vmatpush.msra.mxu3 %v4699_v5 }
 0x681   :  { %2006 = vmatpush.msra.mxu0 %v3822_v17  ;;  %2026 = vmatpush.msrb.mxu1 %v4700_v15 }
 0x682   :  { %1936 = vmatpush.msra.mxu3 %v4701_v51 }
 0x683   :  { %2007 = vmatpush.msra.mxu0 %v4702_v12  ;;  %2027 = vmatpush.msrb.mxu1 %v4703_v32  ;;  %v4185_v19 = vpop.f32.mrf.mxu0 }
 0x685   :  { %v4187_v18 = vpop.f32.mrf.mxu3 }
 0x68b   :  { %v4189_v24 = vpop.f32.mrf.mxu0 }
 0x68c   :  { %4704 = vst [vmem:[#allocation19_spill] sm:$0xff] %v4189_v24 }
 0x68d   :  { %v4191_v17 = vpop.f32.mrf.mxu3 }
 0x693   :  { %v4193_v25 = vpop.f32.mrf.mxu0 }
 0x694   :  { %4705 = vst [vmem:[#allocation18_spill] sm:$0xff] %v4193_v25 }
 0x695   :  { %v4195_v53 = vpop.f32.mrf.mxu3 }
 0x696   :  { %4706 = vst [vmem:[#allocation32_spill] sm:$0xff] %v4195_v53 }
 0x69b   :  { %v4197_v56 = vpop.f32.mrf.mxu0 }
 0x69c   :  { %4707 = vst [vmem:[#allocation40_spill] sm:$0xff] %v4197_v56 }
 0x69d   :  { %v4199_v34 = vpop.f32.mrf.mxu3 }
 0x69e   :  { %4708 = vst [vmem:[#allocation21_spill] sm:$0xff] %v4199_v34 }
 0x6a3   :  { %v4201_v16 = vpop.f32.mrf.mxu0 }
 0x6a4   :  { %4709 = vst [vmem:[#allocation34_spill] sm:$0xff] %v4201_v16 }
 0x6a5   :  { %v4203_v1 = vpop.f32.mrf.mxu3 }
 0x6a6   :  { %4710 = vst [vmem:[#allocation36_spill] sm:$0xff] %v4203_v1 }
 0x6e0   :  { %v1696_v41 = vpop.f32.mrf.mxu0 }
 0x6e1   :  { %v1720_v63 = vadd.f32 %v1696_v41, %v1460_v3 }
 0x6e3   :  { %v2513_v14 = vmul.f32 -1.442695, %v1720_v63 }
 0x6e5   :  { %2632 = vpow2.f32 %v2513_v14 }
 0x6e6   :  { %v1676_v4 = vpop.f32.mrf.mxu3 }
 0x6e7   :  { %v1719_v2 = vadd.f32 %v1676_v4, %v1419_v55  ;;  %v1716_v55 = vpop.f32.mrf.mxu1 }
 0x6e9   :  { %v2512_v59 = vmul.f32 -1.442695, %v1719_v2 }
 0x6eb   :  { %v2633_v7 = vpop.eup %2632  ;;  %2634 = vpow2.f32 %v2512_v59  ;;  %v1759_v59 = vadd.f32 %v4122_v54, %v1716_v55 }
 0x6ec   :  { %v1728_v57 = vadd.f32 1.0, %v2633_v7 }
 0x6ee   :  { %2636 = vrcp.f32 %v1728_v57  ;;  %vm1749_vm13 = vweird.f32 %v1728_v57 }
 0x6f1   :  { %v2635_v9 = vpop.eup %2634 }
 0x6f2   :  { %v1727_v12 = vadd.f32 1.0, %v2635_v9 }
 0x6f4   :  { %2638 = vrcp.f32 %v1727_v12  ;;  %v2637_v16 = vpop.eup %2636  ;;  %v1740_v63 = vand.u32 2147483648, %v1727_v12  ;;  %v1738_v14 = vand.u32 2147483647, %v1727_v12  ;;  %vm1734_vm9 = vweird.f32 %v1727_v12 }
 0x6f5   :  { %v1745_v1 = vmul.f32 %v2637_v16, %v1728_v57  ;;  %vm1750_vm12 = vweird.f32 %v2637_v16 }
 0x6f6   :  { %v1741_v2 = vor.u32 1.1754944e-38, %v1740_v63  ;;  %vm1739_vm11 = vcmp.eq.f32.partialorder %v1738_v14, 8.507059e+37  ;;  %vm1751_vm14 = vmor %vm1749_vm13, %vm1750_vm12 }
 0x6f7   :  { %v1746_v3 = vsub.f32 1.0, %v1745_v1  ;;  %v1501_v1 = vadd.f32 %v1500_v48, %v4124_v35  ;;  %v4217_v48 = vld [vmem:[#allocation9 + $0x2e8] sm:$0xff] }
 0x6f9   :  { %v1747_v37 = vmul.f32 %v2637_v16, %v1746_v3 }
 0x6fa   :  { %v2639_v60 = vpop.eup %2638 }
 0x6fb   :  { %v1730_v56 = vmul.f32 %v2639_v60, %v1727_v12  ;;  %vm1735_vm8 = vweird.f32 %v2639_v60  ;;  %v1748_v25 = vadd.f32 %v2637_v16, %v1747_v37 }
 0x6fc   :  { %vm1736_vm10 = vmor %vm1734_vm9, %vm1735_vm8 }
 0x6fd   :  { %v1731_v41 = vsub.f32 1.0, %v1730_v56  ;;  %v1755_v56 = vand.u32 2147483648, %v1728_v57  ;;  %v1752_v24 = vsel %vm1751_vm14, %v2637_v16, %v1748_v25 }
 0x6ff   :  { %v1732_v34 = vmul.f32 %v2639_v60, %v1731_v41  ;;  %v1753_v41 = vand.u32 2147483647, %v1728_v57 }
 0x701   :  { %v1733_v4 = vadd.f32 %v2639_v60, %v1732_v34  ;;  %v1756_v34 = vor.u32 1.1754944e-38, %v1755_v56  ;;  %vm1754_vm15 = vcmp.eq.f32.partialorder %v1753_v41, 8.507059e+37 }
 0x703   :  { %v1737_v7 = vsel %vm1736_vm10, %v2639_v60, %v1733_v4  ;;  %v1757_v12 = vsel %vm1754_vm15, %v1756_v34, %v1752_v24  ;;  %v4222_v24 = vld [vmem:[#allocation9 + $0x2d0] sm:$0xff] }
 0x704   :  { %v1742_v9 = vsel %vm1739_vm11, %v1741_v2, %v1737_v7  ;;  %v1763_v63 = vsub.f32 1.0, %v1757_v12  ;;  %v1765_v14 = vmul.f32 %v1757_v12, %v4128_v61  ;;  %v4227_v61 = vld [vmem:[#allocation9 + $0x2b8] sm:$0xff] }
 0x705   :  { %v1760_v53 = vmul.f32 %v1759_v59, %v1742_v9 }
 0x707   :  { %v1761_v3 = vadd.f32 %v1760_v53, %v1501_v1 }
 0x709   :  { %2640 = vtanh.f32 %v1761_v3 }
 0x70f   :  { %v2641_v55 = vpop.eup %2640 }
 0x710   :  { %v1764_v60 = vmul.f32 %v2641_v55, %v1763_v63 }
 0x712   :  { %v4211_v37 = vadd.f32 %v1765_v14, %v1764_v60 }
 0x714   :  { %1786 = vmatmul.f32.vlgmr.msra.gmra.mxu2 %v4211_v37  ;;  %1806 = vmatmul.f32.vlgmr.msrb.gmra.mxu3 %v4211_v37 }
 0x715   :  { %1826 = vmatmul.f32.vlgmr.msrb.gmra.mxu0 %v4211_v37  ;;  %2032 = vmatpush.msra.mxu2 %v3903_v52  ;;  %v4232_v52 = vld [vmem:[#allocation9 + $0x2a0] sm:$0xff] }
 0x716   :  { %2103 = vmatpush.msrb.mxu3 %v4217_v48  ;;  %2123 = vmatpush.msrb.mxu0 %v3833_v20  ;;  %v4237_v20 = vld [vmem:[#allocation9 + $0x288] sm:$0xff] }
 0x717   :  { %2033 = vmatpush.msra.mxu2 %v3954_v26 }
 0x718   :  { %2104 = vmatpush.msrb.mxu3 %v4222_v24  ;;  %2124 = vmatpush.msrb.mxu0 %v3839_v45  ;;  %v4242_v45 = vld [vmem:[#allocation9 + $0x270] sm:$0xff] }
 0x719   :  { %2034 = vmatpush.msra.mxu2 %v3956_v21 }
 0x71a   :  { %2105 = vmatpush.msrb.mxu3 %v4227_v61  ;;  %2125 = vmatpush.msrb.mxu0 %v3843_v23  ;;  %v4247_v23 = vld [vmem:[#allocation9 + $0x258] sm:$0xff] }
 0x71b   :  { %2035 = vmatpush.msra.mxu2 %v3966_v0 }
 0x71c   :  { %2106 = vmatpush.msrb.mxu3 %v4232_v52  ;;  %2126 = vmatpush.msrb.mxu0 %v3848_v27  ;;  %v4252_v27 = vld [vmem:[#allocation9 + $0x240] sm:$0xff] }
 0x71d   :  { %2036 = vmatpush.msra.mxu2 %v3968_v30 }
 0x71e   :  { %2107 = vmatpush.msrb.mxu3 %v4237_v20  ;;  %2127 = vmatpush.msrb.mxu0 %v3853_v40  ;;  %v4257_v40 = vld [vmem:[#allocation9 + $0x228] sm:$0xff] }
 0x71f   :  { %2037 = vmatpush.msra.mxu2 %v3972_v42 }
 0x720   :  { %2108 = vmatpush.msrb.mxu3 %v4242_v45  ;;  %2128 = vmatpush.msrb.mxu0 %v3860_v47  ;;  %v4262_v47 = vld [vmem:[#allocation9 + $0x210] sm:$0xff] }
 0x721   :  { %2038 = vmatpush.msra.mxu2 %v3977_v49 }
 0x722   :  { %2109 = vmatpush.msrb.mxu3 %v4247_v23  ;;  %2129 = vmatpush.msrb.mxu0 %v3864_v58  ;;  %v4267_v58 = vld [vmem:[#allocation9 + $0x1f8] sm:$0xff] }
 0x723   :  { %2039 = vmatpush.msra.mxu2 %v3983_v62 }
 0x724   :  { %2110 = vmatpush.msrb.mxu3 %v4252_v27  ;;  %2130 = vmatpush.msrb.mxu0 %v3869_v13  ;;  %v4272_v13 = vld [vmem:[#allocation9 + $0x1e0] sm:$0xff] }
 0x725   :  { %2040 = vmatpush.msra.mxu2 %v3988_v46 }
 0x726   :  { %2111 = vmatpush.msrb.mxu3 %v4257_v40  ;;  %2131 = vmatpush.msrb.mxu0 %v3874_v29  ;;  %v4277_v29 = vld [vmem:[#allocation9 + $0x1c8] sm:$0xff] }
 0x727   :  { %2041 = vmatpush.msra.mxu2 %v4000_v10 }
 0x728   :  { %2112 = vmatpush.msrb.mxu3 %v4262_v47  ;;  %2132 = vmatpush.msrb.mxu0 %v3880_v28  ;;  %v4282_v28 = vld [vmem:[#allocation9 + $0x1b0] sm:$0xff] }
 0x729   :  { %2042 = vmatpush.msra.mxu2 %v4004_v8 }
 0x72a   :  { %2113 = vmatpush.msrb.mxu3 %v4267_v58  ;;  %2133 = vmatpush.msrb.mxu0 %v3885_v36  ;;  %v4287_v36 = vld [vmem:[#allocation9 + $0x198] sm:$0xff] }
 0x72b   :  { %2043 = vmatpush.msra.mxu2 %v4009_v11 }
 0x72c   :  { %2114 = vmatpush.msrb.mxu3 %v4272_v13  ;;  %2134 = vmatpush.msrb.mxu0 %v3890_v44  ;;  %v4292_v44 = vld [vmem:[#allocation9 + $0x180] sm:$0xff] }
 0x72d   :  { %2044 = vmatpush.msra.mxu2 %v4697_v39 }
 0x72e   :  { %2115 = vmatpush.msrb.mxu3 %v4277_v29  ;;  %2135 = vmatpush.msrb.mxu0 %v3895_v33  ;;  %v4714_v33 = vld [vmem:[#allocation29_spill] sm:$0xff] }
 0x72f   :  { %2045 = vmatpush.msra.mxu2 %v4698_v50  ;;  %v1422_v25 = vadd.f32 %v4714_v33, %v4712_v31 }
 0x730   :  { %2116 = vmatpush.msrb.mxu3 %v4282_v28  ;;  %2136 = vmatpush.msrb.mxu0 %v3901_v43  ;;  %v1463_v43 = vadd.f32 %v4183_v6, %v4711_v38 }
 0x731   :  { %2046 = vmatpush.msra.mxu2 %v4699_v5 }
 0x732   :  { %2117 = vmatpush.msrb.mxu3 %v4287_v36  ;;  %2137 = vmatpush.msrb.mxu0 %v4700_v15 }
 0x733   :  { %2047 = vmatpush.msra.mxu2 %v4701_v51 }
 0x734   :  { %2118 = vmatpush.msrb.mxu3 %v4292_v44  ;;  %2138 = vmatpush.msrb.mxu0 %v4703_v32 }
 0x792   :  { %v1827_v60 = vpop.f32.mrf.mxu0 }
 0x797   :  { %v1787_v53 = vpop.f32.mrf.mxu2  ;;  %v1807_v16 = vpop.f32.mrf.mxu3 }
 0x798   :  { %v1830_v57 = vadd.f32 %v1787_v53, %v1422_v25  ;;  %v1831_v4 = vadd.f32 %v1807_v16, %v1463_v43  ;;  %v1870_v43 = vadd.f32 %v4122_v54, %v1827_v60 }
 0x79a   :  { %v2514_v2 = vmul.f32 -1.442695, %v1830_v57  ;;  %v2515_v15 = vmul.f32 -1.442695, %v1831_v4  ;;  %v1504_v4 = vadd.f32 %v4181_v22, %v4124_v35  ;;  %v4309_v22 = vld [vmem:[#allocation9 + $0x2f8] sm:$0xff] }
 0x79c   :  { %2642 = vpow2.f32 %v2514_v2 }
 0x79d   :  { %2644 = vpow2.f32 %v2515_v15 }
 0x7a2   :  { %v2643_v59 = vpop.eup %2642 }
 0x7a3   :  { %v2645_v7 = vpop.eup %2644  ;;  %v1838_v9 = vadd.f32 1.0, %v2643_v59 }
 0x7a4   :  { %v1839_v1 = vadd.f32 1.0, %v2645_v7 }
 0x7a5   :  { %2646 = vrcp.f32 %v1838_v9  ;;  %v1851_v6 = vand.u32 2147483648, %v1838_v9  ;;  %v1849_v55 = vand.u32 2147483647, %v1838_v9  ;;  %vm1845_vm1 = vweird.f32 %v1838_v9 }
 0x7a6   :  { %2648 = vrcp.f32 %v1839_v1  ;;  %v1866_v2 = vand.u32 2147483648, %v1839_v1  ;;  %vm1860_vm5 = vweird.f32 %v1839_v1  ;;  %v1864_v59 = vand.u32 2147483647, %v1839_v1 }
 0x7a7   :  { %v1852_v25 = vor.u32 1.1754944e-38, %v1851_v6  ;;  %vm1850_vm3 = vcmp.eq.f32.partialorder %v1849_v55, 8.507059e+37  ;;  %v4328_v55 = vld [vmem:[#allocation9 + $0x2a8] sm:$0xff] }
 0x7a8   :  { %vm1865_vm7 = vcmp.eq.f32.partialorder %v1864_v59, 8.507059e+37 }
 0x7ab   :  { %v2647_v32 = vpop.eup %2646 }
 0x7ac   :  { %v2649_v56 = vpop.eup %2648  ;;  %v1841_v41 = vmul.f32 %v2647_v32, %v1838_v9  ;;  %vm1846_vm0 = vweird.f32 %v2647_v32  ;;  %v1867_v9 = vor.u32 1.1754944e-38, %v1866_v2 }
 0x7ad   :  { %v1856_v3 = vmul.f32 %v2649_v56, %v1839_v1  ;;  %vm1847_vm2 = vmor %vm1845_vm1, %vm1846_vm0  ;;  %vm1861_vm4 = vweird.f32 %v2649_v56  ;;  %v4313_v1 = vld [vmem:[#allocation9 + $0x2f0] sm:$0xff] }
 0x7ae   :  { %v1842_v34 = vsub.f32 1.0, %v1841_v41  ;;  %vm1862_vm6 = vmor %vm1860_vm5, %vm1861_vm4 }
 0x7af   :  { %v1857_v12 = vsub.f32 1.0, %v1856_v3 }
 0x7b0   :  { %v1843_v63 = vmul.f32 %v2647_v32, %v1842_v34 }
 0x7b1   :  { %v1858_v14 = vmul.f32 %v2649_v56, %v1857_v12 }
 0x7b2   :  { %v1844_v33 = vadd.f32 %v2647_v32, %v1843_v63 }
 0x7b3   :  { %v1859_v57 = vadd.f32 %v2649_v56, %v1858_v14 }
 0x7b4   :  { %v1848_v53 = vsel %vm1847_vm2, %v2647_v32, %v1844_v33 }
 0x7b5   :  { %v1853_v16 = vsel %vm1850_vm3, %v1852_v25, %v1848_v53  ;;  %v1863_v41 = vsel %vm1862_vm6, %v2649_v56, %v1859_v57  ;;  %v4323_v56 = vld [vmem:[#allocation9 + $0x2c0] sm:$0xff]  ;;  %v1466_v25 = vadd.f32 %v4187_v18, %v4711_v38 }
 0x7b6   :  { %v1871_v15 = vmul.f32 %v1870_v43, %v1853_v16  ;;  %v1868_v3 = vsel %vm1865_vm7, %v1867_v9, %v1863_v41 }
 0x7b7   :  { %v1874_v34 = vsub.f32 1.0, %v1868_v3  ;;  %v1876_v12 = vmul.f32 %v1868_v3, %v4211_v37  ;;  %v4318_v37 = vld [vmem:[#allocation9 + $0x2d8] sm:$0xff] }
 0x7b8   :  { %v1872_v7 = vadd.f32 %v1871_v15, %v1504_v4 }
 0x7ba   :  { %2650 = vtanh.f32 %v1872_v7 }
 0x7c0   :  { %v2651_v32 = vpop.eup %2650 }
 0x7c1   :  { %v1875_v6 = vmul.f32 %v2651_v32, %v1874_v34 }
 0x7c3   :  { %v4304_v63 = vadd.f32 %v1876_v12, %v1875_v6 }
 0x7c5   :  { %1897 = vmatmul.f32.vlgmr.msra.gmra.mxu1 %v4304_v63  ;;  %1917 = vmatmul.f32.vlgmr.msrb.gmra.mxu2 %v4304_v63 }
 0x7c6   :  { %1937 = vmatmul.f32.vlgmr.msra.gmra.mxu3 %v4304_v63  ;;  %2143 = vmatpush.msra.mxu1 %v4309_v22 }
 0x7c7   :  { %2214 = vmatpush.msrb.mxu2 %v4217_v48  ;;  %2234 = vmatpush.msra.mxu3 %v4313_v1 }
 0x7c8   :  { %2144 = vmatpush.msra.mxu1 %v3954_v26  ;;  %v4333_v26 = vld [vmem:[#allocation9 + $0x290] sm:$0xff] }
 0x7c9   :  { %2215 = vmatpush.msrb.mxu2 %v4222_v24  ;;  %2235 = vmatpush.msra.mxu3 %v4318_v37 }
 0x7ca   :  { %2145 = vmatpush.msra.mxu1 %v3956_v21  ;;  %v4338_v21 = vld [vmem:[#allocation9 + $0x278] sm:$0xff] }
 0x7cb   :  { %2216 = vmatpush.msrb.mxu2 %v4227_v61  ;;  %2236 = vmatpush.msra.mxu3 %v4323_v56 }
 0x7cc   :  { %2146 = vmatpush.msra.mxu1 %v3966_v0  ;;  %v4343_v0 = vld [vmem:[#allocation9 + $0x260] sm:$0xff] }
 0x7cd   :  { %2217 = vmatpush.msrb.mxu2 %v4232_v52  ;;  %2237 = vmatpush.msra.mxu3 %v4328_v55 }
 0x7ce   :  { %2147 = vmatpush.msra.mxu1 %v3968_v30  ;;  %v4348_v30 = vld [vmem:[#allocation9 + $0x248] sm:$0xff] }
 0x7cf   :  { %2218 = vmatpush.msrb.mxu2 %v4237_v20  ;;  %2238 = vmatpush.msra.mxu3 %v4333_v26 }
 0x7d0   :  { %2148 = vmatpush.msra.mxu1 %v3972_v42  ;;  %v4353_v42 = vld [vmem:[#allocation9 + $0x230] sm:$0xff] }
 0x7d1   :  { %2219 = vmatpush.msrb.mxu2 %v4242_v45  ;;  %2239 = vmatpush.msra.mxu3 %v4338_v21 }
 0x7d2   :  { %2149 = vmatpush.msra.mxu1 %v3977_v49  ;;  %v4358_v49 = vld [vmem:[#allocation9 + $0x218] sm:$0xff] }
 0x7d3   :  { %2220 = vmatpush.msrb.mxu2 %v4247_v23  ;;  %2240 = vmatpush.msra.mxu3 %v4343_v0 }
 0x7d4   :  { %2150 = vmatpush.msra.mxu1 %v3983_v62  ;;  %v4363_v62 = vld [vmem:[#allocation9 + $0x200] sm:$0xff] }
 0x7d5   :  { %2221 = vmatpush.msrb.mxu2 %v4252_v27  ;;  %2241 = vmatpush.msra.mxu3 %v4348_v30 }
 0x7d6   :  { %2151 = vmatpush.msra.mxu1 %v3988_v46  ;;  %v4368_v46 = vld [vmem:[#allocation9 + $0x1e8] sm:$0xff] }
 0x7d7   :  { %2222 = vmatpush.msrb.mxu2 %v4257_v40  ;;  %2242 = vmatpush.msra.mxu3 %v4353_v42 }
 0x7d8   :  { %2152 = vmatpush.msra.mxu1 %v4000_v10  ;;  %v4373_v10 = vld [vmem:[#allocation9 + $0x1d0] sm:$0xff] }
 0x7d9   :  { %2223 = vmatpush.msrb.mxu2 %v4262_v47  ;;  %2243 = vmatpush.msra.mxu3 %v4358_v49 }
 0x7da   :  { %2153 = vmatpush.msra.mxu1 %v4004_v8  ;;  %v4378_v8 = vld [vmem:[#allocation9 + $0x1b8] sm:$0xff] }
 0x7db   :  { %2224 = vmatpush.msrb.mxu2 %v4267_v58  ;;  %2244 = vmatpush.msra.mxu3 %v4363_v62 }
 0x7dc   :  { %2154 = vmatpush.msra.mxu1 %v4009_v11  ;;  %v4383_v11 = vld [vmem:[#allocation9 + $0x1a0] sm:$0xff] }
 0x7dd   :  { %2225 = vmatpush.msrb.mxu2 %v4272_v13  ;;  %2245 = vmatpush.msra.mxu3 %v4368_v46 }
 0x7de   :  { %2155 = vmatpush.msra.mxu1 %v4697_v39  ;;  %v4388_v39 = vld [vmem:[#allocation9 + $0x188] sm:$0xff] }
 0x7df   :  { %2226 = vmatpush.msrb.mxu2 %v4277_v29  ;;  %2246 = vmatpush.msra.mxu3 %v4373_v10 }
 0x7e0   :  { %2156 = vmatpush.msra.mxu1 %v4698_v50  ;;  %v4715_v50 = vld [vmem:[#allocation37_spill] sm:$0xff] }
 0x7e1   :  { %2227 = vmatpush.msrb.mxu2 %v4282_v28  ;;  %2247 = vmatpush.msra.mxu3 %v4378_v8  ;;  %v1425_v60 = vadd.f32 %v4715_v50, %v4712_v31 }
 0x7e2   :  { %2157 = vmatpush.msra.mxu1 %v4699_v5 }
 0x7e3   :  { %2228 = vmatpush.msrb.mxu2 %v4287_v36  ;;  %2248 = vmatpush.msra.mxu3 %v4383_v11 }
 0x7e4   :  { %2158 = vmatpush.msra.mxu1 %v4701_v51 }
 0x7e5   :  { %2229 = vmatpush.msrb.mxu2 %v4292_v44  ;;  %2249 = vmatpush.msra.mxu3 %v4388_v39 }
 0x842   :  { %v1898_v14 = vpop.f32.mrf.mxu1 }
 0x843   :  { %v1941_v33 = vadd.f32 %v1898_v14, %v1425_v60 }
 0x845   :  { %v2516_v5 = vmul.f32 -1.442695, %v1941_v33  ;;  %v1507_v33 = vadd.f32 %v4185_v19, %v4124_v35 }
 0x847   :  { %2652 = vpow2.f32 %v2516_v5 }
 0x848   :  { %v1918_v43 = vpop.f32.mrf.mxu2 }
 0x849   :  { %v1942_v53 = vadd.f32 %v1918_v43, %v1466_v25  ;;  %v1938_v18 = vpop.f32.mrf.mxu3 }
 0x84a   :  { %v1981_v14 = vadd.f32 %v4122_v54, %v1938_v18 }
 0x84b   :  { %v2517_v16 = vmul.f32 -1.442695, %v1942_v53 }
 0x84d   :  { %v2653_v51 = vpop.eup %2652  ;;  %2654 = vpow2.f32 %v2517_v16 }
 0x84e   :  { %v1949_v57 = vadd.f32 1.0, %v2653_v51 }
 0x850   :  { %2656 = vrcp.f32 %v1949_v57  ;;  %v1962_v41 = vand.u32 2147483648, %v1949_v57  ;;  %v1960_v3 = vand.u32 2147483647, %v1949_v57  ;;  %vm1956_vm9 = vweird.f32 %v1949_v57 }
 0x852   :  { %v1963_v12 = vor.u32 1.1754944e-38, %v1962_v41  ;;  %vm1961_vm11 = vcmp.eq.f32.partialorder %v1960_v3, 8.507059e+37 }
 0x853   :  { %v2655_v4 = vpop.eup %2654 }
 0x854   :  { %v1950_v2 = vadd.f32 1.0, %v2655_v4 }
 0x856   :  { %v2657_v15 = vpop.eup %2656  ;;  %2658 = vrcp.f32 %v1950_v2  ;;  %v1977_v43 = vand.u32 2147483648, %v1950_v2  ;;  %v1975_v16 = vand.u32 2147483647, %v1950_v2  ;;  %vm1971_vm13 = vweird.f32 %v1950_v2 }
 0x857   :  { %v1952_v59 = vmul.f32 %v2657_v15, %v1949_v57  ;;  %vm1957_vm8 = vweird.f32 %v2657_v15 }
 0x858   :  { %vm1958_vm10 = vmor %vm1956_vm9, %vm1957_vm8  ;;  %v1978_v57 = vor.u32 1.1754944e-38, %v1977_v43  ;;  %vm1976_vm15 = vcmp.eq.f32.partialorder %v1975_v16, 8.507059e+37 }
 0x859   :  { %v1953_v7 = vsub.f32 1.0, %v1952_v59 }
 0x85b   :  { %v1954_v9 = vmul.f32 %v2657_v15, %v1953_v7 }
 0x85c   :  { %v2659_v34 = vpop.eup %2658 }
 0x85d   :  { %v1967_v32 = vmul.f32 %v2659_v34, %v1950_v2  ;;  %v1955_v6 = vadd.f32 %v2657_v15, %v1954_v9  ;;  %vm1972_vm12 = vweird.f32 %v2659_v34  ;;  %v4407_v2 = vld [vmem:[#allocation9 + $0x2e0] sm:$0xff] }
 0x85e   :  { %vm1973_vm14 = vmor %vm1971_vm13, %vm1972_vm12 }
 0x85f   :  { %v1968_v50 = vsub.f32 1.0, %v1967_v32  ;;  %v1959_v60 = vsel %vm1958_vm10, %v2657_v15, %v1955_v6 }
 0x860   :  { %v1964_v5 = vsel %vm1961_vm11, %v1963_v12, %v1959_v60 }
 0x861   :  { %v1969_v25 = vmul.f32 %v2659_v34, %v1968_v50  ;;  %v1982_v53 = vmul.f32 %v1981_v14, %v1964_v5 }
 0x863   :  { %v1970_v51 = vadd.f32 %v2659_v34, %v1969_v25  ;;  %v1983_v4 = vadd.f32 %v1982_v53, %v1507_v33  ;;  %v4717_v25 = vld [vmem:[#allocation19_spill] sm:$0xff] }
 0x864   :  { %v1510_v43 = vadd.f32 %v4717_v25, %v4124_v35 }
 0x865   :  { %v1974_v59 = vsel %vm1973_vm14, %v2659_v34, %v1970_v51  ;;  %2660 = vtanh.f32 %v1983_v4  ;;  %v4417_v34 = vld [vmem:[#allocation9 + $0x2b0] sm:$0xff] }
 0x866   :  { %v1979_v15 = vsel %vm1976_vm15, %v1978_v57, %v1974_v59 }
 0x867   :  { %v1985_v7 = vsub.f32 1.0, %v1979_v15  ;;  %v1987_v19 = vmul.f32 %v1979_v15, %v4304_v63  ;;  %v4412_v63 = vld [vmem:[#allocation9 + $0x2c8] sm:$0xff] }
 0x86b   :  { %v2661_v41 = vpop.eup %2660 }
 0x86c   :  { %v1986_v9 = vmul.f32 %v2661_v41, %v1985_v7 }
 0x86e   :  { %v4399_v3 = vadd.f32 %v1987_v19, %v1986_v9 }
 0x870   :  { %2008 = vmatmul.f32.vlgmr.msra.gmra.mxu0 %v4399_v3  ;;  %2028 = vmatmul.f32.vlgmr.msrb.gmra.mxu1 %v4399_v3 }
 0x871   :  { %2048 = vmatmul.f32.vlgmr.msra.gmra.mxu2 %v4399_v3  ;;  %2254 = vmatpush.msra.mxu0 %v4309_v22 }
 0x872   :  { %2325 = vmatpush.msrb.mxu1 %v4217_v48  ;;  %2345 = vmatpush.msra.mxu2 %v4313_v1  ;;  %v4422_v48 = vld [vmem:[#allocation9 + $0x298] sm:$0xff]  ;;  %v1469_v1 = vadd.f32 %v4191_v17, %v4711_v38 }
 0x873   :  { %2255 = vmatpush.msra.mxu0 %v4407_v2 }
 0x874   :  { %2326 = vmatpush.msrb.mxu1 %v4222_v24  ;;  %2346 = vmatpush.msra.mxu2 %v4318_v37  ;;  %v4427_v24 = vld [vmem:[#allocation9 + $0x280] sm:$0xff] }
 0x875   :  { %2256 = vmatpush.msra.mxu0 %v4412_v63 }
 0x876   :  { %2327 = vmatpush.msrb.mxu1 %v4227_v61  ;;  %2347 = vmatpush.msra.mxu2 %v4323_v56  ;;  %v4432_v61 = vld [vmem:[#allocation9 + $0x268] sm:$0xff] }
 0x877   :  { %2257 = vmatpush.msra.mxu0 %v4417_v34 }
 0x878   :  { %2328 = vmatpush.msrb.mxu1 %v4232_v52  ;;  %2348 = vmatpush.msra.mxu2 %v4328_v55  ;;  %v4437_v52 = vld [vmem:[#allocation9 + $0x250] sm:$0xff] }
 0x879   :  { %2258 = vmatpush.msra.mxu0 %v4422_v48 }
 0x87a   :  { %2329 = vmatpush.msrb.mxu1 %v4237_v20  ;;  %2349 = vmatpush.msra.mxu2 %v4333_v26  ;;  %v4442_v20 = vld [vmem:[#allocation9 + $0x238] sm:$0xff] }
 0x87b   :  { %2259 = vmatpush.msra.mxu0 %v4427_v24 }
 0x87c   :  { %2330 = vmatpush.msrb.mxu1 %v4242_v45  ;;  %2350 = vmatpush.msra.mxu2 %v4338_v21  ;;  %v4447_v45 = vld [vmem:[#allocation9 + $0x220] sm:$0xff] }
 0x87d   :  { %2260 = vmatpush.msra.mxu0 %v4432_v61 }
 0x87e   :  { %2331 = vmatpush.msrb.mxu1 %v4247_v23  ;;  %2351 = vmatpush.msra.mxu2 %v4343_v0  ;;  %v4452_v23 = vld [vmem:[#allocation9 + $0x208] sm:$0xff] }
 0x87f   :  { %2261 = vmatpush.msra.mxu0 %v4437_v52 }
 0x880   :  { %2332 = vmatpush.msrb.mxu1 %v4252_v27  ;;  %2352 = vmatpush.msra.mxu2 %v4348_v30  ;;  %v4457_v27 = vld [vmem:[#allocation9 + $0x1f0] sm:$0xff] }
 0x881   :  { %2262 = vmatpush.msra.mxu0 %v4442_v20 }
 0x882   :  { %2333 = vmatpush.msrb.mxu1 %v4257_v40  ;;  %2353 = vmatpush.msra.mxu2 %v4353_v42  ;;  %v4462_v40 = vld [vmem:[#allocation9 + $0x1d8] sm:$0xff] }
 0x883   :  { %2263 = vmatpush.msra.mxu0 %v4447_v45 }
 0x884   :  { %2334 = vmatpush.msrb.mxu1 %v4262_v47  ;;  %2354 = vmatpush.msra.mxu2 %v4358_v49  ;;  %v4467_v47 = vld [vmem:[#allocation9 + $0x1c0] sm:$0xff] }
 0x885   :  { %2264 = vmatpush.msra.mxu0 %v4452_v23 }
 0x886   :  { %2335 = vmatpush.msrb.mxu1 %v4267_v58  ;;  %2355 = vmatpush.msra.mxu2 %v4363_v62  ;;  %v4472_v58 = vld [vmem:[#allocation9 + $0x1a8] sm:$0xff] }
 0x887   :  { %2265 = vmatpush.msra.mxu0 %v4457_v27 }
 0x888   :  { %2336 = vmatpush.msrb.mxu1 %v4272_v13  ;;  %2356 = vmatpush.msra.mxu2 %v4368_v46  ;;  %v4477_v13 = vld [vmem:[#allocation9 + $0x190] sm:$0xff] }
 0x889   :  { %2266 = vmatpush.msra.mxu0 %v4462_v40 }
 0x88a   :  { %2337 = vmatpush.msrb.mxu1 %v4277_v29  ;;  %2357 = vmatpush.msra.mxu2 %v4373_v10  ;;  %v4716_v29 = vld [vmem:[#allocation31_spill] sm:$0xff] }
 0x88b   :  { %2267 = vmatpush.msra.mxu0 %v4467_v47 }
 0x88c   :  { %2338 = vmatpush.msrb.mxu1 %v4282_v28  ;;  %2358 = vmatpush.msra.mxu2 %v4378_v8  ;;  %v1428_v28 = vadd.f32 %v4716_v29, %v4712_v31 }
 0x88d   :  { %2268 = vmatpush.msra.mxu0 %v4472_v58 }
 0x88e   :  { %2339 = vmatpush.msrb.mxu1 %v4287_v36  ;;  %2359 = vmatpush.msra.mxu2 %v4383_v11 }
 0x88f   :  { %2269 = vmatpush.msra.mxu0 %v4477_v13 }
 0x890   :  { %2340 = vmatpush.msrb.mxu1 %v4292_v44  ;;  %2360 = vmatpush.msra.mxu2 %v4388_v39 }
 0x8ed   :  { %v2009_v37 = vpop.f32.mrf.mxu0  ;;  %v2029_v56 = vpop.f32.mrf.mxu1 }
 0x8ee   :  { %v2052_v55 = vadd.f32 %v2009_v37, %v1428_v28  ;;  %v2053_v36 = vadd.f32 %v2029_v56, %v1469_v1 }
 0x8f0   :  { %v2518_v26 = vmul.f32 -1.442695, %v2052_v55  ;;  %v2519_v21 = vmul.f32 -1.442695, %v2053_v36 }
 0x8f2   :  { %2662 = vpow2.f32 %v2518_v26 }
 0x8f3   :  { %2664 = vpow2.f32 %v2519_v21 }
 0x8f4   :  { %v2049_v6 = vpop.f32.mrf.mxu2 }
 0x8f5   :  { %v2092_v14 = vadd.f32 %v4122_v54, %v2049_v6 }
 0x8f8   :  { %v2663_v0 = vpop.eup %2662 }
 0x8f9   :  { %v2665_v30 = vpop.eup %2664  ;;  %v2060_v42 = vadd.f32 1.0, %v2663_v0 }
 0x8fa   :  { %v2061_v44 = vadd.f32 1.0, %v2665_v30  ;;  %v4518_v30 = vld [vmem:[%s4554_s4 + $0x1] ss:$0 sm:$0xff] }
 0x8fb   :  { %2666 = vrcp.f32 %v2060_v42  ;;  %v2073_v11 = vand.u32 2147483648, %v2060_v42  ;;  %v2071_v18 = vand.u32 2147483647, %v2060_v42  ;;  %vm2067_vm1 = vweird.f32 %v2060_v42 }
 0x8fc   :  { %2668 = vrcp.f32 %v2061_v44  ;;  %v2088_v16 = vand.u32 2147483648, %v2061_v44  ;;  %vm2082_vm5 = vweird.f32 %v2061_v44  ;;  %v2086_v51 = vand.u32 2147483647, %v2061_v44 }
 0x8fd   :  { %v2074_v50 = vor.u32 1.1754944e-38, %v2073_v11  ;;  %vm2072_vm3 = vcmp.eq.f32.partialorder %v2071_v18, 8.507059e+37 }
 0x8fe   :  { %v2089_v59 = vor.u32 1.1754944e-38, %v2088_v16  ;;  %vm2087_vm7 = vcmp.eq.f32.partialorder %v2086_v51, 8.507059e+37 }
 0x901   :  { %v2667_v49 = vpop.eup %2666 }
 0x902   :  { %v2669_v62 = vpop.eup %2668  ;;  %v2063_v46 = vmul.f32 %v2667_v49, %v2060_v42  ;;  %vm2068_vm0 = vweird.f32 %v2667_v49 }
 0x903   :  { %v2078_v10 = vmul.f32 %v2669_v62, %v2061_v44  ;;  %vm2069_vm2 = vmor %vm2067_vm1, %vm2068_vm0  ;;  %vm2083_vm4 = vweird.f32 %v2669_v62 }
 0x904   :  { %v2064_v8 = vsub.f32 1.0, %v2063_v46  ;;  %vm2084_vm6 = vmor %vm2082_vm5, %vm2083_vm4  ;;  %v4720_v46 = vld [vmem:[#allocation18_spill] sm:$0xff] }
 0x905   :  { %v2079_v17 = vsub.f32 1.0, %v2078_v10  ;;  %v1513_v10 = vadd.f32 %v4720_v46, %v4124_v35  ;;  %v2447_v46 = vld [vmem:[#allocation12 + $0x70] sm:$0xff] }
 0x906   :  { %v2065_v39 = vmul.f32 %v2667_v49, %v2064_v8 }
 0x907   :  { %v2080_v32 = vmul.f32 %v2669_v62, %v2079_v17 }
 0x908   :  { %v2066_v12 = vadd.f32 %v2667_v49, %v2065_v39 }
 0x909   :  { %v2081_v5 = vadd.f32 %v2669_v62, %v2080_v32 }
 0x90a   :  { %v2070_v60 = vsel %vm2069_vm2, %v2667_v49, %v2066_v12 }
 0x90b   :  { %v2075_v33 = vsel %vm2072_vm3, %v2074_v50, %v2070_v60  ;;  %v2085_v57 = vsel %vm2084_vm6, %v2669_v62, %v2081_v5  ;;  %v4721_v5 = vld [vmem:[#allocation39_spill] sm:$0xff] }
 0x90c   :  { %v2093_v53 = vmul.f32 %v2092_v14, %v2075_v33  ;;  %v2090_v15 = vsel %vm2087_vm7, %v2089_v59, %v2085_v57  ;;  %v1434_v25 = vadd.f32 %v4721_v5, %v4712_v31  ;;  %v4725_v5 = vld [vmem:[#allocation36_spill] sm:$0xff] }
 0x90d   :  { %v2096_v7 = vsub.f32 1.0, %v2090_v15  ;;  %v2098_v9 = vmul.f32 %v2090_v15, %v4399_v3 }
 0x90e   :  { %v2094_v4 = vadd.f32 %v2093_v53, %v1510_v43  ;;  %v4722_v43 = vld [vmem:[#allocation21_spill] sm:$0xff] }
 0x90f   :  { %v1475_v53 = vadd.f32 %v4722_v43, %v4711_v38  ;;  %v2438_v43 = vld [vmem:[#allocation12 + $0x28] sm:$0xff] }
 0x910   :  { %2670 = vtanh.f32 %v2094_v4 }
 0x916   :  { %v2671_v41 = vpop.eup %2670 }
 0x917   :  { %v2097_v54 = vmul.f32 %v2671_v41, %v2096_v7 }
 0x919   :  { %v4490_v19 = vadd.f32 %v2098_v9, %v2097_v54 }
 0x91b   :  { %2119 = vmatmul.f32.vlgmr.msrb.gmra.mxu3 %v4490_v19  ;;  %2139 = vmatmul.f32.vlgmr.msrb.gmra.mxu0 %v4490_v19 }
 0x91c   :  { %2159 = vmatmul.f32.vlgmr.msra.gmra.mxu1 %v4490_v19  ;;  %2365 = vmatpush.msrb.mxu3 %v4309_v22  ;;  %v4718_v22 = vld [vmem:[#allocation32_spill] sm:$0xff] }
 0x91d   :  { %v1472_v3 = vadd.f32 %v4718_v22, %v4711_v38 }
 0x91e   :  { %2366 = vmatpush.msrb.mxu3 %v4407_v2 }
 0x920   :  { %2367 = vmatpush.msrb.mxu3 %v4412_v63 }
 0x922   :  { %2368 = vmatpush.msrb.mxu3 %v4417_v34 }
 0x924   :  { %2369 = vmatpush.msrb.mxu3 %v4422_v48  ;;  %v4719_v48 = vld [vmem:[#allocation22_spill] sm:$0xff] }
 0x926   :  { %2370 = vmatpush.msrb.mxu3 %v4427_v24  ;;  %v1431_v24 = vadd.f32 %v4719_v48, %v4712_v31 }
 0x928   :  { %2371 = vmatpush.msrb.mxu3 %v4432_v61 }
 0x92a   :  { %2372 = vmatpush.msrb.mxu3 %v4437_v52 }
 0x92c   :  { %2373 = vmatpush.msrb.mxu3 %v4442_v20 }
 0x92e   :  { %2374 = vmatpush.msrb.mxu3 %v4447_v45 }
 0x930   :  { %2375 = vmatpush.msrb.mxu3 %v4452_v23 }
 0x932   :  { %2376 = vmatpush.msrb.mxu3 %v4457_v27 }
 0x934   :  { %2377 = vmatpush.msrb.mxu3 %v4462_v40 }
 0x936   :  { %2378 = vmatpush.msrb.mxu3 %v4467_v47 }
 0x938   :  { %2379 = vmatpush.msrb.mxu3 %v4472_v58 }
 0x93a   :  { %2380 = vmatpush.msrb.mxu3 %v4477_v13 }
 0x998   :  { %v2140_v2 = vpop.f32.mrf.mxu0 }
 0x999   :  { %v2164_v63 = vadd.f32 %v2140_v2, %v1472_v3  ;;  %v2160_v26 = vpop.f32.mrf.mxu1 }
 0x99a   :  { %v2203_v42 = vadd.f32 %v4518_v30, %v2160_v26 }
 0x99b   :  { %v2521_v34 = vmul.f32 -1.442695, %v2164_v63 }
 0x99d   :  { %2672 = vpow2.f32 %v2521_v34 }
 0x99e   :  { %v2120_v61 = vpop.f32.mrf.mxu3 }
 0x99f   :  { %v2163_v52 = vadd.f32 %v2120_v61, %v1431_v24 }
 0x9a1   :  { %v2520_v20 = vmul.f32 -1.442695, %v2163_v52 }
 0x9a3   :  { %v2673_v45 = vpop.eup %2672  ;;  %2674 = vpow2.f32 %v2520_v20 }
 0x9a4   :  { %v2172_v23 = vadd.f32 1.0, %v2673_v45 }
 0x9a6   :  { %2676 = vrcp.f32 %v2172_v23  ;;  %v2199_v8 = vand.u32 2147483648, %v2172_v23  ;;  %vm2193_vm13 = vweird.f32 %v2172_v23  ;;  %v2197_v11 = vand.u32 2147483647, %v2172_v23 }
 0x9a8   :  { %v2200_v32 = vor.u32 1.1754944e-38, %v2199_v8  ;;  %vm2198_vm15 = vcmp.eq.f32.partialorder %v2197_v11, 8.507059e+37  ;;  %v2445_v8 = vld [vmem:[#allocation12 + $0x60] sm:$0xff]  ;;  %v2443_v11 = vld [vmem:[#allocation12 + $0x50] sm:$0xff] }
 0x9a9   :  { %v2675_v27 = vpop.eup %2674 }
 0x9aa   :  { %v2171_v40 = vadd.f32 1.0, %v2675_v27 }
 0x9ac   :  { %2678 = vrcp.f32 %v2171_v40  ;;  %v2677_v47 = vpop.eup %2676  ;;  %v2184_v37 = vand.u32 2147483648, %v2171_v40  ;;  %v2182_v55 = vand.u32 2147483647, %v2171_v40  ;;  %vm2178_vm9 = vweird.f32 %v2171_v40 }
 0x9ad   :  { %v2189_v58 = vmul.f32 %v2677_v47, %v2172_v23  ;;  %vm2194_vm12 = vweird.f32 %v2677_v47 }
 0x9ae   :  { %v2185_v0 = vor.u32 1.1754944e-38, %v2184_v37  ;;  %vm2183_vm11 = vcmp.eq.f32.partialorder %v2182_v55, 8.507059e+37  ;;  %vm2195_vm14 = vmor %vm2193_vm13, %vm2194_vm12 }
 0x9af   :  { %v2190_v28 = vsub.f32 1.0, %v2189_v58 }
 0x9b1   :  { %v2191_v36 = vmul.f32 %v2677_v47, %v2190_v28 }
 0x9b2   :  { %v2679_v13 = vpop.eup %2678 }
 0x9b3   :  { %v2174_v29 = vmul.f32 %v2679_v13, %v2171_v40  ;;  %vm2179_vm8 = vweird.f32 %v2679_v13  ;;  %v2192_v49 = vadd.f32 %v2677_v47, %v2191_v36 }
 0x9b4   :  { %vm2180_vm10 = vmor %vm2178_vm9, %vm2179_vm8 }
 0x9b5   :  { %v2175_v1 = vsub.f32 1.0, %v2174_v29  ;;  %v2196_v18 = vsel %vm2195_vm14, %v2677_v47, %v2192_v49 }
 0x9b6   :  { %v2201_v6 = vsel %vm2198_vm15, %v2200_v32, %v2196_v18  ;;  %v4724_v18 = vld [vmem:[#allocation38_spill] sm:$0xff] }
 0x9b7   :  { %v2176_v56 = vmul.f32 %v2679_v13, %v2175_v1  ;;  %v2207_v12 = vsub.f32 1.0, %v2201_v6  ;;  %v2209_v14 = vmul.f32 %v2201_v6, %v4490_v19  ;;  %v1437_v32 = vadd.f32 %v4724_v18, %v4712_v31  ;;  %v2441_v6 = vld [vmem:[#allocation12 + $0x40] sm:$0xff] }
 0x9b9   :  { %v2177_v21 = vadd.f32 %v2679_v13, %v2176_v56 }
 0x9bb   :  { %v2181_v44 = vsel %vm2180_vm10, %v2679_v13, %v2177_v21  ;;  %v4723_v13 = vld [vmem:[#allocation40_spill] sm:$0xff] }
 0x9bc   :  { %v2186_v62 = vsel %vm2183_vm11, %v2185_v0, %v2181_v44  ;;  %v1516_v29 = vadd.f32 %v4723_v13, %v4124_v35 }
 0x9bd   :  { %v2204_v17 = vmul.f32 %v2203_v42, %v2186_v62  ;;  %v2448_v62 = vld [vmem:[#allocation12 + $0x78] sm:$0xff] }
 0x9be   :  { %2453 = vmatpush.msrb.mxu0 %v2448_v62 }
 0x9bf   :  { %v2205_v39 = vadd.f32 %v2204_v17, %v1513_v10  ;;  %v2446_v10 = vld [vmem:[#allocation12 + $0x68] sm:$0xff]  ;;  %v2444_v17 = vld [vmem:[#allocation12 + $0x58] sm:$0xff] }
 0x9c0   :  { %2454 = vmatpush.msrb.mxu0 %v2447_v46 }
 0x9c1   :  { %2680 = vtanh.f32 %v2205_v39  ;;  %v2442_v39 = vld [vmem:[#allocation12 + $0x48] sm:$0xff] }
 0x9c2   :  { %2455 = vmatpush.msrb.mxu0 %v2446_v10 }
 0x9c4   :  { %2456 = vmatpush.msrb.mxu0 %v2445_v8 }
 0x9c6   :  { %2457 = vmatpush.msrb.mxu0 %v2444_v17 }
 0x9c7   :  { %v2681_v50 = vpop.eup %2680 }
 0x9c8   :  { %v2208_v60 = vmul.f32 %v2681_v50, %v2207_v12  ;;  %2458 = vmatpush.msrb.mxu0 %v2443_v11 }
 0x9ca   :  { %v2210_v33 = vadd.f32 %v2209_v14, %v2208_v60  ;;  %2459 = vmatpush.msrb.mxu0 %v2442_v39  ;;  %v2440_v60 = vld [vmem:[#allocation12 + $0x38] sm:$0xff] }
 0x9cc   :  { %2230 = vmatmul.f32.vlgmr.msrb.gmra.mxu2 %v2210_v33  ;;  %2250 = vmatmul.f32.vlgmr.msra.gmra.mxu3 %v2210_v33 }
 0x9cd   :  { %2270 = vmatmul.f32.vlgmr.msra.gmra.mxu0 %v2210_v33 }
 0x9ce   :  { %2460 = vmatpush.msrb.mxu0 %v2441_v6 }
 0x9d0   :  { %2461 = vmatpush.msrb.mxu0 %v2440_v60 }
 0xa4a   :  { %v2271_v52 = vpop.f32.mrf.mxu0 }
 0xa4b   :  { %v2314_v27 = vadd.f32 %v4518_v30, %v2271_v52 }
 0xa4f   :  { %v2231_v16 = vpop.f32.mrf.mxu2  ;;  %v2251_v51 = vpop.f32.mrf.mxu3 }
 0xa50   :  { %v2274_v4 = vadd.f32 %v2231_v16, %v1434_v25  ;;  %v2275_v57 = vadd.f32 %v2251_v51, %v1475_v53  ;;  %v1478_v25 = vadd.f32 %v4725_v5, %v4711_v38  ;;  %v2437_v51 = vld [vmem:[#allocation12 + $0x20] sm:$0xff] }
 0xa52   :  { %v2522_v59 = vmul.f32 -1.442695, %v2274_v4  ;;  %v2523_v15 = vmul.f32 -1.442695, %v2275_v57  ;;  %v2436_v4 = vld [vmem:[#allocation12 + $0x18] sm:$0xff]  ;;  %v2435_v57 = vld [vmem:[#allocation12 + $0x10] sm:$0xff] }
 0xa54   :  { %2682 = vpow2.f32 %v2522_v59 }
 0xa55   :  { %2684 = vpow2.f32 %v2523_v15  ;;  %v2434_v15 = vld [vmem:[#allocation12 + $0x8] sm:$0xff] }
 0xa5a   :  { %v2683_v7 = vpop.eup %2682 }
 0xa5b   :  { %v2685_v41 = vpop.eup %2684  ;;  %v2282_v54 = vadd.f32 1.0, %v2683_v7 }
 0xa5c   :  { %v2283_v9 = vadd.f32 1.0, %v2685_v41  ;;  %v2433_v41 = vld [vmem:[#allocation12] sm:$0xff] }
 0xa5d   :  { %2686 = vrcp.f32 %v2282_v54  ;;  %v2295_v34 = vand.u32 2147483648, %v2282_v54  ;;  %v2293_v61 = vand.u32 2147483647, %v2282_v54  ;;  %vm2289_vm1 = vweird.f32 %v2282_v54 }
 0xa5e   :  { %2688 = vrcp.f32 %v2283_v9  ;;  %v2310_v28 = vand.u32 2147483648, %v2283_v9  ;;  %vm2304_vm5 = vweird.f32 %v2283_v9  ;;  %v2308_v37 = vand.u32 2147483647, %v2283_v9 }
 0xa5f   :  { %v2296_v23 = vor.u32 1.1754944e-38, %v2295_v34  ;;  %vm2294_vm3 = vcmp.eq.f32.partialorder %v2293_v61, 8.507059e+37 }
 0xa60   :  { %v2311_v36 = vor.u32 1.1754944e-38, %v2310_v28  ;;  %vm2309_vm7 = vcmp.eq.f32.partialorder %v2308_v37, 8.507059e+37 }
 0xa63   :  { %v2687_v19 = vpop.eup %2686 }
 0xa64   :  { %v2689_v22 = vpop.eup %2688  ;;  %v2285_v3 = vmul.f32 %v2687_v19, %v2282_v54  ;;  %vm2290_vm0 = vweird.f32 %v2687_v19 }
 0xa65   :  { %v2300_v2 = vmul.f32 %v2689_v22, %v2283_v9  ;;  %vm2291_vm2 = vmor %vm2289_vm1, %vm2290_vm0  ;;  %vm2305_vm4 = vweird.f32 %v2689_v22 }
 0xa66   :  { %v2286_v63 = vsub.f32 1.0, %v2285_v3  ;;  %vm2306_vm6 = vmor %vm2304_vm5, %vm2305_vm4 }
 0xa67   :  { %v2301_v48 = vsub.f32 1.0, %v2300_v2 }
 0xa68   :  { %v2287_v24 = vmul.f32 %v2687_v19, %v2286_v63 }
 0xa69   :  { %v2302_v20 = vmul.f32 %v2689_v22, %v2301_v48 }
 0xa6a   :  { %v2288_v45 = vadd.f32 %v2687_v19, %v2287_v24 }
 0xa6b   :  { %v2303_v58 = vadd.f32 %v2689_v22, %v2302_v20 }
 0xa6c   :  { %v2292_v40 = vsel %vm2291_vm2, %v2687_v19, %v2288_v45 }
 0xa6d   :  { %v2297_v47 = vsel %vm2294_vm3, %v2296_v23, %v2292_v40  ;;  %v2307_v55 = vsel %vm2306_vm6, %v2689_v22, %v2303_v58 }
 0xa6e   :  { %v2315_v1 = vmul.f32 %v2314_v27, %v2297_v47  ;;  %v2312_v26 = vsel %vm2309_vm7, %v2311_v36, %v2307_v55  ;;  %v4726_v27 = vld [vmem:[#allocation34_spill] sm:$0xff] }
 0xa6f   :  { %v2318_v21 = vsub.f32 1.0, %v2312_v26  ;;  %v2320_v44 = vmul.f32 %v2312_v26, %v2210_v33  ;;  %v2439_v33 = vld [vmem:[#allocation12 + $0x30] sm:$0xff]  ;;  %v1519_v40 = vadd.f32 %v4726_v27, %v4124_v35 }
 0xa70   :  { %v2316_v56 = vadd.f32 %v2315_v1, %v1516_v29  ;;  %2462 = vmatpush.msrb.mxu0 %v2439_v33 }
 0xa72   :  { %2690 = vtanh.f32 %v2316_v56  ;;  %2463 = vmatpush.msrb.mxu0 %v2438_v43 }
 0xa74   :  { %2464 = vmatpush.msrb.mxu0 %v2437_v51 }
 0xa76   :  { %2465 = vmatpush.msrb.mxu0 %v2436_v4 }
 0xa78   :  { %v2691_v0 = vpop.eup %2690  ;;  %2466 = vmatpush.msrb.mxu0 %v2435_v57 }
 0xa79   :  { %v2319_v42 = vmul.f32 %v2691_v0, %v2318_v21 }
 0xa7a   :  { %2467 = vmatpush.msrb.mxu0 %v2434_v15 }
 0xa7b   :  { %v4531_v49 = vadd.f32 %v2320_v44, %v2319_v42  ;;  %v2541_v42 = vld [vmem:[%s4556_s6] ss:$0 sm:$0xff] }
 0xa7c   :  { %2468 = vmatpush.msrb.mxu0 %v2433_v41 }
 0xa7d   :  { %2341 = vmatmul.f32.vlgmr.msrb.gmra.mxu1 %v4531_v49  ;;  %2361 = vmatmul.f32.vlgmr.msra.gmra.mxu2 %v4531_v49 }
 0xa7e   :  { %2381 = vmatmul.f32.vlgmr.msrb.gmra.mxu3 %v4531_v49 }
 0xafa   :  { %v2342_v12 = vpop.f32.mrf.mxu1 }
 0xafb   :  { %v2385_v50 = vadd.f32 %v2342_v12, %v1437_v32 }
 0xafd   :  { %v2524_v14 = vmul.f32 -1.442695, %v2385_v50 }
 0xaff   :  { %2692 = vpow2.f32 %v2524_v14 }
 0xb00   :  { %v2362_v53 = vpop.f32.mrf.mxu2 }
 0xb01   :  { %v2386_v16 = vadd.f32 %v2362_v53, %v1478_v25  ;;  %v2382_v48 = vpop.f32.mrf.mxu3 }
 0xb02   :  { %v2425_v23 = vadd.f32 %v4518_v30, %v2382_v48 }
 0xb03   :  { %v2525_v31 = vmul.f32 -1.442695, %v2386_v16 }
 0xb05   :  { %v2693_v59 = vpop.eup %2692  ;;  %2694 = vpow2.f32 %v2525_v31 }
 0xb06   :  { %v2393_v7 = vadd.f32 1.0, %v2693_v59 }
 0xb08   :  { %2696 = vrcp.f32 %v2393_v7  ;;  %v2406_v3 = vand.u32 2147483648, %v2393_v7  ;;  %v2404_v63 = vand.u32 2147483647, %v2393_v7  ;;  %vm2400_vm9 = vweird.f32 %v2393_v7 }
 0xb0a   :  { %v2407_v52 = vor.u32 1.1754944e-38, %v2406_v3  ;;  %vm2405_vm11 = vcmp.eq.f32.partialorder %v2404_v63, 8.507059e+37 }
 0xb0b   :  { %v2695_v38 = vpop.eup %2694 }
 0xb0c   :  { %v2394_v54 = vadd.f32 1.0, %v2695_v38 }
 0xb0e   :  { %v2697_v9 = vpop.eup %2696  ;;  %2698 = vrcp.f32 %v2394_v54  ;;  %v2421_v13 = vand.u32 2147483648, %v2394_v54  ;;  %v2419_v28 = vand.u32 2147483647, %v2394_v54  ;;  %vm2415_vm13 = vweird.f32 %v2394_v54 }
 0xb0f   :  { %v2396_v19 = vmul.f32 %v2697_v9, %v2393_v7  ;;  %vm2401_vm8 = vweird.f32 %v2697_v9 }
 0xb10   :  { %vm2402_vm10 = vmor %vm2400_vm9, %vm2401_vm8  ;;  %v2422_v56 = vor.u32 1.1754944e-38, %v2421_v13  ;;  %vm2420_vm15 = vcmp.eq.f32.partialorder %v2419_v28, 8.507059e+37 }
 0xb11   :  { %v2397_v22 = vsub.f32 1.0, %v2396_v19 }
 0xb13   :  { %v2398_v2 = vmul.f32 %v2697_v9, %v2397_v22 }
 0xb14   :  { %v2699_v34 = vpop.eup %2698 }
 0xb15   :  { %v2411_v24 = vmul.f32 %v2699_v34, %v2394_v54  ;;  %v2399_v61 = vadd.f32 %v2697_v9, %v2398_v2  ;;  %vm2416_vm12 = vweird.f32 %v2699_v34 }
 0xb16   :  { %vm2417_vm14 = vmor %vm2415_vm13, %vm2416_vm12 }
 0xb17   :  { %v2412_v20 = vsub.f32 1.0, %v2411_v24  ;;  %v2403_v45 = vsel %vm2402_vm10, %v2697_v9, %v2399_v61 }
 0xb18   :  { %v2408_v47 = vsel %vm2405_vm11, %v2407_v52, %v2403_v45 }
 0xb19   :  { %v2413_v58 = vmul.f32 %v2699_v34, %v2412_v20  ;;  %v2426_v29 = vmul.f32 %v2425_v23, %v2408_v47 }
 0xb1b   :  { %v2414_v1 = vadd.f32 %v2699_v34, %v2413_v58  ;;  %v2427_v37 = vadd.f32 %v2426_v29, %v1519_v40 }
 0xb1d   :  { %v2418_v55 = vsel %vm2417_vm14, %v2699_v34, %v2414_v1  ;;  %2700 = vtanh.f32 %v2427_v37 }
 0xb1e   :  { %v2423_v36 = vsel %vm2420_vm15, %v2422_v56, %v2418_v55 }
 0xb1f   :  { %v2429_v26 = vsub.f32 1.0, %v2423_v36  ;;  %v2431_v35 = vmul.f32 %v2423_v36, %v4531_v49 }
 0xb23   :  { %v2701_v30 = vpop.eup %2700 }
 0xb24   :  { %v2430_v21 = vmul.f32 %v2701_v30, %v2429_v26 }
 0xb26   :  { %v2432_v0 = vadd.f32 %v2431_v35, %v2430_v21 }
 0xb28   :  { %2469 = vmatmul.f32.vlgmr.msrb.gmra.mxu0 %v2432_v0 }
 0xba5   :  { %v2470_v44 = vpop.f32.mrf.mxu0 }
 0xba6   :  { %v2471_v62 = vadd.f32 %v2541_v42, %v2470_v44 }
 0xba8   :  { %2473 = vst [vmem:[#allocation13] sm:$0xff] %v2471_v62 }
 0xba9   :  { %2484 = dma.vmem_to_hbm [thread:$0]  %s2480_s14, 128, %s2482_s16, [#allocation6]  }
 0xbaa   :  { %2950 = dma.done.wait [#allocation6], 128  }
 0xbab   :  { %2951 = vsyncadd [#allocation6], 4294967168 }
 0xbac   :  { %2489 = vsyncpa [#allocation5], 1 }
 0xbad   :  { %2490 = vsyncpa [#allocation8], 1 }
 0xbae   :  { %2491 = vsyncpa [#allocation11], 1 }
 0xbaf   :  { %2492 = vsyncpa [#allocation6], 1 }

</bundles_post_ra>
